<compile_context>
chip_gen: v6e
topology: v6e:2x2x1
jax: 0.10.0
libtpu: 0.0.40
codegen_flags: <defaults>
</compile_context>

<pallas_src>
import functools

import jax
import jax.numpy as jnp
from jax import lax
from jax.experimental import pallas as pl
from jax.experimental.pallas import tpu as pltpu

N_EMBD = 384                      # n_embd in the module
NUM_HEADS = 6
HEAD_SIZE = N_EMBD // NUM_HEADS   # 64
BLOCK_SIZE = 256                  # causal-mask capacity; T <= BLOCK_SIZE


# ----------------------------------------------------------------------------
# Fused kernel: QKV projection (all heads, Bb sub-batches) + causal softmax
# attention per head (query strips, deferred normalization) + concat (VMEM
# scratch) + output projection + bias.   grid = (B // Bb,)
# ----------------------------------------------------------------------------
def _mha_fused_kernel(x_ref, wqkv_ref, wp_ref, bp_ref, o_ref, cat_ref, *,
                      sub_batch, num_heads, head_size, q_strip):
    Bb = sub_batch
    H, hs = num_heads, head_size
    D = H * hs
    T = x_ref.shape[1]
    C = x_ref.shape[2]
    rows = Bb * T
    QS = q_strip                                  # query-strip length (<=128)

    # ---- fused QKV projection for all heads & sub-batches: (Bb*T,C)@(C,3D) ----
    x = x_ref[...].reshape(rows, C)                          # bf16 already
    qkv = jnp.dot(x, wqkv_ref[...],
                  preferred_element_type=jnp.float32)        # f32 accumulate
    qkv = qkv.astype(jnp.bfloat16)                           # single cast

    # ---- per-(sub-batch, query strip, head pair) attention ----
    for bi in range(Bb):
        base = bi * T
        for s in range(T // QS):
            q_lo = s * QS
            kv_len = (s + 1) * QS        # causal: later KV blocks fully masked
            # causal mask for this strip (global row index = q_lo + local row)
            row_idx = lax.broadcasted_iota(jnp.int32, (QS, kv_len), 0) + q_lo
            col_idx = lax.broadcasted_iota(jnp.int32, (QS, kv_len), 1)
            causal = col_idx <= row_idx

            for p in range(H // 2):                    # 128-lane head pairs
                outs = []
                for h in (2 * p, 2 * p + 1):
                    qh = qkv[base + q_lo:base + q_lo + QS, h * hs:(h + 1) * hs]
                    kh = qkv[base:base + kv_len, D + h * hs:D + (h + 1) * hs]
                    vh = qkv[base:base + kv_len,
                             2 * D + h * hs:2 * D + (h + 1) * hs]

                    # scale already folded into wq; contract on hs (no k.T)
                    wei = lax.dot_general(
                        qh, kh, dimension_numbers=(((1,), (1,)), ((), ())),
                        preferred_element_type=jnp.float32)   # (QS, kv_len)
                    wei = jnp.where(causal, wei, -jnp.inf)
                    # stable softmax; diagonal always unmasked -> no NaN
                    wei = wei - jnp.max(wei, axis=-1, keepdims=True)
                    pr = jnp.exp(wei)
                    l = jnp.sum(pr, axis=-1, keepdims=True)   # (QS, 1)
                    # attention dropout -> identity in eval mode
                    oh = jnp.dot(pr.astype(jnp.bfloat16), vh,
                                 preferred_element_type=jnp.float32)  # (QS, hs)
                    # deferred normalization on the small (QS, hs) output
                    outs.append(oh * pl.reciprocal(l, approx=True))

                pair = jnp.concatenate(outs, -1).astype(jnp.bfloat16)  # (QS,128)
                cat_ref[base + q_lo:base + q_lo + QS,
                        2 * p * hs:2 * (p + 1) * hs] = pair

    # ---- fused output projection + bias on all rows at once ----
    y = jnp.dot(cat_ref[...], wp_ref[...],
                preferred_element_type=jnp.float32)           # (rows, C)
    y = y + bp_ref[...]                                       # (1, C) broadcast
    # output dropout -> identity in eval mode
    o_ref[...] = y.reshape(Bb, T, C).astype(o_ref.dtype)


def _fuse_qkv_weights(wq, wk, wv, scale):
    """(H,C,hs) x3 -> (C, 3*H*hs) fused weight; softmax scale folded into q."""
    H, C, hs = wq.shape
    def stack(w):                                    # (H, C, hs) -> (C, H*hs)
        return jnp.transpose(w, (1, 0, 2)).reshape(C, H * hs)
    return jnp.concatenate([stack(wq) * scale, stack(wk), stack(wv)], axis=-1)


def _choose_sub_batch(B, T):
    """Largest Bb dividing B with Bb*T ~<= 256 rows, keeping >=2 grid steps."""
    target = max(1, 256 // max(T, 1))
    best = 1
    for bb in range(1, B + 1):
        if B % bb:
            continue
        if B >= 2 and B // bb < 2:          # keep >=2 parallel steps (v7x 2 TCs)
            continue
        if bb <= target:
            best = bb
    return best


def multi_head_attention(x, params):
    """x: (B,T,C); params = (wq, wk, wv, wp, bp) with wq/wk/wv: (H,C,hs)."""
    wq, wk, wv, wp, bp = params
    B, T, C = x.shape
    H, _, hs = wq.shape
    D = H * hs
    assert C == D, "n_embd must equal num_heads * head_size"
    assert T % 8 == 0 and T <= BLOCK_SIZE, "T must be a multiple of 8 and <= block_size"
    assert H % 2 == 0, "head pairing assumes an even number of heads"

    out_dtype = x.dtype
    scale = float(C) ** -0.5

    # One-time host-side weight fusion + bf16 cast; scale folded into q columns.
    wqkv = _fuse_qkv_weights(wq, wk, wv, scale).astype(jnp.bfloat16)   # (C, 3D)
    wp_b = wp.astype(jnp.bfloat16)                                     # (C, C)
    x_b = x.astype(jnp.bfloat16)              # halve input DMA; MXU ops are bf16

    Bb = _choose_sub_batch(B, T)
    QS = 128 if (T > 128 and T % 128 == 0) else T

    kernel = functools.partial(
        _mha_fused_kernel, sub_batch=Bb, num_heads=H, head_size=hs, q_strip=QS)

    # TODO(synk): on v7x (64 MiB VMEM), mark the three constant weight BlockSpecs
    # with pipeline_mode=pl.Buffered(1) to drop their second (never used) buffer.
    return pl.pallas_call(
        kernel,
        out_shape=jax.ShapeDtypeStruct((B, T, C), out_dtype),
        grid_spec=pltpu.PrefetchScalarGridSpec(
            num_scalar_prefetch=0,
            grid=(B // Bb,),
            in_specs=[
                pl.BlockSpec((Bb, T, C), lambda b: (b, 0, 0)),     # x (bf16)
                pl.BlockSpec((C, 3 * D), lambda b: (0, 0)),        # fused QKV w
                pl.BlockSpec((C, C), lambda b: (0, 0)),            # proj weight
                pl.BlockSpec((1, C), lambda b: (0, 0)),            # proj bias
            ],
            out_specs=pl.BlockSpec((Bb, T, C), lambda b: (b, 0, 0)),
            scratch_shapes=[pltpu.VMEM((Bb * T, D), jnp.bfloat16)],  # head concat
        ),
        compiler_params=pltpu.CompilerParams(
            dimension_semantics=("parallel",)),
    )(x_b, wqkv, wp_b, bp)


# ----------------------------------------------------------------------------
# Params + pure-JAX reference
# ----------------------------------------------------------------------------
def init_params(key, n_embd=N_EMBD, num_heads=NUM_HEADS, head_size=HEAD_SIZE):
    k1, k2, k3, k4, k5 = jax.random.split(key, 5)
    s = 0.02
    wq = s * jax.random.normal(k1, (num_heads, n_embd, head_size), jnp.float32)
    wk = s * jax.random.normal(k2, (num_heads, n_embd, head_size), jnp.float32)
    wv = s * jax.random.normal(k3, (num_heads, n_embd, head_size), jnp.float32)
    wp = s * jax.random.normal(k4, (n_embd, n_embd), jnp.float32)
    bp = s * jax.random.normal(k5, (1, n_embd), jnp.float32)
    return (wq, wk, wv, wp, bp)


def _reference(x, params):
    """Pure-JAX f32 reference with identical semantics (sanity check)."""
    wq, wk, wv, wp, bp = params
    B, T, C = x.shape
    outs = []
    for h in range(wq.shape[0]):
        q = x @ wq[h]
        k = x @ wk[h]
        v = x @ wv[h]
        wei = (q @ jnp.swapaxes(k, -1, -2)) * (C ** -0.5)
        mask = jnp.tril(jnp.ones((T, T)))
        wei = jnp.where(mask == 0, -jnp.inf, wei)
        wei = jax.nn.softmax(wei, axis=-1)
        outs.append(wei @ v)
    cat = jnp.concatenate(outs, axis=-1)
    return cat @ wp + bp


if __name__ == "__main__":
    key = jax.random.PRNGKey(0)
    kp = jax.random.fold_in(key, 1)
    params = init_params(kp)

    # (B, T) configs: single strip / Bb=1, Bb=2 sub-batching, two query strips.
    for i, (B, T) in enumerate([(2, 64), (4, 128), (2, 256)]):
        kx = jax.random.fold_in(key, 100 + i)
        x = jax.random.normal(kx, (B, T, N_EMBD), jnp.float32)

        out = multi_head_attention(x, params)
        out = jax.block_until_ready(out)

        ref = _reference(x, params)
        assert out.shape == (B, T, N_EMBD)
        # bf16 MXU operands + approx reciprocal -> loosened tolerance vs f32 ref.
        assert jnp.allclose(out, ref, atol=2e-2, rtol=2e-2), \
            f"mismatch vs reference at B={B}, T={T}"

    print("KERNEL_OK")
</pallas_src>

<mosaic_0001>
module attributes {stable_mosaic.version = 11 : i64} {
  func.func @_mha_fused_kernel(%arg0: i32, %arg1: memref<1x64x384xbf16, #tpu.memory_space<vmem>>, %arg2: memref<384x1152xbf16, #tpu.memory_space<vmem>>, %arg3: memref<384x384xbf16, #tpu.memory_space<vmem>>, %arg4: memref<1x384xf32, #tpu.memory_space<vmem>>, %arg5: memref<1x64x384xf32, #tpu.memory_space<vmem>>, %arg6: memref<64x384xbf16, #tpu.memory_space<vmem>>) attributes {dimension_semantics = [#tpu.dimension_semantics<parallel>], iteration_bounds = array<i64: 2>, scalar_prefetch = 0 : i64, scratch_operands = 1 : i64, tpu.core_type = #tpu.core_type<tc>, window_params = [{transform_indices = @transform_0, window_bounds = array<i64: 1, 64, 384>}, {pipeline_mode = #tpu.pipeline_mode<synchronous>, transform_indices = @transform_1, window_bounds = array<i64: 384, 1152>}, {pipeline_mode = #tpu.pipeline_mode<synchronous>, transform_indices = @transform_2, window_bounds = array<i64: 384, 384>}, {pipeline_mode = #tpu.pipeline_mode<synchronous>, transform_indices = @transform_3, window_bounds = array<i64: 1, 384>}, {transform_indices = @transform_4, window_bounds = array<i64: 1, 64, 384>}]} {
    %c0 = arith.constant 0 : index
    %c0_0 = arith.constant 0 : index
    %c0_1 = arith.constant 0 : index
    %0 = vector.load %arg1[%c0, %c0_0, %c0_1] : memref<1x64x384xbf16, #tpu.memory_space<vmem>>, vector<1x64x384xbf16>
    %1 = vector.shape_cast %0 : vector<1x64x384xbf16> to vector<64x384xbf16>
    %c0_2 = arith.constant 0 : index
    %c0_3 = arith.constant 0 : index
    %2 = vector.load %arg2[%c0_2, %c0_3] : memref<384x1152xbf16, #tpu.memory_space<vmem>>, vector<384x1152xbf16>
    %cst = arith.constant dense<0.000000e+00> : vector<64x1152xf32>
    %3 = tpu.matmul %1, %2, %cst {dimension_numbers = #tpu.dot_dimension_numbers<[1], [0], [0], [1], [0, 0, 1, 1], [], []>} : vector<64x384xbf16>, vector<384x1152xbf16>, vector<64x1152xf32> -> vector<64x1152xf32>
    %4 = arith.truncf %3 : vector<64x1152xf32> to vector<64x1152xbf16>
    %5 = tpu.iota {dimensions = array<i32: 0>} : vector<64x64xi32>
    %c0_i32 = arith.constant 0 : i32
    %6 = vector.broadcast %c0_i32 : i32 to vector<64x64xi32>
    %7 = arith.addi %5, %6 : vector<64x64xi32>
    %8 = tpu.iota {dimensions = array<i32: 1>} : vector<64x64xi32>
    %9 = arith.cmpi sle, %8, %7 : vector<64x64xi32>
    %10 = vector.extract_strided_slice %4 {offsets = [0, 0], sizes = [64, 64], strides = [1, 1]} : vector<64x1152xbf16> to vector<64x64xbf16>
    %11 = vector.extract_strided_slice %4 {offsets = [0, 384], sizes = [64, 64], strides = [1, 1]} : vector<64x1152xbf16> to vector<64x64xbf16>
    %12 = vector.extract_strided_slice %4 {offsets = [0, 768], sizes = [64, 64], strides = [1, 1]} : vector<64x1152xbf16> to vector<64x64xbf16>
    %cst_4 = arith.constant dense<0.000000e+00> : vector<64x64xf32>
    %13 = tpu.matmul %10, %11, %cst_4 {dimension_numbers = #tpu.dot_dimension_numbers<[1], [1], [0], [0], [0, 0, 1, 0], [], []>} : vector<64x64xbf16>, vector<64x64xbf16>, vector<64x64xf32> -> vector<64x64xf32>
    %cst_5 = arith.constant 0xFF800000 : f32
    %14 = vector.broadcast %cst_5 : f32 to vector<64x64xf32>
    %15 = arith.select %9, %13, %14 : vector<64x64xi1>, vector<64x64xf32>
    %cst_6 = arith.constant dense<0xFF800000> : vector<64xf32>
    %16 = vector.multi_reduction <maximumf>, %15, %cst_6 [1] : vector<64x64xf32> to vector<64xf32>
    %17 = vector.shape_cast %16 : vector<64xf32> to vector<64x1xf32>
    %18 = vector.broadcast %17 : vector<64x1xf32> to vector<64x64xf32>
    %19 = arith.subf %15, %18 : vector<64x64xf32>
    %20 = math.exp %19 : vector<64x64xf32>
    %cst_7 = arith.constant dense<0.000000e+00> : vector<64xf32>
    %21 = vector.multi_reduction <add>, %20, %cst_7 [1] : vector<64x64xf32> to vector<64xf32>
    %22 = vector.shape_cast %21 : vector<64xf32> to vector<64x1xf32>
    %23 = arith.truncf %20 : vector<64x64xf32> to vector<64x64xbf16>
    %cst_8 = arith.constant dense<0.000000e+00> : vector<64x64xf32>
    %24 = tpu.matmul %23, %12, %cst_8 {dimension_numbers = #tpu.dot_dimension_numbers<[1], [0], [0], [1], [0, 0, 1, 1], [], []>} : vector<64x64xbf16>, vector<64x64xbf16>, vector<64x64xf32> -> vector<64x64xf32>
    %25 = tpu.reciprocal %22 {approx = true} : vector<64x1xf32> -> vector<64x1xf32>
    %26 = vector.broadcast %25 : vector<64x1xf32> to vector<64x64xf32>
    %27 = arith.mulf %24, %26 : vector<64x64xf32>
    %28 = vector.extract_strided_slice %4 {offsets = [0, 64], sizes = [64, 64], strides = [1, 1]} : vector<64x1152xbf16> to vector<64x64xbf16>
    %29 = vector.extract_strided_slice %4 {offsets = [0, 448], sizes = [64, 64], strides = [1, 1]} : vector<64x1152xbf16> to vector<64x64xbf16>
    %30 = vector.extract_strided_slice %4 {offsets = [0, 832], sizes = [64, 64], strides = [1, 1]} : vector<64x1152xbf16> to vector<64x64xbf16>
    %cst_9 = arith.constant dense<0.000000e+00> : vector<64x64xf32>
    %31 = tpu.matmul %28, %29, %cst_9 {dimension_numbers = #tpu.dot_dimension_numbers<[1], [1], [0], [0], [0, 0, 1, 0], [], []>} : vector<64x64xbf16>, vector<64x64xbf16>, vector<64x64xf32> -> vector<64x64xf32>
    %cst_10 = arith.constant 0xFF800000 : f32
    %32 = vector.broadcast %cst_10 : f32 to vector<64x64xf32>
    %33 = arith.select %9, %31, %32 : vector<64x64xi1>, vector<64x64xf32>
    %cst_11 = arith.constant dense<0xFF800000> : vector<64xf32>
    %34 = vector.multi_reduction <maximumf>, %33, %cst_11 [1] : vector<64x64xf32> to vector<64xf32>
    %35 = vector.shape_cast %34 : vector<64xf32> to vector<64x1xf32>
    %36 = vector.broadcast %35 : vector<64x1xf32> to vector<64x64xf32>
    %37 = arith.subf %33, %36 : vector<64x64xf32>
    %38 = math.exp %37 : vector<64x64xf32>
    %cst_12 = arith.constant dense<0.000000e+00> : vector<64xf32>
    %39 = vector.multi_reduction <add>, %38, %cst_12 [1] : vector<64x64xf32> to vector<64xf32>
    %40 = vector.shape_cast %39 : vector<64xf32> to vector<64x1xf32>
    %41 = arith.truncf %38 : vector<64x64xf32> to vector<64x64xbf16>
    %cst_13 = arith.constant dense<0.000000e+00> : vector<64x64xf32>
    %42 = tpu.matmul %41, %30, %cst_13 {dimension_numbers = #tpu.dot_dimension_numbers<[1], [0], [0], [1], [0, 0, 1, 1], [], []>} : vector<64x64xbf16>, vector<64x64xbf16>, vector<64x64xf32> -> vector<64x64xf32>
    %43 = tpu.reciprocal %40 {approx = true} : vector<64x1xf32> -> vector<64x1xf32>
    %44 = vector.broadcast %43 : vector<64x1xf32> to vector<64x64xf32>
    %45 = arith.mulf %42, %44 : vector<64x64xf32>
    %46 = tpu.concatenate %27, %45 in 1 : vector<64x64xf32>, vector<64x64xf32> -> vector<64x128xf32>
    %47 = arith.truncf %46 : vector<64x128xf32> to vector<64x128xbf16>
    %c0_14 = arith.constant 0 : index
    %c0_15 = arith.constant 0 : index
    %48 = vector.load %arg6[%c0_14, %c0_15] : memref<64x384xbf16, #tpu.memory_space<vmem>>, vector<64x128xbf16>
    tpu.vector_store %arg6[%c0_14, %c0_15], %47 {strides = array<i32>} : memref<64x384xbf16, #tpu.memory_space<vmem>>, vector<64x128xbf16>,
    %49 = vector.extract_strided_slice %4 {offsets = [0, 128], sizes = [64, 64], strides = [1, 1]} : vector<64x1152xbf16> to vector<64x64xbf16>
    %50 = vector.extract_strided_slice %4 {offsets = [0, 512], sizes = [64, 64], strides = [1, 1]} : vector<64x1152xbf16> to vector<64x64xbf16>
    %51 = vector.extract_strided_slice %4 {offsets = [0, 896], sizes = [64, 64], strides = [1, 1]} : vector<64x1152xbf16> to vector<64x64xbf16>
    %cst_16 = arith.constant dense<0.000000e+00> : vector<64x64xf32>
    %52 = tpu.matmul %49, %50, %cst_16 {dimension_numbers = #tpu.dot_dimension_numbers<[1], [1], [0], [0], [0, 0, 1, 0], [], []>} : vector<64x64xbf16>, vector<64x64xbf16>, vector<64x64xf32> -> vector<64x64xf32>
    %cst_17 = arith.constant 0xFF800000 : f32
    %53 = vector.broadcast %cst_17 : f32 to vector<64x64xf32>
    %54 = arith.select %9, %52, %53 : vector<64x64xi1>, vector<64x64xf32>
    %cst_18 = arith.constant dense<0xFF800000> : vector<64xf32>
    %55 = vector.multi_reduction <maximumf>, %54, %cst_18 [1] : vector<64x64xf32> to vector<64xf32>
    %56 = vector.shape_cast %55 : vector<64xf32> to vector<64x1xf32>
    %57 = vector.broadcast %56 : vector<64x1xf32> to vector<64x64xf32>
    %58 = arith.subf %54, %57 : vector<64x64xf32>
    %59 = math.exp %58 : vector<64x64xf32>
    %cst_19 = arith.constant dense<0.000000e+00> : vector<64xf32>
    %60 = vector.multi_reduction <add>, %59, %cst_19 [1] : vector<64x64xf32> to vector<64xf32>
    %61 = vector.shape_cast %60 : vector<64xf32> to vector<64x1xf32>
    %62 = arith.truncf %59 : vector<64x64xf32> to vector<64x64xbf16>
    %cst_20 = arith.constant dense<0.000000e+00> : vector<64x64xf32>
    %63 = tpu.matmul %62, %51, %cst_20 {dimension_numbers = #tpu.dot_dimension_numbers<[1], [0], [0], [1], [0, 0, 1, 1], [], []>} : vector<64x64xbf16>, vector<64x64xbf16>, vector<64x64xf32> -> vector<64x64xf32>
    %64 = tpu.reciprocal %61 {approx = true} : vector<64x1xf32> -> vector<64x1xf32>
    %65 = vector.broadcast %64 : vector<64x1xf32> to vector<64x64xf32>
    %66 = arith.mulf %63, %65 : vector<64x64xf32>
    %67 = vector.extract_strided_slice %4 {offsets = [0, 192], sizes = [64, 64], strides = [1, 1]} : vector<64x1152xbf16> to vector<64x64xbf16>
    %68 = vector.extract_strided_slice %4 {offsets = [0, 576], sizes = [64, 64], strides = [1, 1]} : vector<64x1152xbf16> to vector<64x64xbf16>
    %69 = vector.extract_strided_slice %4 {offsets = [0, 960], sizes = [64, 64], strides = [1, 1]} : vector<64x1152xbf16> to vector<64x64xbf16>
    %cst_21 = arith.constant dense<0.000000e+00> : vector<64x64xf32>
    %70 = tpu.matmul %67, %68, %cst_21 {dimension_numbers = #tpu.dot_dimension_numbers<[1], [1], [0], [0], [0, 0, 1, 0], [], []>} : vector<64x64xbf16>, vector<64x64xbf16>, vector<64x64xf32> -> vector<64x64xf32>
    %cst_22 = arith.constant 0xFF800000 : f32
    %71 = vector.broadcast %cst_22 : f32 to vector<64x64xf32>
    %72 = arith.select %9, %70, %71 : vector<64x64xi1>, vector<64x64xf32>
    %cst_23 = arith.constant dense<0xFF800000> : vector<64xf32>
    %73 = vector.multi_reduction <maximumf>, %72, %cst_23 [1] : vector<64x64xf32> to vector<64xf32>
    %74 = vector.shape_cast %73 : vector<64xf32> to vector<64x1xf32>
    %75 = vector.broadcast %74 : vector<64x1xf32> to vector<64x64xf32>
    %76 = arith.subf %72, %75 : vector<64x64xf32>
    %77 = math.exp %76 : vector<64x64xf32>
    %cst_24 = arith.constant dense<0.000000e+00> : vector<64xf32>
    %78 = vector.multi_reduction <add>, %77, %cst_24 [1] : vector<64x64xf32> to vector<64xf32>
    %79 = vector.shape_cast %78 : vector<64xf32> to vector<64x1xf32>
    %80 = arith.truncf %77 : vector<64x64xf32> to vector<64x64xbf16>
    %cst_25 = arith.constant dense<0.000000e+00> : vector<64x64xf32>
    %81 = tpu.matmul %80, %69, %cst_25 {dimension_numbers = #tpu.dot_dimension_numbers<[1], [0], [0], [1], [0, 0, 1, 1], [], []>} : vector<64x64xbf16>, vector<64x64xbf16>, vector<64x64xf32> -> vector<64x64xf32>
    %82 = tpu.reciprocal %79 {approx = true} : vector<64x1xf32> -> vector<64x1xf32>
    %83 = vector.broadcast %82 : vector<64x1xf32> to vector<64x64xf32>
    %84 = arith.mulf %81, %83 : vector<64x64xf32>
    %85 = tpu.concatenate %66, %84 in 1 : vector<64x64xf32>, vector<64x64xf32> -> vector<64x128xf32>
    %86 = arith.truncf %85 : vector<64x128xf32> to vector<64x128xbf16>
    %c0_26 = arith.constant 0 : index
    %c128 = arith.constant 128 : index
    %87 = vector.load %arg6[%c0_26, %c128] : memref<64x384xbf16, #tpu.memory_space<vmem>>, vector<64x128xbf16>
    tpu.vector_store %arg6[%c0_26, %c128], %86 {strides = array<i32>} : memref<64x384xbf16, #tpu.memory_space<vmem>>, vector<64x128xbf16>,
    %88 = vector.extract_strided_slice %4 {offsets = [0, 256], sizes = [64, 64], strides = [1, 1]} : vector<64x1152xbf16> to vector<64x64xbf16>
    %89 = vector.extract_strided_slice %4 {offsets = [0, 640], sizes = [64, 64], strides = [1, 1]} : vector<64x1152xbf16> to vector<64x64xbf16>
    %90 = vector.extract_strided_slice %4 {offsets = [0, 1024], sizes = [64, 64], strides = [1, 1]} : vector<64x1152xbf16> to vector<64x64xbf16>
    %cst_27 = arith.constant dense<0.000000e+00> : vector<64x64xf32>
    %91 = tpu.matmul %88, %89, %cst_27 {dimension_numbers = #tpu.dot_dimension_numbers<[1], [1], [0], [0], [0, 0, 1, 0], [], []>} : vector<64x64xbf16>, vector<64x64xbf16>, vector<64x64xf32> -> vector<64x64xf32>
    %cst_28 = arith.constant 0xFF800000 : f32
    %92 = vector.broadcast %cst_28 : f32 to vector<64x64xf32>
    %93 = arith.select %9, %91, %92 : vector<64x64xi1>, vector<64x64xf32>
    %cst_29 = arith.constant dense<0xFF800000> : vector<64xf32>
    %94 = vector.multi_reduction <maximumf>, %93, %cst_29 [1] : vector<64x64xf32> to vector<64xf32>
    %95 = vector.shape_cast %94 : vector<64xf32> to vector<64x1xf32>
    %96 = vector.broadcast %95 : vector<64x1xf32> to vector<64x64xf32>
    %97 = arith.subf %93, %96 : vector<64x64xf32>
    %98 = math.exp %97 : vector<64x64xf32>
    %cst_30 = arith.constant dense<0.000000e+00> : vector<64xf32>
    %99 = vector.multi_reduction <add>, %98, %cst_30 [1] : vector<64x64xf32> to vector<64xf32>
    %100 = vector.shape_cast %99 : vector<64xf32> to vector<64x1xf32>
    %101 = arith.truncf %98 : vector<64x64xf32> to vector<64x64xbf16>
    %cst_31 = arith.constant dense<0.000000e+00> : vector<64x64xf32>
    %102 = tpu.matmul %101, %90, %cst_31 {dimension_numbers = #tpu.dot_dimension_numbers<[1], [0], [0], [1], [0, 0, 1, 1], [], []>} : vector<64x64xbf16>, vector<64x64xbf16>, vector<64x64xf32> -> vector<64x64xf32>
    %103 = tpu.reciprocal %100 {approx = true} : vector<64x1xf32> -> vector<64x1xf32>
    %104 = vector.broadcast %103 : vector<64x1xf32> to vector<64x64xf32>
    %105 = arith.mulf %102, %104 : vector<64x64xf32>
    %106 = vector.extract_strided_slice %4 {offsets = [0, 320], sizes = [64, 64], strides = [1, 1]} : vector<64x1152xbf16> to vector<64x64xbf16>
    %107 = vector.extract_strided_slice %4 {offsets = [0, 704], sizes = [64, 64], strides = [1, 1]} : vector<64x1152xbf16> to vector<64x64xbf16>
    %108 = vector.extract_strided_slice %4 {offsets = [0, 1088], sizes = [64, 64], strides = [1, 1]} : vector<64x1152xbf16> to vector<64x64xbf16>
    %cst_32 = arith.constant dense<0.000000e+00> : vector<64x64xf32>
    %109 = tpu.matmul %106, %107, %cst_32 {dimension_numbers = #tpu.dot_dimension_numbers<[1], [1], [0], [0], [0, 0, 1, 0], [], []>} : vector<64x64xbf16>, vector<64x64xbf16>, vector<64x64xf32> -> vector<64x64xf32>
    %cst_33 = arith.constant 0xFF800000 : f32
    %110 = vector.broadcast %cst_33 : f32 to vector<64x64xf32>
    %111 = arith.select %9, %109, %110 : vector<64x64xi1>, vector<64x64xf32>
    %cst_34 = arith.constant dense<0xFF800000> : vector<64xf32>
    %112 = vector.multi_reduction <maximumf>, %111, %cst_34 [1] : vector<64x64xf32> to vector<64xf32>
    %113 = vector.shape_cast %112 : vector<64xf32> to vector<64x1xf32>
    %114 = vector.broadcast %113 : vector<64x1xf32> to vector<64x64xf32>
    %115 = arith.subf %111, %114 : vector<64x64xf32>
    %116 = math.exp %115 : vector<64x64xf32>
    %cst_35 = arith.constant dense<0.000000e+00> : vector<64xf32>
    %117 = vector.multi_reduction <add>, %116, %cst_35 [1] : vector<64x64xf32> to vector<64xf32>
    %118 = vector.shape_cast %117 : vector<64xf32> to vector<64x1xf32>
    %119 = arith.truncf %116 : vector<64x64xf32> to vector<64x64xbf16>
    %cst_36 = arith.constant dense<0.000000e+00> : vector<64x64xf32>
    %120 = tpu.matmul %119, %108, %cst_36 {dimension_numbers = #tpu.dot_dimension_numbers<[1], [0], [0], [1], [0, 0, 1, 1], [], []>} : vector<64x64xbf16>, vector<64x64xbf16>, vector<64x64xf32> -> vector<64x64xf32>
    %121 = tpu.reciprocal %118 {approx = true} : vector<64x1xf32> -> vector<64x1xf32>
    %122 = vector.broadcast %121 : vector<64x1xf32> to vector<64x64xf32>
    %123 = arith.mulf %120, %122 : vector<64x64xf32>
    %124 = tpu.concatenate %105, %123 in 1 : vector<64x64xf32>, vector<64x64xf32> -> vector<64x128xf32>
    %125 = arith.truncf %124 : vector<64x128xf32> to vector<64x128xbf16>
    %c0_37 = arith.constant 0 : index
    %c256 = arith.constant 256 : index
    %126 = vector.load %arg6[%c0_37, %c256] : memref<64x384xbf16, #tpu.memory_space<vmem>>, vector<64x128xbf16>
    tpu.vector_store %arg6[%c0_37, %c256], %125 {strides = array<i32>} : memref<64x384xbf16, #tpu.memory_space<vmem>>, vector<64x128xbf16>,
    %c0_38 = arith.constant 0 : index
    %c0_39 = arith.constant 0 : index
    %127 = vector.load %arg6[%c0_38, %c0_39] : memref<64x384xbf16, #tpu.memory_space<vmem>>, vector<64x384xbf16>
    %c0_40 = arith.constant 0 : index
    %c0_41 = arith.constant 0 : index
    %128 = vector.load %arg3[%c0_40, %c0_41] : memref<384x384xbf16, #tpu.memory_space<vmem>>, vector<384x384xbf16>
    %cst_42 = arith.constant dense<0.000000e+00> : vector<64x384xf32>
    %129 = tpu.matmul %127, %128, %cst_42 {dimension_numbers = #tpu.dot_dimension_numbers<[1], [0], [0], [1], [0, 0, 1, 1], [], []>} : vector<64x384xbf16>, vector<384x384xbf16>, vector<64x384xf32> -> vector<64x384xf32>
    %c0_43 = arith.constant 0 : index
    %c0_44 = arith.constant 0 : index
    %130 = vector.load %arg4[%c0_43, %c0_44] : memref<1x384xf32, #tpu.memory_space<vmem>>, vector<1x384xf32>
    %131 = vector.broadcast %130 : vector<1x384xf32> to vector<64x384xf32>
    %132 = arith.addf %129, %131 : vector<64x384xf32>
    %133 = vector.shape_cast %132 : vector<64x384xf32> to vector<1x64x384xf32>
    %c0_45 = arith.constant 0 : index
    %c0_46 = arith.constant 0 : index
    %c0_47 = arith.constant 0 : index
    %134 = vector.load %arg5[%c0_45, %c0_46, %c0_47] : memref<1x64x384xf32, #tpu.memory_space<vmem>>, vector<1x64x384xf32>
    tpu.vector_store %arg5[%c0_45, %c0_46, %c0_47], %133 {strides = array<i32>} : memref<1x64x384xf32, #tpu.memory_space<vmem>>, vector<1x64x384xf32>,
    return
  }
  func.func @transform_0(%arg0: i32) -> (i32, i32, i32) {
    %c0_i32 = arith.constant 0 : i32
    %c0_i32_0 = arith.constant 0 : i32
    %c0_i32_1 = arith.constant 0 : i32
    return %arg0, %c0_i32, %c0_i32_0 : i32, i32, i32
  }
  func.func @transform_1(%arg0: i32) -> (i32, i32) {
    %c0_i32 = arith.constant 0 : i32
    %c0_i32_0 = arith.constant 0 : i32
    %c0_i32_1 = arith.constant 0 : i32
    return %c0_i32, %c0_i32_0 : i32, i32
  }
  func.func @transform_2(%arg0: i32) -> (i32, i32) {
    %c0_i32 = arith.constant 0 : i32
    %c0_i32_0 = arith.constant 0 : i32
    %c0_i32_1 = arith.constant 0 : i32
    return %c0_i32, %c0_i32_0 : i32, i32
  }
  func.func @transform_3(%arg0: i32) -> (i32, i32) {
    %c0_i32 = arith.constant 0 : i32
    %c0_i32_0 = arith.constant 0 : i32
    %c0_i32_1 = arith.constant 0 : i32
    return %c0_i32, %c0_i32_0 : i32, i32
  }
  func.func @transform_4(%arg0: i32) -> (i32, i32, i32) {
    %c0_i32 = arith.constant 0 : i32
    %c0_i32_0 = arith.constant 0 : i32
    %c0_i32_1 = arith.constant 0 : i32
    return %arg0, %c0_i32, %c0_i32_0 : i32, i32, i32
  }
}

</mosaic_0001>

<bundles_post_ra>
// kernel: tpu_custom_call.1
= control target key start
LH: loop header
LB: loop body
LE: loop exit
PB: predicated region body
PF: predicated region fallthrough
CT: control target
= control target key end

     0   :  { %9 = vsyncpa [#allocation4], 0  ;;  %s8736_s0 = inlined_call_operand.hbm [shape: bf16[2,64,384], index: 0, kind: input, shape index: {}]   ;;  %s8737_s1 = inlined_call_operand.hbm [shape: bf16[384,1152], index: 1, kind: input, shape index: {}]   ;;  %s8738_s2 = inlined_call_operand.hbm [shape: bf16[384,384], index: 2, kind: input, shape index: {}]   ;;  %s8739_s3 = inlined_call_operand.vmem [shape: f32[1,384], index: 3, kind: input, shape index: {}]   ;;  %s8740_s4 = inlined_call_operand.hbm [shape: f32[2,64,384], index: 4, kind: output, shape index: {}]  }
   0x1   :  { %11 = vsyncpa [#allocation4 + $0x1], 0 }
   0x2   :  { %12 = vsyncpa [#allocation7], 0 }
   0x3   :  { %13 = vsyncpa [#allocation5], 0 }
   0x4   :  { %15 = vsyncpa [#allocation5 + $0x1], 0  ;;  %s7250_s15 = smov 0   ;;  %s7252_s16 = smov 0  }
   0x5   :  { %s7254_s17 = smov 0   ;;  %s7256_s18 = smov 0  }
   0x6 LB: > { %s7271_s19 = sadd.s32 4294967295, %s7211_s18   ;;  %s5379_s20 = sadd.s32 4294967294, %s7211_s18   ;;  %s7211_s18 = sphi %s7256_s18, %s8885_s18   ;;  %s7207_s17 = sphi %s7254_s17, %s8884_s17   ;;  %s7203_s16 = sphi %s7252_s16, %s8883_s16   ;;  %s7199_s15 = sphi %s7250_s15, %s8882_s15  }
   0x7   : > { %p41_p0 = scmp.ne.s32.totalorder %s7203_s16, %s7199_s15  ;;  %p8741_p1 = scmp.eq.s32.totalorder %s7271_s19, 0 }
   0x8   : > { %p134_p3 = scmp.eq.s32.totalorder %s5379_s20, 1  ;;  %p5380_p5 = scmp.ge.s32.totalorder %s7211_s18, 1 }
   0x9   : > { %p7280_p4 = por %p8741_p1, %p41_p0  ;;  %p141_p7 = scmp.lt.s32.totalorder %s7211_s18, 3 }
   0xa   : > { %p7285_p6 = por %p134_p3, %p41_p0  ;;  %s7213_s24 = smov [#allocation6]  }
   0xb   : > { %s8759_s21 = scalar_select %p7280_p4, 1, 0 }
   0xc   : > { %s8760_s22 = scalar_select %p7285_p6, 1, 0 }
   0xd   : > { %p7290_p8 = pnand %p5380_p5, %p141_p7  ;;  %s153_s25 = sshll.u32 %s7213_s24, 4  ;;  %s154_s25 = int_to_ptr.vmem [resolvable:$true] %s153_s25 }
   0xe   : > { %s7214_s27 = smov [#allocation8]   ;;  %s7074_s29 = scalar_lea.vmem %s154_s25, 27648 }
   0xf   : > { %s8761_s23 = scalar_select %p7290_p8, 1, 0 }
  0x10   : > { %p6296_p9 = pneg %p7290_p8  ;;  %s166_s28 = sshll.u32 %s7214_s27, 4  ;;  %s167_s28 = int_to_ptr.vmem [resolvable:$true] %s166_s28 }
  0x11   : > { %p7075_p13 = scmp.ne.s32.totalorder %s154_s25, %s7074_s29  ;;  %p7082_p5 = scmp.lt.s32.totalorder %s154_s25, %s154_s25 }
  0x12   : > { %p7299_p11 = pnand %p6296_p9, %p8741_p1  ;;  %p7083_p7 = scmp.lt.s32.totalorder %s7074_s29, %s7074_s29 }
  0x14   : > { %p7065_p12 = pneg %p7299_p11  ;;  %p7084_p10 = por %p7083_p7, %p7082_p5 }
  0x16   : > { %p7077_p0 = pnand %p7075_p13, %p7065_p12 }
  0x18   : > { %p7078_p3 = pneg %p7077_p0 }
  0x1a   : > { %p7085_p9 = pnand %p7084_p10, %p7078_p3 }
  0x1c   : > { %7088 = shalt.err (!%p7085_p9)
}
  0x1d   : > { %s7215_s30 = smov 576   ;;  %s7216_s5 = smov 36  }
  0x1e   : > { %6299 = dma.hbm_to_vmem [thread:$0]  (!%p7299_p11), %s8737_s1, 27648, %s154_s25, [#allocation7], %s7215_s30, %s7215_s30, %s7216_s5  }
  0x1f   : > { %s7100_s8 = scalar_lea.vmem %s167_s28, 9216  ;;  %p7108_p2 = scmp.lt.s32.totalorder %s167_s28, %s167_s28 }
  0x20   : > { %p7101_p1 = scmp.ne.s32.totalorder %s167_s28, %s7100_s8  ;;  %p7109_p6 = scmp.lt.s32.totalorder %s7100_s8, %s7100_s8 }
  0x22   : > { %p7103_p13 = pnand %p7101_p1, %p7065_p12  ;;  %p7110_p5 = por %p7109_p6, %p7108_p2 }
  0x24   : > { %p7104_p0 = pneg %p7103_p13 }
  0x26   : > { %p7111_p10 = pnand %p7110_p5, %p7104_p0 }
  0x28   : > { %7114 = shalt.err (!%p7111_p10)
}
  0x29   : > { %s7217_s9 = smov 192   ;;  %s7218_s10 = smov 12  }
  0x2a   : > { %6302 = dma.hbm_to_vmem [thread:$0]  (!%p7299_p11), %s8738_s2, 9216, %s167_s28, [#allocation7], %s7217_s9, %s7217_s9, %s7218_s10  }
  0x2b   : > { %s7325_s13 = sadd.s32 1, %s7211_s18   ;;  %s28_s20 = sadd.s32 1, %s7207_s17 }
  0x2c   : > { %s25_s14 = ssub.s32 %s7211_s18, %s7325_s13  ;;  %p35_p2 = scmp.ne.s32.totalorder %s7207_s17, %s7203_s16 }
  0x2d   : > { %p26_p1 = scmp.eq.s32.totalorder %s25_s14, 0  ;;  %p36_p6 = scmp.eq.s32.totalorder %s7211_s18, 0 }
  0x2e   : > { %p8763_p3 = scmp.eq.s32.totalorder %s7271_s19, 1  ;;  %p6313_p9 = scmp.lt.s32.totalorder %s7211_s18, 2 }
  0x2f   : > { %s7334_s24 = scalar_select %p26_p1, %s7207_s17, %s28_s20  }
  0x30   : > { %p37_p12 = por %p36_p6, %p35_p2  ;;  %p7338_p7 = por %p8763_p3, %p35_p2 }
  0x31   : > { %s183_s26 = sand.u32 1, %s7207_s17   ;;  %s6280_s28 = smul.u32 1536, %s7211_s18 }
  0x32   : > { %s8764_s25 = scalar_select %p7338_p7, 1, 0 }
  0x33   : > { %s6279_s27 = smul.u32 96, %s183_s26  ;;  %p7345_p11 = pnand %p6313_p9, %p37_p12 }
  0x34   : > { %s7352_s6 = scalar_lea.hbm %s8736_s0, %s6280_s28  ;;  %s7356_s11 = scalar_lea.sflag [#allocation4], %s183_s26 }
  0x35   : > { %s187_s7 = scalar_lea.vmem [#allocation3], %s6279_s27  ;;  %s7115_s12 = scalar_lea.hbm %s7352_s6, 1536 }
  0x36   : > { %s194_s8 = sshll.u32 %s187_s7, 4  ;;  %p7116_p13 = scmp.ne.s32.totalorder %s7352_s6, %s7115_s12  ;;  %s7354_s8 = int_to_ptr.vmem [resolvable:$true] %s194_s8 }
  0x37   : > { %p7117_p0 = pneg %p7345_p11  ;;  %s7120_s28 = scalar_lea.hbm %s8736_s0, 3072 }
  0x38   : > { %p7121_p1 = scmp.lt.s32.totalorder %s7352_s6, %s8736_s0  ;;  %p7122_p2 = scmp.lt.s32.totalorder %s7120_s28, %s7115_s12 }
  0x39   : > { %p7118_p5 = pnand %p7117_p0, %p7116_p13 }
  0x3a   : > { %p7123_p6 = por %p7122_p2, %p7121_p1 }
  0x3b   : > { %p7119_p10 = pneg %p7118_p5 }
  0x3d   : > { %p7124_p12 = pnand %p7123_p6, %p7119_p10 }
  0x3f   : > { %7127 = shalt.err (!%p7124_p12)
}
  0x40   : > { %s7128_s26 = scalar_lea.vmem %s7354_s8, 1536  ;;  %s7219_s27 = smov [#allocation3]  }
  0x41   : > { %p7129_p3 = scmp.ne.s32.totalorder %s7354_s8, %s7128_s26  ;;  %s7133_s7 = sshll.u32 %s7219_s27, 4  ;;  %s7134_s7 = int_to_ptr.vmem [resolvable:$false] %s7133_s7 }
  0x42   : > { %s7135_s14 = scalar_lea.vmem %s7134_s7, 3072  ;;  %p7136_p5 = scmp.lt.s32.totalorder %s7354_s8, %s7134_s7 }
  0x43   : > { %p7131_p9 = pnand %p7129_p3, %p7117_p0  ;;  %p7137_p7 = scmp.lt.s32.totalorder %s7135_s14, %s7128_s26 }
  0x45   : > { %p7132_p13 = pneg %p7131_p9  ;;  %p7138_p4 = por %p7137_p7, %p7136_p5 }
  0x47   : > { %p7139_p8 = pnand %p7138_p4, %p7132_p13 }
  0x49   : > { %7142 = shalt.err (!%p7139_p8)
}
  0x4a   : > { %6306 = dma.hbm_to_vmem [thread:$0]  (!%p7345_p11), %s7352_s6, 1536, %s7354_s8, %s7356_s11, %s7217_s9, %s7217_s9, %s7218_s10  }
  0x4b   : > { %p8766_p0 = scmp.ne.s32.totalorder %s8761_s23, 0 }
  0x4d   : > { %206 = sbr.rel (%p8766_p0) target bundleno = 3577 (0xdf9), region = 36 }
  0x52   : > { %s7383_s12 = sand.u32 1, %s7203_s16   ;;  %p8767_p4 = scmp.ne.s32.totalorder %s8759_s21, 0 }
  0x53   : > { %s6281_s20 = smul.u32 96, %s7383_s12  ;;  %s209_s28 = scalar_lea.sflag [#allocation4], %s7383_s12 }
  0x55   : > { %s7387_s30 = scalar_lea.vmem [#allocation3], %s6281_s20 }
  0x56   : > { %7186 = dma.done.wait (%p8767_p4), %s209_s28, 1536  }
  0x57   : > { %7188 = vsyncadd (%p8767_p4), %s209_s28, 4294965760  ;;  %p8768_p8 = scmp.eq.s32.totalorder %s7271_s19, 0 }
  0x59   : > { %7190 = dma.done.wait (%p8768_p8), [#allocation7], 36864   ;;  %p8769_p7 = pmov %p8768_p8 }
  0x5a   : > { %v8745_v0 = vmov 0   ;;  %v6419_v1 = vld [vmem:[#allocation6 + $0x1fc] ss:$36 sps:$4 sm:$0xff]   ;;  %v6425_v5 = vld [vmem:[#allocation6 + $0x1b4] ss:$36 sps:$4 sm:$0xff]   ;;  %vm2439_vm0 = vcmask 523264  }
  0x5b   : > { %7192 = vsyncadd (%p8769_p7), [#allocation7], 4294930432  ;;  %1775 = vmatprep.mubr.bf16.mxu1 %v8745_v0  ;;  %v6421_v2 = vld [vmem:[#allocation6 + $0x67c] ss:$36 sps:$4 sm:$0xff]   ;;  %1670 = vmatprep.subr.bf16.mxu0 %v6419_v1  ;;  %v6427_v6 = vld [vmem:[#allocation6 + $0x634] ss:$36 sps:$4 sm:$0xff]  }
  0x5c   : > { %v6423_v3 = vld [vmem:[#allocation6 + $0x1f8] ss:$36 sps:$4 sm:$0xff]   ;;  %1743 = vmatprep.subr.bf16.mxu1 %v6421_v2  ;;  %v6429_v7 = vld [vmem:[#allocation6 + $0x1b0] ss:$36 sps:$4 sm:$0xff]   ;;  %v6435_v11 = vld [vmem:[#allocation6 + $0x168] ss:$36 sps:$4 sm:$0xff]  }
  0x5d   : > { %v6424_v4 = vld [vmem:[#allocation6 + $0x678] ss:$36 sps:$4 sm:$0xff]   ;;  %1671 = vmatpush1.bf16.msra.mxu0 %v6423_v3  ;;  %v6430_v8 = vld [vmem:[#allocation6 + $0x630] ss:$36 sps:$4 sm:$0xff]   ;;  %v6436_v12 = vld [vmem:[#allocation6 + $0x5e8] ss:$36 sps:$4 sm:$0xff]  }
  0x5e   : > { %1744 = vmatpush1.bf16.msra.mxu1 %v6424_v4  ;;  %1672 = vmatprep.subr.bf16.mxu0 %v6425_v5  ;;  %v6431_v9 = vld [vmem:[#allocation6 + $0x16c] ss:$36 sps:$4 sm:$0xff]   ;;  %v6437_v13 = vld [vmem:[#allocation6 + $0x124] ss:$36 sps:$4 sm:$0xff]   ;;  %v6443_v17 = vld [vmem:[#allocation6 + $0xdc] ss:$36 sps:$4 sm:$0xff]  }
  0x5f   : > { %1745 = vmatprep.subr.bf16.mxu1 %v6427_v6  ;;  %v6433_v10 = vld [vmem:[#allocation6 + $0x5ec] ss:$36 sps:$4 sm:$0xff]   ;;  %v6439_v14 = vld [vmem:[#allocation6 + $0x5a4] ss:$36 sps:$4 sm:$0xff]   ;;  %v6445_v18 = vld [vmem:[#allocation6 + $0x55c] ss:$36 sps:$4 sm:$0xff]  }
  0x60   : > { %v6441_v15 = vld [vmem:[#allocation6 + $0x120] ss:$36 sps:$4 sm:$0xff]   ;;  %v6447_v19 = vld [vmem:[#allocation6 + $0xd8] ss:$36 sps:$4 sm:$0xff]   ;;  %v6453_v23 = vld [vmem:[#allocation6 + $0x90] ss:$36 sps:$4 sm:$0xff]  }
  0x61   : > { %1673 = vmatpush1.bf16.msra.mxu0 %v6429_v7  ;;  %v6442_v16 = vld [vmem:[#allocation6 + $0x5a0] ss:$36 sps:$4 sm:$0xff]   ;;  %v6448_v20 = vld [vmem:[#allocation6 + $0x558] ss:$36 sps:$4 sm:$0xff]   ;;  %v6454_v24 = vld [vmem:[#allocation6 + $0x510] ss:$36 sps:$4 sm:$0xff]  }
  0x62   : > { %1746 = vmatpush1.bf16.msra.mxu1 %v6430_v8  ;;  %1674 = vmatprep.subr.bf16.mxu0 %v6431_v9  ;;  %v6449_v21 = vld [vmem:[#allocation6 + $0x94] ss:$36 sps:$4 sm:$0xff]   ;;  %v6455_v25 = vld [vmem:[#allocation6 + $0x4c] ss:$36 sps:$4 sm:$0xff]   ;;  %v6461_v29 = vld [vmem:[#allocation6 + $0x4] ss:$36 sps:$4 sm:$0xff]  }
  0x63   : > { %1747 = vmatprep.subr.bf16.mxu1 %v6433_v10  ;;  %v6451_v22 = vld [vmem:[#allocation6 + $0x514] ss:$36 sps:$4 sm:$0xff]   ;;  %v6457_v26 = vld [vmem:[#allocation6 + $0x4cc] ss:$36 sps:$4 sm:$0xff]   ;;  %v6463_v30 = vld [vmem:[#allocation6 + $0x484] ss:$36 sps:$4 sm:$0xff]  }
  0x64   : > { %v6459_v27 = vld [vmem:[#allocation6 + $0x48] ss:$36 sps:$4 sm:$0xff]   ;;  %v6465_v31 = vld [vmem:[#allocation6] ss:$36 sps:$4 sm:$0xff]   ;;  %v6473_v37 = vld [vmem:[#allocation6 + $0x438] ss:$36 sps:$4 sm:$0xff]  }
  0x65   : > { %1675 = vmatpush1.bf16.msra.mxu0 %v6435_v11  ;;  %v6460_v28 = vld [vmem:[#allocation6 + $0x4c8] ss:$36 sps:$4 sm:$0xff]   ;;  %v6466_v32 = vld [vmem:[#allocation6 + $0x480] ss:$36 sps:$4 sm:$0xff]   ;;  %v6474_v38 = vld [vmem:[#allocation6 + $0x3f4] ss:$36 sps:$4 sm:$0xff]  }
  0x66   : > { %1748 = vmatpush1.bf16.msra.mxu1 %v6436_v12  ;;  %1676 = vmatprep.subr.bf16.mxu0 %v6437_v13  ;;  %v6467_v33 = vld [vmem:[#allocation6 + $0x43c] ss:$36 sps:$4 sm:$0xff]   ;;  %v6472_v34 = vld [vmem:[#allocation6 + $0x204] ss:$36 sps:$4 sm:$0xff]   ;;  %v6479_v41 = vld [vmem:[#allocation6 + $0x3f0] ss:$36 sps:$4 sm:$0xff]  }
  0x67   : > { %1749 = vmatprep.subr.bf16.mxu1 %v6439_v14  ;;  %v7399_v35 = vld [vmem:[%s7387_s30 + $0x8] ss:$12 sps:$4 sm:$0xff]   ;;  %v6470_v36 = vld [vmem:[#allocation6 + $0x200] ss:$36 sps:$4 sm:$0xff]   ;;  %v6476_v40 = vld [vmem:[#allocation6 + $0x1b8] ss:$36 sps:$4 sm:$0xff]  }
  0x68   : > { %v6478_v39 = vld [vmem:[#allocation6 + $0x1bc] ss:$36 sps:$4 sm:$0xff]   ;;  %v6480_v42 = vld [vmem:[#allocation6 + $0x3ac] ss:$36 sps:$4 sm:$0xff]   ;;  %v6484_v43 = vld [vmem:[#allocation6 + $0x174] ss:$36 sps:$4 sm:$0xff]  }
  0x69   : > { %1677 = vmatpush1.bf16.msra.mxu0 %v6441_v15  ;;  %v6482_v44 = vld [vmem:[#allocation6 + $0x170] ss:$36 sps:$4 sm:$0xff]   ;;  %v6485_v45 = vld [vmem:[#allocation6 + $0x3a8] ss:$36 sps:$4 sm:$0xff]   ;;  %v6491_v49 = vld [vmem:[#allocation6 + $0x360] ss:$36 sps:$4 sm:$0xff]  }
  0x6a   : > { %1750 = vmatpush1.bf16.msra.mxu1 %v6442_v16  ;;  %1678 = vmatprep.subr.bf16.mxu0 %v6443_v17  ;;  %v6486_v46 = vld [vmem:[#allocation6 + $0x364] ss:$36 sps:$4 sm:$0xff]   ;;  %v6490_v47 = vld [vmem:[#allocation6 + $0x12c] ss:$36 sps:$4 sm:$0xff]   ;;  %v6492_v50 = vld [vmem:[#allocation6 + $0x31c] ss:$36 sps:$4 sm:$0xff]  }
  0x6b   : > { %1751 = vmatprep.subr.bf16.mxu1 %v6445_v18  ;;  %v6488_v48 = vld [vmem:[#allocation6 + $0x128] ss:$36 sps:$4 sm:$0xff]   ;;  %v7404_v51 = vld [vmem:[%s7387_s30 + $0x4] ss:$12 sps:$4 sm:$0xff]   ;;  %v6497_v54 = vld [vmem:[#allocation6 + $0x318] ss:$36 sps:$4 sm:$0xff]  }
  0x6c   : > { %v6496_v52 = vld [vmem:[#allocation6 + $0xe4] ss:$36 sps:$4 sm:$0xff]   ;;  %1702 = vmatprep.mubr.bf16.mxu0 %v7404_v51  ;;  %v7408_v55 = vld [vmem:[%s7387_s30 + $0x20] ss:$12 sps:$4 sm:$0xff]   ;;  %v6498_v56 = vld [vmem:[#allocation6 + $0x2d4] ss:$36 sps:$4 sm:$0xff]  }
  0x6d   : > { %1679 = vmatpush1.bf16.msra.mxu0 %v6447_v19  ;;  %v6494_v53 = vld [vmem:[#allocation6 + $0xe0] ss:$36 sps:$4 sm:$0xff]   ;;  %v6500_v58 = vld [vmem:[#allocation6 + $0x98] ss:$36 sps:$4 sm:$0xff]   ;;  %v6503_v59 = vld [vmem:[#allocation6 + $0x2d0] ss:$36 sps:$4 sm:$0xff]  }
  0x6e   : > { %1752 = vmatpush1.bf16.msra.mxu1 %v6448_v20  ;;  %1680 = vmatprep.subr.bf16.mxu0 %v6449_v21  ;;  %v6502_v57 = vld [vmem:[#allocation6 + $0x9c] ss:$36 sps:$4 sm:$0xff]   ;;  %v6504_v60 = vld [vmem:[#allocation6 + $0x28c] ss:$36 sps:$4 sm:$0xff]   ;;  %v6508_v61 = vld [vmem:[#allocation6 + $0x54] ss:$36 sps:$4 sm:$0xff]  }
  0x6f   : > { %1753 = vmatprep.subr.bf16.mxu1 %v6451_v22  ;;  %v6506_v62 = vld [vmem:[#allocation6 + $0x50] ss:$36 sps:$4 sm:$0xff]   ;;  %v6509_v63 = vld [vmem:[#allocation6 + $0x288] ss:$36 sps:$4 sm:$0xff]   ;;  %v7413_v1 = vld [vmem:[%s7387_s30 + $0x38] ss:$12 sps:$4 sm:$0xff]  }
  0x70   : > { %v6510_v2 = vld [vmem:[#allocation6 + $0x244] ss:$36 sps:$4 sm:$0xff]   ;;  %v6514_v3 = vld [vmem:[#allocation6 + $0xc] ss:$36 sps:$4 sm:$0xff]   ;;  %v6528_v12 = vld [vmem:[#allocation6 + $0x3fc] ss:$36 sps:$4 sm:$0xff]  }
  0x71   : > { %1681 = vmatpush1.bf16.msra.mxu0 %v6453_v23  ;;  %v6512_v4 = vld [vmem:[#allocation6 + $0x8] ss:$36 sps:$4 sm:$0xff]   ;;  %v6515_v5 = vld [vmem:[#allocation6 + $0x240] ss:$36 sps:$4 sm:$0xff]   ;;  %v7421_v11 = vld [vmem:[%s7387_s30 + $0x50] ss:$12 sps:$4 sm:$0xff]  }
  0x72   : > { %1754 = vmatpush1.bf16.msra.mxu1 %v6454_v24  ;;  %1682 = vmatprep.subr.bf16.mxu0 %v6455_v25  ;;  %v7418_v6 = vld [vmem:[%s7387_s30] ss:$12 sps:$4 sm:$0xff]   ;;  %v6521_v7 = vld [vmem:[#allocation6 + $0x444] ss:$36 sps:$4 sm:$0xff]   ;;  %v6526_v15 = vld [vmem:[#allocation6 + $0x3f8] ss:$36 sps:$4 sm:$0xff]  }
  0x73   : > { %1755 = vmatprep.subr.bf16.mxu1 %v6457_v26  ;;  %v6524_v8 = vld [vmem:[#allocation6 + $0x684] ss:$36 sps:$4 sm:$0xff]   ;;  %v6531_v13 = vld [vmem:[#allocation6 + $0x63c] ss:$36 sps:$4 sm:$0xff]   ;;  %v6537_v17 = vld [vmem:[#allocation6 + $0x3b4] ss:$36 sps:$4 sm:$0xff]  }
  0x74   : > { %v6519_v9 = vld [vmem:[#allocation6 + $0x440] ss:$36 sps:$4 sm:$0xff]   ;;  %v7424_v14 = vld [vmem:[%s7387_s30 + $0x1c] ss:$12 sps:$4 sm:$0xff]   ;;  %v6540_v18 = vld [vmem:[#allocation6 + $0x5f4] ss:$36 sps:$4 sm:$0xff]  }
  0x75   : > { %1683 = vmatpush1.bf16.msra.mxu0 %v6459_v27  ;;  %v6522_v10 = vld [vmem:[#allocation6 + $0x680] ss:$36 sps:$4 sm:$0xff]   ;;  %v6529_v16 = vld [vmem:[#allocation6 + $0x638] ss:$36 sps:$4 sm:$0xff]   ;;  %v6535_v20 = vld [vmem:[#allocation6 + $0x3b0] ss:$36 sps:$4 sm:$0xff]  }
  0x76   : > { %1756 = vmatpush1.bf16.msra.mxu1 %v6460_v28  ;;  %1684 = vmatprep.subr.bf16.mxu0 %v6461_v29  ;;  %v7431_v19 = vld [vmem:[%s7387_s30 + $0x18] ss:$12 sps:$4 sm:$0xff]   ;;  %v6538_v21 = vld [vmem:[#allocation6 + $0x5f0] ss:$36 sps:$4 sm:$0xff]   ;;  %v6542_v25 = vld [vmem:[#allocation6 + $0x368] ss:$36 sps:$4 sm:$0xff]  }
  0x77   : > { %1757 = vmatprep.subr.bf16.mxu1 %v6463_v30  ;;  %v6544_v22 = vld [vmem:[#allocation6 + $0x36c] ss:$36 sps:$4 sm:$0xff]   ;;  %v7434_v24 = vld [vmem:[%s7387_s30 + $0x34] ss:$12 sps:$4 sm:$0xff]   ;;  %v6553_v27 = vld [vmem:[#allocation6 + $0x324] ss:$36 sps:$4 sm:$0xff]  }
  0x78   : > { %v6547_v23 = vld [vmem:[#allocation6 + $0x5ac] ss:$36 sps:$4 sm:$0xff]   ;;  %v6556_v28 = vld [vmem:[#allocation6 + $0x564] ss:$36 sps:$4 sm:$0xff]   ;;  %s7221_s21 = smov 64   ;;  %s6282_s10 = smul.u32 192, %s7383_s12 }
  0x79   : > { %1685 = vmatpush1.bf16.msra.mxu0 %v6465_v31  ;;  %v6545_v26 = vld [vmem:[#allocation6 + $0x5a8] ss:$36 sps:$4 sm:$0xff]   ;;  %v7439_v29 = vld [vmem:[%s7387_s30 + $0x30] ss:$12 sps:$4 sm:$0xff]   ;;  %v6551_v30 = vld [vmem:[#allocation6 + $0x320] ss:$36 sps:$4 sm:$0xff]  }
  0x7a   : > { %1758 = vmatpush1.bf16.msra.mxu1 %v6466_v32  ;;  %1686 = vmatprep.subr.bf16.mxu0 %v6467_v33  ;;  %v6554_v31 = vld [vmem:[#allocation6 + $0x560] ss:$36 sps:$4 sm:$0xff]   ;;  %s8631_s29 = scalar_lea.vmem [#allocation9], %s6282_s10  ;;  %s6283_s6 = smul.u32 3072, %s7271_s19 }
  0x7b   : > { %1816 = vmatprep.subr.bf16.mxu1 %v6472_v34  ;;  %v6560_v32 = vld [vmem:[#allocation6 + $0x2dc] ss:$36 sps:$4 sm:$0xff]   ;;  %v7442_v34 = vld [vmem:[%s7387_s30 + $0x4c] ss:$12 sps:$4 sm:$0xff]   ;;  %s5287_s8 = sshll.u32 %s8631_s29, 4  ;;  %s5274_s26 = scalar_lea.sflag [#allocation5], %s7383_s12  ;;  %s8689_s8 = int_to_ptr.vmem [resolvable:$true] %s5287_s8 }
  0x7c   : > { %v6563_v33 = vld [vmem:[#allocation6 + $0x51c] ss:$36 sps:$4 sm:$0xff]   ;;  %s8687_s5 = scalar_lea.hbm %s8740_s4, %s6283_s6  ;;  %s7143_s27 = scalar_lea.vmem %s8689_s8, 3072 }
  0x7d   : > { %1776 = vmatmul.mubr.bf16.vlgmr.msra.gmra.mxu1 %v7399_v35  ;;  %1687 = vmatpush2.bf16.msra.mxu0 %v6473_v37  ;;  %v6561_v37 = vld [vmem:[#allocation6 + $0x518] ss:$36 sps:$4 sm:$0xff]   ;;  %p7144_p11 = scmp.ne.s32.totalorder %s8689_s8, %s7143_s27  ;;  %p8879_p10 = scmp.ne.s32.totalorder %s8764_s25, 0 }
  0x7e   : > { %1817 = vmatpush1.bf16.msra.mxu1 %v6470_v36  ;;  %1688 = vmatprep.subr.bf16.mxu0 %v6474_v38  ;;  %v6558_v36 = vld [vmem:[#allocation6 + $0x2d8] ss:$36 sps:$4 sm:$0xff]   ;;  %s7222_s7 = smov [#allocation9]  }
  0x7f   : > { %1818 = vmatprep.subr.bf16.mxu1 %v6478_v39  ;;  %1785 = vmatprep.mubr.bf16.mxu1 %v8745_v0  ;;  %v6569_v38 = vld [vmem:[#allocation6 + $0x294] ss:$36 sps:$4 sm:$0xff]   ;;  %p7145_p1 = pnand %p7144_p11, %p8879_p10  ;;  %s7147_s14 = sshll.u32 %s7222_s7, 4  ;;  %s7148_s14 = int_to_ptr.vmem [resolvable:$false] %s7147_s14 }
  0x80   : > { %v6572_v39 = vld [vmem:[#allocation6 + $0x4d4] ss:$36 sps:$4 sm:$0xff]   ;;  %s7149_s20 = scalar_lea.vmem %s7148_s14, 6144  ;;  %p7150_p6 = scmp.lt.s32.totalorder %s8689_s8, %s7148_s14 }
  0x81   : > { %1689 = vmatpush2.bf16.msra.mxu0 %v6479_v41  ;;  %v6567_v41 = vld [vmem:[#allocation6 + $0x290] ss:$36 sps:$4 sm:$0xff]   ;;  %p7146_p2 = pneg %p7145_p1  ;;  %p7151_p12 = scmp.lt.s32.totalorder %s7149_s20, %s7143_s27 }
  0x82   : > { %1819 = vmatpush1.bf16.msra.mxu1 %v6476_v40  ;;  %1690 = vmatprep.subr.bf16.mxu0 %v6480_v42  ;;  %v7447_v40 = vld [vmem:[%s7387_s30 + $0x48] ss:$12 sps:$4 sm:$0xff]  }
  0x83   : > { %1820 = vmatprep.subr.bf16.mxu1 %v6484_v43  ;;  %v6570_v42 = vld [vmem:[#allocation6 + $0x4d0] ss:$36 sps:$4 sm:$0xff]   ;;  %p7152_p3 = por %p7151_p12, %p7150_p6 }
  0x84   : > { %v6575_v43 = vld [vmem:[#allocation6 + $0x24c] ss:$36 sps:$4 sm:$0xff]  }
  0x85   : > { %1691 = vmatpush2.bf16.msra.mxu0 %v6485_v45  ;;  %1786 = vmatmul.mubr.bf16.gmra.mxu1 %v7408_v55  ;;  %v6573_v45 = vld [vmem:[#allocation6 + $0x248] ss:$36 sps:$4 sm:$0xff]   ;;  %p7153_p9 = pnand %p7152_p3, %p7146_p2 }
  0x86   : > { %1821 = vmatpush1.bf16.msra.mxu1 %v6482_v44  ;;  %1692 = vmatprep.subr.bf16.mxu0 %v6486_v46  ;;  %v6578_v44 = vld [vmem:[#allocation6 + $0x48c] ss:$36 sps:$4 sm:$0xff]  }
  0x87   : > { %1822 = vmatprep.subr.bf16.mxu1 %v6490_v47  ;;  %1795 = vmatprep.mubr.bf16.mxu1 %v8745_v0  ;;  %v6576_v46 = vld [vmem:[#allocation6 + $0x488] ss:$36 sps:$4 sm:$0xff]  }
  0x88   : > { %v6581_v47 = vld [vmem:[#allocation6 + $0x20c] ss:$36 sps:$4 sm:$0xff]  }
  0x89   : > { %1693 = vmatpush2.bf16.msra.mxu0 %v6491_v49  ;;  %v6579_v49 = vld [vmem:[#allocation6 + $0x208] ss:$36 sps:$4 sm:$0xff]  }
  0x8a   : > { %1823 = vmatpush1.bf16.msra.mxu1 %v6488_v48  ;;  %1694 = vmatprep.subr.bf16.mxu0 %v6492_v50  ;;  %v6614_v48 = vld [vmem:[#allocation6 + $0x68c] ss:$36 sps:$4 sm:$0xff]  }
  0x8b   : > { %1824 = vmatprep.subr.bf16.mxu1 %v6496_v52  ;;  %v6612_v50 = vld [vmem:[#allocation6 + $0x688] ss:$36 sps:$4 sm:$0xff]  }
  0x8c   : > { %v6584_v52 = vld [vmem:[#allocation6 + $0x1c4] ss:$36 sps:$4 sm:$0xff]  }
  0x8d   : > { %1695 = vmatpush2.bf16.msra.mxu0 %v6497_v54  ;;  %1796 = vmatmul.mubr.bf16.gmra.mxu1 %v7413_v1  ;;  %v6582_v54 = vld [vmem:[#allocation6 + $0x1c0] ss:$36 sps:$4 sm:$0xff]  }
  0x8e   : > { %1825 = vmatpush1.bf16.msra.mxu1 %v6494_v53  ;;  %1696 = vmatprep.subr.bf16.mxu0 %v6498_v56  ;;  %v6620_v53 = vld [vmem:[#allocation6 + $0x644] ss:$36 sps:$4 sm:$0xff]  }
  0x8f   : > { %1826 = vmatprep.subr.bf16.mxu1 %v6502_v57  ;;  %1805 = vmatprep.mubr.bf16.mxu1 %v8745_v0  ;;  %v6618_v56 = vld [vmem:[#allocation6 + $0x640] ss:$36 sps:$4 sm:$0xff]  }
  0x90   : > { %v6587_v57 = vld [vmem:[#allocation6 + $0x17c] ss:$36 sps:$4 sm:$0xff]  }
  0x91   : > { %1697 = vmatpush2.bf16.msra.mxu0 %v6503_v59  ;;  %v6585_v59 = vld [vmem:[#allocation6 + $0x178] ss:$36 sps:$4 sm:$0xff]  }
  0x92   : > { %1827 = vmatpush1.bf16.msra.mxu1 %v6500_v58  ;;  %1698 = vmatprep.subr.bf16.mxu0 %v6504_v60  ;;  %v6626_v58 = vld [vmem:[#allocation6 + $0x5fc] ss:$36 sps:$4 sm:$0xff]  }
  0x93   : > { %1828 = vmatprep.subr.bf16.mxu1 %v6508_v61  ;;  %v6624_v60 = vld [vmem:[#allocation6 + $0x5f8] ss:$36 sps:$4 sm:$0xff]  }
  0x94   : > { %v6590_v61 = vld [vmem:[#allocation6 + $0x134] ss:$36 sps:$4 sm:$0xff]  }
  0x95   : > { %1699 = vmatpush2.bf16.msra.mxu0 %v6509_v63  ;;  %1806 = vmatmul.mubr.bf16.gmra.mxu1 %v7421_v11  ;;  %v6588_v63 = vld [vmem:[#allocation6 + $0x130] ss:$36 sps:$4 sm:$0xff]  }
  0x96   : > { %1829 = vmatpush1.bf16.msra.mxu1 %v6506_v62  ;;  %1700 = vmatprep.subr.bf16.mxu0 %v6510_v2  ;;  %v6632_v62 = vld [vmem:[#allocation6 + $0x5b4] ss:$36 sps:$4 sm:$0xff]  }
  0x97   : > { %1830 = vmatprep.subr.bf16.mxu1 %v6514_v3  ;;  %1848 = vmatprep.mubr.bf16.mxu1 %v7404_v51  ;;  %v6630_v2 = vld [vmem:[#allocation6 + $0x5b0] ss:$36 sps:$4 sm:$0xff]  }
  0x98   : > { %v6593_v3 = vld [vmem:[#allocation6 + $0xec] ss:$36 sps:$4 sm:$0xff]  }
  0x99   : > { %1701 = vmatpush2.bf16.msra.mxu0 %v6515_v5  ;;  %v6591_v5 = vld [vmem:[#allocation6 + $0xe8] ss:$36 sps:$4 sm:$0xff]  }
  0x9a   : > { %1831 = vmatpush1.bf16.msra.mxu1 %v6512_v4  ;;  %1889 = vmatprep.subr.bf16.mxu0 %v6524_v8  ;;  %v6638_v4 = vld [vmem:[#allocation6 + $0x56c] ss:$36 sps:$4 sm:$0xff]   ;;  %v6596_v8 = vld [vmem:[#allocation6 + $0xa4] ss:$36 sps:$4 sm:$0xff]  }
  0x9b   : > { %1832 = vmatprep.subr.bf16.mxu1 %v6521_v7  ;;  %v6636_v7 = vld [vmem:[#allocation6 + $0x568] ss:$36 sps:$4 sm:$0xff]  }
  0x9c   : > { %1703 = vmatmul.mubr.bf16.vlgmr.msra.gmra.mxu0 %v7418_v6 }
  0x9d   : > { %1890 = vmatpush1.bf16.msra.mxu0 %v6522_v10  ;;  %1712 = vmatprep.mubr.bf16.mxu0 %v7424_v14  ;;  %v6594_v10 = vld [vmem:[#allocation6 + $0xa0] ss:$36 sps:$4 sm:$0xff]  }
  0x9e   : > { %1833 = vmatpush2.bf16.msra.mxu1 %v6519_v9  ;;  %1891 = vmatprep.subr.bf16.mxu0 %v6531_v13  ;;  %v6644_v9 = vld [vmem:[#allocation6 + $0x524] ss:$36 sps:$4 sm:$0xff]   ;;  %v6599_v13 = vld [vmem:[#allocation6 + $0x5c] ss:$36 sps:$4 sm:$0xff]  }
  0x9f   : > { %1834 = vmatprep.subr.bf16.mxu1 %v6528_v12  ;;  %v6642_v12 = vld [vmem:[#allocation6 + $0x520] ss:$36 sps:$4 sm:$0xff]  }
  0xa1   : > { %1892 = vmatpush1.bf16.msra.mxu0 %v6529_v16  ;;  %v6597_v16 = vld [vmem:[#allocation6 + $0x58] ss:$36 sps:$4 sm:$0xff]  }
  0xa2   : > { %1835 = vmatpush2.bf16.msra.mxu1 %v6526_v15  ;;  %1893 = vmatprep.subr.bf16.mxu0 %v6540_v18  ;;  %v6650_v15 = vld [vmem:[#allocation6 + $0x4dc] ss:$36 sps:$4 sm:$0xff]   ;;  %v6602_v18 = vld [vmem:[#allocation6 + $0x14] ss:$36 sps:$4 sm:$0xff]  }
  0xa3   : > { %1836 = vmatprep.subr.bf16.mxu1 %v6537_v17  ;;  %v6648_v17 = vld [vmem:[#allocation6 + $0x4d8] ss:$36 sps:$4 sm:$0xff]  }
  0xa4   : > { %1713 = vmatmul.mubr.bf16.gmra.mxu0 %v7431_v19 }
  0xa5   : > { %1894 = vmatpush1.bf16.msra.mxu0 %v6538_v21  ;;  %1722 = vmatprep.mubr.bf16.mxu0 %v7434_v24  ;;  %v6600_v21 = vld [vmem:[#allocation6 + $0x10] ss:$36 sps:$4 sm:$0xff]  }
  0xa6   : > { %1837 = vmatpush2.bf16.msra.mxu1 %v6535_v20  ;;  %1895 = vmatprep.subr.bf16.mxu0 %v6547_v23  ;;  %v6656_v20 = vld [vmem:[#allocation6 + $0x494] ss:$36 sps:$4 sm:$0xff]  }
  0xa7   : > { %1838 = vmatprep.subr.bf16.mxu1 %v6544_v22  ;;  %v6605_v22 = vld [vmem:[#allocation6 + $0x44c] ss:$36 sps:$4 sm:$0xff]  }
  0xa8   : > { %v6654_v23 = vld [vmem:[#allocation6 + $0x490] ss:$36 sps:$4 sm:$0xff]  }
  0xa9   : > { %1896 = vmatpush1.bf16.msra.mxu0 %v6545_v26  ;;  %v6603_v26 = vld [vmem:[#allocation6 + $0x448] ss:$36 sps:$4 sm:$0xff]  }
  0xaa   : > { %1839 = vmatpush2.bf16.msra.mxu1 %v6542_v25  ;;  %1897 = vmatprep.subr.bf16.mxu0 %v6556_v28  ;;  %v6662_v25 = vld [vmem:[#allocation6 + $0x214] ss:$36 sps:$4 sm:$0xff]   ;;  %v6608_v28 = vld [vmem:[#allocation6 + $0x404] ss:$36 sps:$4 sm:$0xff]  }
  0xab   : > { %1840 = vmatprep.subr.bf16.mxu1 %v6553_v27  ;;  %v6660_v27 = vld [vmem:[#allocation6 + $0x210] ss:$36 sps:$4 sm:$0xff]  }
  0xac   : > { %1723 = vmatmul.mubr.bf16.gmra.mxu0 %v7439_v29 }
  0xad   : > { %1898 = vmatpush1.bf16.msra.mxu0 %v6554_v31  ;;  %1732 = vmatprep.mubr.bf16.mxu0 %v7442_v34  ;;  %v6606_v31 = vld [vmem:[#allocation6 + $0x400] ss:$36 sps:$4 sm:$0xff]  }
  0xae   : > { %1841 = vmatpush2.bf16.msra.mxu1 %v6551_v30  ;;  %1899 = vmatprep.subr.bf16.mxu0 %v6563_v33  ;;  %v6668_v30 = vld [vmem:[#allocation6 + $0x1cc] ss:$36 sps:$4 sm:$0xff]  }
  0xaf   : > { %1842 = vmatprep.subr.bf16.mxu1 %v6560_v32  ;;  %v6611_v32 = vld [vmem:[#allocation6 + $0x3bc] ss:$36 sps:$4 sm:$0xff]   ;;  %v6666_v33 = vld [vmem:[#allocation6 + $0x1c8] ss:$36 sps:$4 sm:$0xff]  }
  0xb1   : > { %1900 = vmatpush1.bf16.msra.mxu0 %v6561_v37  ;;  %v6609_v37 = vld [vmem:[#allocation6 + $0x3b8] ss:$36 sps:$4 sm:$0xff]  }
  0xb2   : > { %1843 = vmatpush2.bf16.msra.mxu1 %v6558_v36  ;;  %1901 = vmatprep.subr.bf16.mxu0 %v6572_v39  ;;  %v6674_v36 = vld [vmem:[#allocation6 + $0x184] ss:$36 sps:$4 sm:$0xff]  }
  0xb3   : > { %1844 = vmatprep.subr.bf16.mxu1 %v6569_v38  ;;  %v6617_v38 = vld [vmem:[#allocation6 + $0x374] ss:$36 sps:$4 sm:$0xff]   ;;  %v6672_v39 = vld [vmem:[#allocation6 + $0x180] ss:$36 sps:$4 sm:$0xff]  }
  0xb4   : > { %1733 = vmatmul.mubr.bf16.gmra.mxu0 %v7447_v40 }
  0xb5   : > { %1902 = vmatpush1.bf16.msra.mxu0 %v6570_v42  ;;  %1921 = vmatprep.mubr.bf16.mxu0 %v8745_v0  ;;  %v6615_v42 = vld [vmem:[#allocation6 + $0x370] ss:$36 sps:$4 sm:$0xff]  }
  0xb6   : > { %1845 = vmatpush2.bf16.msra.mxu1 %v6567_v41  ;;  %1903 = vmatprep.subr.bf16.mxu0 %v6578_v44  ;;  %v6680_v41 = vld [vmem:[#allocation6 + $0x13c] ss:$36 sps:$4 sm:$0xff]   ;;  %v6686_v44 = vld [vmem:[#allocation6 + $0xf4] ss:$36 sps:$4 sm:$0xff]  }
  0xb7   : > { %1846 = vmatprep.subr.bf16.mxu1 %v6575_v43  ;;  %v6623_v43 = vld [vmem:[#allocation6 + $0x32c] ss:$36 sps:$4 sm:$0xff]  }
  0xb9   : > { %1904 = vmatpush1.bf16.msra.mxu0 %v6576_v46  ;;  %v6629_v46 = vld [vmem:[#allocation6 + $0x2e4] ss:$36 sps:$4 sm:$0xff]  }
  0xba   : > { %1847 = vmatpush2.bf16.msra.mxu1 %v6573_v45  ;;  %1962 = vmatprep.subr.bf16.mxu0 %v6581_v47  ;;  %v6621_v45 = vld [vmem:[#allocation6 + $0x328] ss:$36 sps:$4 sm:$0xff]   ;;  %v6684_v47 = vld [vmem:[#allocation6 + $0xf0] ss:$36 sps:$4 sm:$0xff]  }
  0xbb   : > { %2035 = vmatprep.subr.bf16.mxu1 %v6614_v48  ;;  %v6692_v48 = vld [vmem:[#allocation6 + $0xac] ss:$36 sps:$4 sm:$0xff]  }
  0xbc   : > { %1922 = vmatmul.mubr.bf16.vlgmr.msra.gmra.mxu0 %v7399_v35 }
  0xbd   : > { %1849 = vmatmul.mubr.bf16.vlgmr.msra.gmra.mxu1 %v7418_v6  ;;  %1931 = vmatprep.mubr.bf16.mxu0 %v8745_v0 }
  0xbe   : > { %1858 = vmatprep.mubr.bf16.mxu1 %v7424_v14  ;;  %1963 = vmatpush1.bf16.msra.mxu0 %v6579_v49  ;;  %v6627_v49 = vld [vmem:[#allocation6 + $0x2e0] ss:$36 sps:$4 sm:$0xff]  }
  0xbf   : > { %2036 = vmatpush1.bf16.msra.mxu1 %v6612_v50  ;;  %1964 = vmatprep.subr.bf16.mxu0 %v6584_v52  ;;  %v6635_v50 = vld [vmem:[#allocation6 + $0x29c] ss:$36 sps:$4 sm:$0xff]   ;;  %v6697_v52 = vld [vmem:[#allocation6 + $0x64] ss:$36 sps:$4 sm:$0xff]  }
  0xc0   : > { %2037 = vmatprep.subr.bf16.mxu1 %v6620_v53  ;;  %v6633_v53 = vld [vmem:[#allocation6 + $0x298] ss:$36 sps:$4 sm:$0xff]  }
  0xc2   : > { %1965 = vmatpush1.bf16.msra.mxu0 %v6582_v54  ;;  %v6641_v54 = vld [vmem:[#allocation6 + $0x254] ss:$36 sps:$4 sm:$0xff]  }
  0xc3   : > { %2038 = vmatpush1.bf16.msra.mxu1 %v6618_v56  ;;  %1966 = vmatprep.subr.bf16.mxu0 %v6587_v57  ;;  %v6695_v56 = vld [vmem:[#allocation6 + $0x60] ss:$36 sps:$4 sm:$0xff]  }
  0xc4   : > { %2039 = vmatprep.subr.bf16.mxu1 %v6626_v58  ;;  %1932 = vmatmul.mubr.bf16.gmra.mxu0 %v7408_v55  ;;  %v6702_v57 = vld [vmem:[#allocation6 + $0x1c] ss:$36 sps:$4 sm:$0xff]   ;;  %v6639_v58 = vld [vmem:[#allocation6 + $0x250] ss:$36 sps:$4 sm:$0xff]  }
  0xc5   : > { %1859 = vmatmul.mubr.bf16.gmra.mxu1 %v7431_v19  ;;  %1941 = vmatprep.mubr.bf16.mxu0 %v8745_v0 }
  0xc6   : > { %1868 = vmatprep.mubr.bf16.mxu1 %v7434_v24  ;;  %1967 = vmatpush1.bf16.msra.mxu0 %v6585_v59  ;;  %v6700_v59 = vld [vmem:[#allocation6 + $0x18] ss:$36 sps:$4 sm:$0xff]  }
  0xc7   : > { %2040 = vmatpush1.bf16.msra.mxu1 %v6624_v60  ;;  %1968 = vmatprep.subr.bf16.mxu0 %v6590_v61  ;;  %v6707_v60 = vld [vmem:[#allocation6 + $0x454] ss:$36 sps:$4 sm:$0xff]  }
  0xc8   : > { %2041 = vmatprep.subr.bf16.mxu1 %v6632_v62  ;;  %v6645_v61 = vld [vmem:[#allocation6 + $0x690] ss:$36 sps:$4 sm:$0xff]  }
  0xc9   : > { %v6653_v62 = vld [vmem:[#allocation6 + $0x64c] ss:$36 sps:$4 sm:$0xff]  }
  0xca   : > { %1969 = vmatpush1.bf16.msra.mxu0 %v6588_v63  ;;  %v6705_v63 = vld [vmem:[#allocation6 + $0x450] ss:$36 sps:$4 sm:$0xff]  }
  0xcb   : > { %2042 = vmatpush1.bf16.msra.mxu1 %v6630_v2  ;;  %1970 = vmatprep.subr.bf16.mxu0 %v6593_v3  ;;  %v6712_v2 = vld [vmem:[#allocation6 + $0x40c] ss:$36 sps:$4 sm:$0xff]  }
  0xcc   : > { %2043 = vmatprep.subr.bf16.mxu1 %v6638_v4  ;;  %1942 = vmatmul.mubr.bf16.gmra.mxu0 %v7413_v1  ;;  %v6651_v3 = vld [vmem:[#allocation6 + $0x648] ss:$36 sps:$4 sm:$0xff]  }
  0xcd   : > { %1869 = vmatmul.mubr.bf16.gmra.mxu1 %v7439_v29  ;;  %1951 = vmatprep.mubr.bf16.mxu0 %v8745_v0  ;;  %v6659_v4 = vld [vmem:[#allocation6 + $0x604] ss:$36 sps:$4 sm:$0xff]  }
  0xce   : > { %1878 = vmatprep.mubr.bf16.mxu1 %v7442_v34  ;;  %1971 = vmatpush1.bf16.msra.mxu0 %v6591_v5  ;;  %v6710_v5 = vld [vmem:[#allocation6 + $0x408] ss:$36 sps:$4 sm:$0xff]  }
  0xcf   : > { %2044 = vmatpush1.bf16.msra.mxu1 %v6636_v7  ;;  %1972 = vmatprep.subr.bf16.mxu0 %v6596_v8  ;;  %v6657_v7 = vld [vmem:[#allocation6 + $0x600] ss:$36 sps:$4 sm:$0xff]  }
  0xd0   : > { %2045 = vmatprep.subr.bf16.mxu1 %v6644_v9  ;;  %v6715_v8 = vld [vmem:[#allocation6 + $0x3c0] ss:$36 sps:$4 sm:$0xff]  }
  0xd1   : > { %v6722_v9 = vld [vmem:[#allocation6 + $0x37c] ss:$36 sps:$4 sm:$0xff]  }
  0xd2   : > { %1973 = vmatpush1.bf16.msra.mxu0 %v6594_v10  ;;  %v6663_v10 = vld [vmem:[#allocation6 + $0x5b8] ss:$36 sps:$4 sm:$0xff]  }
  0xd3   : > { %2046 = vmatpush1.bf16.msra.mxu1 %v6642_v12  ;;  %1974 = vmatprep.subr.bf16.mxu0 %v6599_v13  ;;  %v6720_v12 = vld [vmem:[#allocation6 + $0x378] ss:$36 sps:$4 sm:$0xff]   ;;  %v6669_v13 = vld [vmem:[#allocation6 + $0x570] ss:$36 sps:$4 sm:$0xff]  }
  0xd4   : > { %2047 = vmatprep.subr.bf16.mxu1 %v6650_v15  ;;  %1952 = vmatmul.mubr.bf16.gmra.mxu0 %v7421_v11  ;;  %v6677_v15 = vld [vmem:[#allocation6 + $0x52c] ss:$36 sps:$4 sm:$0xff]  }
  0xd5   : > { %1879 = vmatmul.mubr.bf16.gmra.mxu1 %v7447_v40  ;;  %1994 = vmatprep.mubr.bf16.mxu0 %v7404_v51 }
  0xd6   : > { %2067 = vmatprep.mubr.bf16.mxu1 %v8745_v0  ;;  %1975 = vmatpush1.bf16.msra.mxu0 %v6597_v16  ;;  %v6725_v16 = vld [vmem:[#allocation6 + $0x330] ss:$36 sps:$4 sm:$0xff]  }
  0xd7   : > { %2048 = vmatpush1.bf16.msra.mxu1 %v6648_v17  ;;  %1976 = vmatprep.subr.bf16.mxu0 %v6602_v18  ;;  %v6732_v17 = vld [vmem:[#allocation6 + $0x2ec] ss:$36 sps:$4 sm:$0xff]  }
  0xd8   : > { %2049 = vmatprep.subr.bf16.mxu1 %v6656_v20  ;;  %v6675_v18 = vld [vmem:[#allocation6 + $0x528] ss:$36 sps:$4 sm:$0xff]  }
  0xd9   : > { %v6730_v20 = vld [vmem:[#allocation6 + $0x2e8] ss:$36 sps:$4 sm:$0xff]  }
  0xda   : > { %1977 = vmatpush1.bf16.msra.mxu0 %v6600_v21  ;;  %v6681_v21 = vld [vmem:[#allocation6 + $0x4e0] ss:$36 sps:$4 sm:$0xff]  }
  0xdb   : > { %2050 = vmatpush1.bf16.msra.mxu1 %v6654_v23  ;;  %1978 = vmatprep.subr.bf16.mxu0 %v6605_v22  ;;  %v6689_v22 = vld [vmem:[#allocation6 + $0x49c] ss:$36 sps:$4 sm:$0xff]  }
  0xdc   : > { %2108 = vmatprep.subr.bf16.mxu1 %v6662_v25  ;;  %v6733_v23 = vld [vmem:[#allocation6 + $0x2a0] ss:$36 sps:$4 sm:$0xff]  }
  0xdd   : > { %v6738_v25 = vld [vmem:[#allocation6 + $0x25c] ss:$36 sps:$4 sm:$0xff]  }
  0xde   : > { %2068 = vmatmul.mubr.bf16.vlgmr.msra.gmra.mxu1 %v7399_v35  ;;  %1979 = vmatpush2.bf16.msra.mxu0 %v6603_v26  ;;  %v6678_v35 = vld [vmem:[#allocation6 + $0x138] ss:$36 sps:$4 sm:$0xff]  }
  0xdf   : > { %2109 = vmatpush1.bf16.msra.mxu1 %v6660_v27  ;;  %1980 = vmatprep.subr.bf16.mxu0 %v6608_v28  ;;  %v6687_v26 = vld [vmem:[#allocation6 + $0x498] ss:$36 sps:$4 sm:$0xff]  }
  0xe0   : > { %2110 = vmatprep.subr.bf16.mxu1 %v6668_v30  ;;  %2077 = vmatprep.mubr.bf16.mxu1 %v8745_v0  ;;  %v6736_v27 = vld [vmem:[#allocation6 + $0x258] ss:$36 sps:$4 sm:$0xff]   ;;  %v6698_v30 = vld [vmem:[#allocation6 + $0x410] ss:$36 sps:$4 sm:$0xff]  }
  0xe1   : > { %v6694_v28 = vld [vmem:[#allocation6 + $0x218] ss:$36 sps:$4 sm:$0xff]  }
  0xe2   : > { %1981 = vmatpush2.bf16.msra.mxu0 %v6606_v31  ;;  %v7484_v31 = vld [vmem:[%s7387_s30 + $0x8] ss:$12 sps:$4 sm:$0xff]  }
  0xe3   : > { %2111 = vmatpush1.bf16.msra.mxu1 %v6666_v33  ;;  %1982 = vmatprep.subr.bf16.mxu0 %v6611_v32  ;;  %v6699_v32 = vld [vmem:[#allocation6 + $0x1d0] ss:$36 sps:$4 sm:$0xff]   ;;  %v6703_v33 = vld [vmem:[#allocation6 + $0x3c8] ss:$36 sps:$4 sm:$0xff]  }
  0xe4   : > { %2112 = vmatprep.subr.bf16.mxu1 %v6674_v36  ;;  %v7489_v36 = vld [vmem:[%s7387_s30] ss:$12 sps:$4 sm:$0xff]  }
  0xe6   : > { %2078 = vmatmul.mubr.bf16.gmra.mxu1 %v7408_v55  ;;  %1983 = vmatpush2.bf16.msra.mxu0 %v6609_v37  ;;  %v6690_v55 = vld [vmem:[#allocation6 + $0xa8] ss:$36 sps:$4 sm:$0xff]  }
  0xe7   : > { %2113 = vmatpush1.bf16.msra.mxu1 %v6672_v39  ;;  %1984 = vmatprep.subr.bf16.mxu0 %v6617_v38  ;;  %v7493_v37 = vld [vmem:[%s7387_s30 + $0x1c] ss:$12 sps:$4 sm:$0xff]  }
  0xe8   : > { %2114 = vmatprep.subr.bf16.mxu1 %v6680_v41  ;;  %2087 = vmatprep.mubr.bf16.mxu1 %v8745_v0  ;;  %v6741_v38 = vld [vmem:[#allocation6 + $0x608] ss:$36 sps:$4 sm:$0xff]   ;;  %v6708_v41 = vld [vmem:[#allocation6 + $0x380] ss:$36 sps:$4 sm:$0xff]  }
  0xe9   : > { %v6704_v39 = vld [vmem:[#allocation6 + $0x188] ss:$36 sps:$4 sm:$0xff]  }
  0xea   : > { %1985 = vmatpush2.bf16.msra.mxu0 %v6615_v42  ;;  %v7054_v42 = vld [vmem:[%s7387_s30 + $0x20] ss:$12 sps:$4 sm:$0xff]  }
  0xeb   : > { %2115 = vmatpush1.bf16.msra.mxu1 %v6678_v35  ;;  %1986 = vmatprep.subr.bf16.mxu0 %v6623_v43  ;;  %v6742_v43 = vld [vmem:[#allocation6 + $0x5c0] ss:$36 sps:$4 sm:$0xff]  }
  0xec   : > { %2116 = vmatprep.subr.bf16.mxu1 %v6686_v44  ;;  %v6709_v35 = vld [vmem:[#allocation6 + $0x140] ss:$36 sps:$4 sm:$0xff]   ;;  %v6713_v44 = vld [vmem:[#allocation6 + $0x338] ss:$36 sps:$4 sm:$0xff]  }
  0xee   : > { %2088 = vmatmul.mubr.bf16.gmra.mxu1 %v7413_v1  ;;  %1987 = vmatpush2.bf16.msra.mxu0 %v6621_v45  ;;  %v6647_v1 = vld [vmem:[#allocation6 + $0x694] ss:$36 sps:$4 sm:$0xff]  }
  0xef   : > { %2117 = vmatpush1.bf16.msra.mxu1 %v6684_v47  ;;  %1988 = vmatprep.subr.bf16.mxu0 %v6629_v46  ;;  %v7055_v45 = vld [vmem:[%s7387_s30 + $0x18] ss:$12 sps:$4 sm:$0xff]   ;;  %v7056_v46 = vld [vmem:[%s7387_s30 + $0x34] ss:$12 sps:$4 sm:$0xff]  }
  0xf0   : > { %2118 = vmatprep.subr.bf16.mxu1 %v6692_v48  ;;  %2097 = vmatprep.mubr.bf16.mxu1 %v8745_v0  ;;  %v6743_v47 = vld [vmem:[#allocation6 + $0x578] ss:$36 sps:$4 sm:$0xff]  }
  0xf1   : > { %v6714_v48 = vld [vmem:[#allocation6 + $0xf8] ss:$36 sps:$4 sm:$0xff]  }
  0xf2   : > { %1989 = vmatpush2.bf16.msra.mxu0 %v6627_v49  ;;  %v6718_v49 = vld [vmem:[#allocation6 + $0x2f0] ss:$36 sps:$4 sm:$0xff]  }
  0xf3   : > { %2119 = vmatpush1.bf16.msra.mxu1 %v6690_v55  ;;  %1990 = vmatprep.subr.bf16.mxu0 %v6635_v50  ;;  %v7057_v55 = vld [vmem:[%s7387_s30 + $0x38] ss:$12 sps:$4 sm:$0xff]   ;;  %v6744_v50 = vld [vmem:[#allocation6 + $0x530] ss:$36 sps:$4 sm:$0xff]  }
  0xf4   : > { %2120 = vmatprep.subr.bf16.mxu1 %v6697_v52  ;;  %v6719_v52 = vld [vmem:[#allocation6 + $0xb0] ss:$36 sps:$4 sm:$0xff]  }
  0xf6   : > { %2098 = vmatmul.mubr.bf16.gmra.mxu1 %v7421_v11  ;;  %1991 = vmatpush2.bf16.msra.mxu0 %v6633_v53  ;;  %v6717_v11 = vld [vmem:[#allocation6 + $0x3c4] ss:$36 sps:$4 sm:$0xff]  }
  0xf7   : > { %2121 = vmatpush1.bf16.msra.mxu1 %v6695_v56  ;;  %1992 = vmatprep.subr.bf16.mxu0 %v6641_v54  ;;  %v6723_v53 = vld [vmem:[#allocation6 + $0x2a8] ss:$36 sps:$4 sm:$0xff]   ;;  %v7058_v54 = vld [vmem:[%s7387_s30 + $0x30] ss:$12 sps:$4 sm:$0xff]  }
  0xf8   : > { %2122 = vmatprep.subr.bf16.mxu1 %v6702_v57  ;;  %2140 = vmatprep.mubr.bf16.mxu1 %v7404_v51  ;;  %v6665_v51 = vld [vmem:[#allocation6 + $0x5bc] ss:$36 sps:$4 sm:$0xff]   ;;  %v7059_v56 = vld [vmem:[%s7387_s30 + $0x4c] ss:$12 sps:$4 sm:$0xff]  }
  0xf9   : > { %v6745_v57 = vld [vmem:[#allocation6 + $0x4e8] ss:$36 sps:$4 sm:$0xff]  }
  0xfa   : > { %1993 = vmatpush2.bf16.msra.mxu0 %v6639_v58  ;;  %v6724_v58 = vld [vmem:[#allocation6 + $0x68] ss:$36 sps:$4 sm:$0xff]  }
  0xfb   : > { %2123 = vmatpush1.bf16.msra.mxu1 %v6700_v59  ;;  %2181 = vmatprep.subr.bf16.mxu0 %v6647_v1  ;;  %v6728_v59 = vld [vmem:[#allocation6 + $0x260] ss:$36 sps:$4 sm:$0xff]   ;;  %v7060_v1 = vld [vmem:[%s7387_s30 + $0x50] ss:$12 sps:$4 sm:$0xff]  }
  0xfc   : > { %2124 = vmatprep.subr.bf16.mxu1 %v6707_v60  ;;  %v6746_v60 = vld [vmem:[#allocation6 + $0x4a0] ss:$36 sps:$4 sm:$0xff]  }
  0xfd   : > { %1995 = vmatmul.mubr.bf16.vlgmr.msra.gmra.mxu0 %v7418_v6  ;;  %v6671_v6 = vld [vmem:[#allocation6 + $0x574] ss:$36 sps:$4 sm:$0xff]  }
  0xfe   : > { %2182 = vmatpush1.bf16.msra.mxu0 %v6645_v61  ;;  %2004 = vmatprep.mubr.bf16.mxu0 %v7424_v14  ;;  %v6727_v14 = vld [vmem:[#allocation6 + $0x334] ss:$36 sps:$4 sm:$0xff]   ;;  %v6729_v61 = vld [vmem:[#allocation6 + $0x20] ss:$36 sps:$4 sm:$0xff]  }
  0xff   : > { %2183 = vmatprep.subr.bf16.mxu0 %v6653_v62  ;;  %2125 = vmatpush2.bf16.msra.mxu1 %v6705_v63  ;;  %v7061_v62 = vld [vmem:[%s7387_s30 + $0x4] ss:$12 sps:$4 sm:$0xff]   ;;  %v7062_v63 = vld [vmem:[%s7387_s30 + $0x48] ss:$12 sps:$4 sm:$0xff]  }
 0x100   : > { %2126 = vmatprep.subr.bf16.mxu1 %v6712_v2 }
 0x102   : > { %2184 = vmatpush1.bf16.msra.mxu0 %v6651_v3 }
 0x103   : > { %2185 = vmatprep.subr.bf16.mxu0 %v6659_v4  ;;  %2127 = vmatpush2.bf16.msra.mxu1 %v6710_v5 }
 0x104   : > { %2128 = vmatprep.subr.bf16.mxu1 %v6717_v11 }
 0x105   : > { %2005 = vmatmul.mubr.bf16.gmra.mxu0 %v7431_v19  ;;  %v6683_v19 = vld [vmem:[#allocation6 + $0x4e4] ss:$36 sps:$4 sm:$0xff]  }
 0x106   : > { %2186 = vmatpush1.bf16.msra.mxu0 %v6657_v7  ;;  %2014 = vmatprep.mubr.bf16.mxu0 %v7434_v24  ;;  %v6735_v24 = vld [vmem:[#allocation6 + $0x2a4] ss:$36 sps:$4 sm:$0xff]  }
 0x107   : > { %2187 = vmatprep.subr.bf16.mxu0 %v6665_v51  ;;  %2129 = vmatpush2.bf16.msra.mxu1 %v6715_v8 }
 0x108   : > { %2130 = vmatprep.subr.bf16.mxu1 %v6722_v9 }
 0x10a   : > { %2188 = vmatpush1.bf16.msra.mxu0 %v6663_v10 }
 0x10b   : > { %2189 = vmatprep.subr.bf16.mxu0 %v6671_v6  ;;  %2131 = vmatpush2.bf16.msra.mxu1 %v6720_v12 }
 0x10c   : > { %2132 = vmatprep.subr.bf16.mxu1 %v6727_v14 }
 0x10d   : > { %2015 = vmatmul.mubr.bf16.gmra.mxu0 %v7439_v29  ;;  %v6693_v29 = vld [vmem:[#allocation6 + $0x458] ss:$36 sps:$4 sm:$0xff]  }
 0x10e   : > { %2190 = vmatpush1.bf16.msra.mxu0 %v6669_v13  ;;  %2024 = vmatprep.mubr.bf16.mxu0 %v7442_v34  ;;  %v6739_v34 = vld [vmem:[#allocation6 + $0x698] ss:$36 sps:$4 sm:$0xff]  }
 0x10f   : > { %2191 = vmatprep.subr.bf16.mxu0 %v6677_v15  ;;  %2133 = vmatpush2.bf16.msra.mxu1 %v6725_v16 }
 0x110   : > { %2134 = vmatprep.subr.bf16.mxu1 %v6732_v17 }
 0x112   : > { %2192 = vmatpush1.bf16.msra.mxu0 %v6675_v18 }
 0x113   : > { %2193 = vmatprep.subr.bf16.mxu0 %v6683_v19  ;;  %2135 = vmatpush2.bf16.msra.mxu1 %v6730_v20 }
 0x114   : > { %2136 = vmatprep.subr.bf16.mxu1 %v6735_v24 }
 0x115   : > { %2025 = vmatmul.mubr.bf16.gmra.mxu0 %v7447_v40  ;;  %v6740_v40 = vld [vmem:[#allocation6 + $0x650] ss:$36 sps:$4 sm:$0xff]  }
 0x116   : > { %2194 = vmatpush1.bf16.msra.mxu0 %v6681_v21  ;;  %2213 = vmatprep.mubr.bf16.mxu0 %v8745_v0 }
 0x117   : > { %2195 = vmatprep.subr.bf16.mxu0 %v6689_v22  ;;  %2137 = vmatpush2.bf16.msra.mxu1 %v6733_v23 }
 0x118   : > { %2138 = vmatprep.subr.bf16.mxu1 %v6738_v25 }
 0x11a   : > { %2196 = vmatpush1.bf16.msra.mxu0 %v6687_v26 }
 0x11b   : > { %5799 = vmatprep.subr.bf16.mxu0 %v6693_v29  ;;  %2139 = vmatpush2.bf16.msra.mxu1 %v6736_v27 }
 0x11c   : > { %5999 = vmatprep.subr.bf16.mxu1 %v6739_v34 }
 0x11d   : > { %2214 = vmatmul.mubr.bf16.vlgmr.msra.gmra.mxu0 %v7484_v31 }
 0x11e   : > { %5800 = vmatpush3.bf16.msra.mxu0 %v6694_v28  ;;  %2223 = vmatprep.mubr.bf16.mxu0 %v8745_v0 }
 0x11f   : > { %5801 = vmatprep.subr.bf16.mxu0 %v6698_v30  ;;  %2141 = vmatmul.mubr.bf16.vlgmr.msra.gmra.mxu1 %v7489_v36 }
 0x120   : > { %2150 = vmatprep.mubr.bf16.mxu1 %v7493_v37  ;;  %6000 = vmatpush3.bf16.msra.mxu1 %v6739_v34 }
 0x121   : > { %6001 = vmatprep.subr.bf16.mxu1 %v6740_v40 }
 0x122   : > { %5802 = vmatpush3.bf16.msra.mxu0 %v6699_v32 }
 0x123   : > { %5803 = vmatprep.subr.bf16.mxu0 %v6703_v33 }
 0x124   : > { %6002 = vmatpush3.bf16.msra.mxu1 %v6740_v40 }
 0x125   : > { %2224 = vmatmul.mubr.bf16.gmra.mxu0 %v7054_v42  ;;  %6003 = vmatprep.subr.bf16.mxu1 %v6741_v38 }
 0x126   : > { %5804 = vmatpush3.bf16.msra.mxu0 %v6704_v39  ;;  %2233 = vmatprep.mubr.bf16.mxu0 %v8745_v0 }
 0x127   : > { %5805 = vmatprep.subr.bf16.mxu0 %v6708_v41  ;;  %2151 = vmatmul.mubr.bf16.gmra.mxu1 %v7055_v45 }
 0x128   : > { %2160 = vmatprep.mubr.bf16.mxu1 %v7056_v46  ;;  %6004 = vmatpush3.bf16.msra.mxu1 %v6741_v38 }
 0x129   : > { %6005 = vmatprep.subr.bf16.mxu1 %v6742_v43 }
 0x12a   : > { %5806 = vmatpush3.bf16.msra.mxu0 %v6709_v35 }
 0x12b   : > { %5807 = vmatprep.subr.bf16.mxu0 %v6713_v44 }
 0x12c   : > { %6006 = vmatpush3.bf16.msra.mxu1 %v6742_v43 }
 0x12d   : > { %2234 = vmatmul.mubr.bf16.gmra.mxu0 %v7057_v55  ;;  %6007 = vmatprep.subr.bf16.mxu1 %v6743_v47 }
 0x12e   : > { %5808 = vmatpush3.bf16.msra.mxu0 %v6714_v48  ;;  %2243 = vmatprep.mubr.bf16.mxu0 %v8745_v0 }
 0x12f   : > { %5809 = vmatprep.subr.bf16.mxu0 %v6718_v49  ;;  %2161 = vmatmul.mubr.bf16.gmra.mxu1 %v7058_v54 }
 0x130   : > { %2170 = vmatprep.mubr.bf16.mxu1 %v7059_v56  ;;  %6008 = vmatpush3.bf16.msra.mxu1 %v6743_v47 }
 0x131   : > { %6009 = vmatprep.subr.bf16.mxu1 %v6744_v50 }
 0x132   : > { %5810 = vmatpush3.bf16.msra.mxu0 %v6719_v52 }
 0x133   : > { %5811 = vmatprep.subr.bf16.mxu0 %v6723_v53 }
 0x134   : > { %6010 = vmatpush3.bf16.msra.mxu1 %v6744_v50 }
 0x135   : > { %2244 = vmatmul.mubr.bf16.gmra.mxu0 %v7060_v1  ;;  %6011 = vmatprep.subr.bf16.mxu1 %v6745_v57 }
 0x136   : > { %5812 = vmatpush3.bf16.msra.mxu0 %v6724_v58  ;;  %2286 = vmatprep.mubr.bf16.mxu0 %v7061_v62 }
 0x137   : > { %5813 = vmatprep.subr.bf16.mxu0 %v6728_v59  ;;  %2171 = vmatmul.mubr.bf16.gmra.mxu1 %v7062_v63 }
 0x138   : > { %6012 = vmatpush3.bf16.msra.mxu1 %v6745_v57  ;;  %6015 = vmatprep.mubr.bf16.mxu1 %v7484_v31 }
 0x139   : > { %6013 = vmatprep.subr.bf16.mxu1 %v6746_v60 }
 0x13a   : > { %5814 = vmatpush3.bf16.msra.mxu0 %v6729_v61 }
 0x13c   : > { %6014 = vmatpush3.bf16.msra.mxu1 %v6746_v60 }
 0x13d   : > { %2287 = vmatmul.mubr.bf16.vlgmr.msra.gmra.mxu0 %v7489_v36  ;;  %v1777_v2 = vpop.f32.mrf.mxu1 }
 0x13e   : > { %2294 = vmatprep.mubr.bf16.mxu0 %v7493_v37 }
 0x13f   : > { %6016 = vmatmul.mubr.bf16.vlgmr.msra.gmra.mxu1 %v7054_v42  ;;  %v1779_v3 = vpop.f32.mrf.mxu1 }
 0x140   : > { %6019 = vmatprep.mubr.bf16.mxu1 %v7057_v55 }
 0x141   : > { %v1781_v4 = vpop.f32.mrf.mxu1 }
 0x143   : > { %v7510_v5 = vpop.f32.mrf.mxu1 }
 0x145   : > { %2295 = vmatmul.mubr.bf16.gmra.mxu0 %v7055_v45  ;;  %v1787_v11 = vpop.f32.mrf.mxu1 }
 0x146   : > { %2302 = vmatprep.mubr.bf16.mxu0 %v7056_v46 }
 0x147   : > { %6020 = vmatmul.mubr.bf16.gmra.mxu1 %v7060_v1  ;;  %v1789_v7 = vpop.f32.mrf.mxu1 }
 0x149   : > { %v1791_v51 = vpop.f32.mrf.mxu1 }
 0x14b   : > { %v7512_v8 = vpop.f32.mrf.mxu1 }
 0x14d   : > { %2303 = vmatmul.mubr.bf16.gmra.mxu0 %v7058_v54  ;;  %v1797_v6 = vpop.f32.mrf.mxu1 }
 0x14e   : > { %2310 = vmatprep.mubr.bf16.mxu0 %v7059_v56 }
 0x14f   : > { %v1799_v17 = vpop.f32.mrf.mxu1 }
 0x151   : > { %v1801_v21 = vpop.f32.mrf.mxu1 }
 0x153   : > { %v7526_v29 = vpop.f32.mrf.mxu1 }
 0x155   : > { %2311 = vmatmul.mubr.bf16.gmra.mxu0 %v7062_v63  ;;  %v1807_v31 = vpop.f32.mrf.mxu1 }
 0x157   : > { %v1809_v36 = vpop.f32.mrf.mxu1 }
 0x159   : > { %v1811_v42 = vpop.f32.mrf.mxu1 }
 0x15b   : > { %v7538_v46 = vpop.f32.mrf.mxu1 }
 0x15c   : > { %v1704_v9 = vpop.f32.mrf.mxu0 }
 0x15d   : > { %v1778_v13 = vadd.f32 %v1777_v2, %v1704_v9 }
 0x15e   : > { %v1706_v10 = vpop.f32.mrf.mxu0 }
 0x15f   : > { %v7514_v12 = vadd.f32 %v1779_v3, %v1706_v10 }
 0x160   : > { %v1708_v14 = vpop.f32.mrf.mxu0 }
 0x161   : > { %v1782_v15 = vadd.f32 %v1781_v4, %v1708_v14 }
 0x162   : > { %v7516_v16 = vpop.f32.mrf.mxu0 }
 0x163   : > { %v7518_v18 = vpack.c.bf16 %v1782_v15, %v1778_v13 }
 0x164   : > { %v1714_v19 = vpop.f32.mrf.mxu0 }
 0x165   : > { %v1788_v20 = vadd.f32 %v1787_v11, %v1714_v19  ;;  %6031 = vmatprep.mubr.msk.bf16.mxu0 %vm2439_vm0, %v7518_v18 }
 0x166   : > { %v1716_v24 = vpop.f32.mrf.mxu0 }
 0x167   : > { %v7522_v22 = vadd.f32 %v1789_v7, %v1716_v24 }
 0x168   : > { %v1718_v23 = vpop.f32.mrf.mxu0 }
 0x169   : > { %v1792_v25 = vadd.f32 %v1791_v51, %v1718_v23 }
 0x16a   : > { %v7524_v26 = vpop.f32.mrf.mxu0 }
 0x16b   : > { %v7528_v27 = vpack.c.bf16 %v1792_v25, %v1788_v20 }
 0x16c   : > { %v1724_v34 = vpop.f32.mrf.mxu0 }
 0x16d   : > { %v1798_v28 = vadd.f32 %v1797_v6, %v1724_v34 }
 0x16e   : > { %v1726_v30 = vpop.f32.mrf.mxu0 }
 0x16f   : > { %v7530_v40 = vadd.f32 %v1799_v17, %v1726_v30 }
 0x170   : > { %v1728_v32 = vpop.f32.mrf.mxu0 }
 0x171   : > { %v1802_v33 = vadd.f32 %v1801_v21, %v1728_v32 }
 0x172   : > { %v7532_v37 = vpop.f32.mrf.mxu0 }
 0x173   : > { %v7534_v38 = vpack.c.bf16 %v1802_v33, %v1798_v28 }
 0x174   : > { %v1734_v39 = vpop.f32.mrf.mxu0 }
 0x175   : > { %v1808_v41 = vadd.f32 %v1807_v31, %v1734_v39 }
 0x176   : > { %v1736_v43 = vpop.f32.mrf.mxu0 }
 0x177   : > { %v7536_v35 = vadd.f32 %v1809_v36, %v1736_v43 }
 0x178   : > { %v1738_v44 = vpop.f32.mrf.mxu0 }
 0x179   : > { %v1812_v45 = vadd.f32 %v1811_v42, %v1738_v44 }
 0x17a   : > { %v7540_v47 = vpop.f32.mrf.mxu0 }
 0x17b   : > { %v7542_v48 = vpack.c.bf16 %v1812_v45, %v1808_v41 }
 0x17c   : > { %v1923_v55 = vpop.f32.mrf.mxu0 }
 0x17d   : > { %v1850_v49 = vpop.f32.mrf.mxu1 }
 0x17e   : > { %v1924_v50 = vadd.f32 %v1923_v55, %v1850_v49  ;;  %v1925_v53 = vpop.f32.mrf.mxu0 }
 0x17f   : > { %v1852_v52 = vpop.f32.mrf.mxu1 }
 0x180   : > { %v1927_v56 = vpop.f32.mrf.mxu0 }
 0x181   : > { %v1854_v54 = vpop.f32.mrf.mxu1 }
 0x182   : > { %v1928_v57 = vadd.f32 %v1927_v56, %v1854_v54  ;;  %v1929_v59 = vpop.f32.mrf.mxu0 }
 0x183   : > { %v1856_v58 = vpop.f32.mrf.mxu1 }
 0x184   : > { %v7544_v1 = vpack.c.bf16 %v1928_v57, %v1924_v50  ;;  %v1933_v61 = vpop.f32.mrf.mxu0 }
 0x185   : > { %v1860_v60 = vpop.f32.mrf.mxu1 }
 0x186   : > { %v1934_v62 = vadd.f32 %v1933_v61, %v1860_v60  ;;  %v1935_v2 = vpop.f32.mrf.mxu0 }
 0x187   : > { %v1862_v63 = vpop.f32.mrf.mxu1 }
 0x188   : > { %v1937_v4 = vpop.f32.mrf.mxu0  ;;  %v1936_v61 = vadd.f32 %v1935_v2, %v1862_v63 }
 0x189   : > { %v1864_v3 = vpop.f32.mrf.mxu1 }
 0x18a   : > { %v1938_v11 = vadd.f32 %v1937_v4, %v1864_v3  ;;  %v1939_v51 = vpop.f32.mrf.mxu0 }
 0x18b   : > { %v1866_v7 = vpop.f32.mrf.mxu1 }
 0x18c   : > { %v7546_v9 = vpack.c.bf16 %v1938_v11, %v1934_v62  ;;  %v1943_v6 = vpop.f32.mrf.mxu0  ;;  %v1940_v57 = vadd.f32 %v1939_v51, %v1866_v7  ;;  %v1930_v11 = vadd.f32 %v1929_v59, %v1856_v58 }
 0x18d   : > { %v1870_v10 = vpop.f32.mrf.mxu1 }
 0x18e   : > { %8770 = vst [vmem:[#allocation13_spill] sm:$0xff] %v7546_v9  ;;  %v1944_v14 = vadd.f32 %v1943_v6, %v1870_v10  ;;  %v1945_v15 = vpop.f32.mrf.mxu0  ;;  %v7562_v62 = vpack.c.bf16 %v1940_v57, %v1936_v61  ;;  %v1926_v6 = vadd.f32 %v1925_v53, %v1852_v52 }
 0x18f   : > { %v1872_v13 = vpop.f32.mrf.mxu1 }
 0x190   : > { %v1947_v19 = vpop.f32.mrf.mxu0  ;;  %v1946_v49 = vadd.f32 %v1945_v15, %v1872_v13  ;;  %v2456_v7 = vsel %vm2439_vm0, %v7562_v62, 0 }
 0x191   : > { %v1874_v17 = vpop.f32.mrf.mxu1 }
 0x192   : > { %v1948_v20 = vadd.f32 %v1947_v19, %v1874_v17  ;;  %v1949_v21 = vpop.f32.mrf.mxu0 }
 0x193   : > { %v1876_v24 = vpop.f32.mrf.mxu1 }
 0x194   : > { %v7548_v23 = vpack.c.bf16 %v1948_v20, %v1944_v14  ;;  %v1953_v34 = vpop.f32.mrf.mxu0  ;;  %v1950_v42 = vadd.f32 %v1949_v21, %v1876_v24  ;;  %v7570_v14 = vpack.c.bf16 %v1930_v11, %v1926_v6 }
 0x195   : > { %v1880_v25 = vpop.f32.mrf.mxu1 }
 0x196   : > { %8771 = vst [vmem:[#allocation14_spill] sm:$0xff] %v7548_v23  ;;  %v1954_v28 = vadd.f32 %v1953_v34, %v1880_v25  ;;  %v1955_v31 = vpop.f32.mrf.mxu0  ;;  %v7554_v50 = vpack.c.bf16 %v1950_v42, %v1946_v49  ;;  %v2453_v51 = vsel %vm2439_vm0, %v7570_v14, 0 }
 0x197   : > { %v1882_v30 = vpop.f32.mrf.mxu1 }
 0x198   : > { %v1957_v33 = vpop.f32.mrf.mxu0  ;;  %v1956_v43 = vadd.f32 %v1955_v31, %v1882_v30  ;;  %v2459_v3 = vsel %vm2439_vm0, %v7554_v50, 0 }
 0x199   : > { %v1884_v32 = vpop.f32.mrf.mxu1 }
 0x19a   : > { %v1958_v36 = vadd.f32 %v1957_v33, %v1884_v32  ;;  %v1959_v41 = vpop.f32.mrf.mxu0 }
 0x19b   : > { %v1886_v39 = vpop.f32.mrf.mxu1 }
 0x19c   : > { %v7550_v44 = vpack.c.bf16 %v1958_v36, %v1954_v28  ;;  %v1960_v45 = vadd.f32 %v1959_v41, %v1886_v39 }
 0x19e   : > { %8772 = vst [vmem:[#allocation15_spill] sm:$0xff] %v7550_v44  ;;  %v7552_v55 = vpack.c.bf16 %v1960_v45, %v1956_v43  ;;  %v2069_v56 = vpop.f32.mrf.mxu1 }
 0x1a0   : > { %6255 = vmatprep.subr.msk.bf16.mxu0 %vm2439_vm0, %v7552_v55  ;;  %v2462_v54 = vsel %vm2439_vm0, %v7552_v55, 0  ;;  %v2071_v60 = vpop.f32.mrf.mxu1 }
 0x1a1   : > { %6024 = vmatpush3.bf16.xpose.msra.mxu0 %v2462_v54 }
 0x1a2   : > { %6256 = vmatprep.subr.msk.bf16.mxu0 %vm2439_vm0, %v7554_v50  ;;  %v2073_v4 = vpop.f32.mrf.mxu1 }
 0x1a4   : > { %v7568_v10 = vpop.f32.mrf.mxu1 }
 0x1a5   : > { %8773 = vst [vmem:[#allocation16_spill] sm:$0xff] %v7568_v10 }
 0x1a6   : > { %v2079_v63 = vpop.f32.mrf.mxu1 }
 0x1a8   : > { %v2081_v2 = vpop.f32.mrf.mxu1 }
 0x1a9   : > { %6026 = vmatpush3.bf16.xpose.msra.mxu0 %v2459_v3 }
 0x1aa   : > { %6257 = vmatprep.subr.msk.bf16.mxu0 %vm2439_vm0, %v7562_v62  ;;  %v2083_v13 = vpop.f32.mrf.mxu1 }
 0x1ac   : > { %v2085_v58 = vpop.f32.mrf.mxu1 }
 0x1ae   : > { %v2089_v53 = vpop.f32.mrf.mxu1 }
 0x1b0   : > { %v2091_v21 = vpop.f32.mrf.mxu1 }
 0x1b1   : > { %6028 = vmatpush3.bf16.xpose.msra.mxu0 %v2456_v7 }
 0x1b2   : > { %6258 = vmatprep.subr.msk.bf16.mxu0 %vm2439_vm0, %v7570_v14  ;;  %v2093_v31 = vpop.f32.mrf.mxu1 }
 0x1b4   : > { %v2095_v41 = vpop.f32.mrf.mxu1 }
 0x1b6   : > { %v2099_v57 = vpop.f32.mrf.mxu1 }
 0x1b8   : > { %v2101_v11 = vpop.f32.mrf.mxu1 }
 0x1b9   : > { %6030 = vmatpush3.bf16.xpose.msra.mxu0 %v2453_v51 }
 0x1bd   : > { %v1996_v59 = vpop.f32.mrf.mxu0 }
 0x1be   : > { %v2070_v15 = vadd.f32 %v2069_v56, %v1996_v59 }
 0x1bf   : > { %v1998_v52 = vpop.f32.mrf.mxu0 }
 0x1c0   : > { %6032 = vmatmul.mubr.msk.bf16.vlgmr.msra.gmra.mxu0 %vm2439_vm0, %v7528_v27  ;;  %v7582_v17 = vadd.f32 %v2071_v60, %v1998_v52 }
 0x1c1   : > { %6035 = vmatprep.mubr.msk.bf16.mxu0 %vm2439_vm0, %v7534_v38  ;;  %v2000_v19 = vpop.f32.mrf.mxu0 }
 0x1c2   : > { %8774 = vst [vmem:[#allocation17_spill] sm:$0xff] %v7582_v17  ;;  %v2074_v20 = vadd.f32 %v2073_v4, %v2000_v19 }
 0x1c3   : > { %v7584_v24 = vpop.f32.mrf.mxu0 }
 0x1c4   : > { %8775 = vst [vmem:[#allocation18_spill] sm:$0xff] %v7584_v24  ;;  %v7586_v25 = vpack.c.bf16 %v2074_v20, %v2070_v15 }
 0x1c5   : > { %v2006_v34 = vpop.f32.mrf.mxu0 }
 0x1c6   : > { %v2080_v28 = vadd.f32 %v2079_v63, %v2006_v34 }
 0x1c7   : > { %v2008_v30 = vpop.f32.mrf.mxu0 }
 0x1c8   : > { %6036 = vmatmul.mubr.msk.bf16.gmra.mxu0 %vm2439_vm0, %v7542_v48  ;;  %v2082_v32 = vadd.f32 %v2081_v2, %v2008_v30 }
 0x1c9   : > { %v2010_v33 = vpop.f32.mrf.mxu0 }
 0x1ca   : > { %v2084_v36 = vadd.f32 %v2083_v13, %v2010_v33 }
 0x1cb   : > { %v2012_v39 = vpop.f32.mrf.mxu0 }
 0x1cc   : > { %v7590_v42 = vpack.c.bf16 %v2084_v36, %v2080_v28  ;;  %v2086_v43 = vadd.f32 %v2085_v58, %v2012_v39  ;;  %v2103_v58 = vpop.f32.mrf.mxu1 }
 0x1cd   : > { %v2016_v45 = vpop.f32.mrf.mxu0 }
 0x1ce   : > { %v7592_v49 = vpack.c.bf16 %v2086_v43, %v2082_v32  ;;  %v2090_v54 = vadd.f32 %v2089_v53, %v2016_v45  ;;  %v2105_v19 = vpop.f32.mrf.mxu1 }
 0x1cf   : > { %v2018_v56 = vpop.f32.mrf.mxu0 }
 0x1d0   : > { %v2092_v60 = vadd.f32 %v2091_v21, %v2018_v56 }
 0x1d1   : > { %v2020_v61 = vpop.f32.mrf.mxu0 }
 0x1d2   : > { %v2094_v3 = vadd.f32 %v2093_v31, %v2020_v61 }
 0x1d3   : > { %v2022_v4 = vpop.f32.mrf.mxu0 }
 0x1d4   : > { %v7594_v6 = vpack.c.bf16 %v2094_v3, %v2090_v54  ;;  %v2096_v7 = vadd.f32 %v2095_v41, %v2022_v4 }
 0x1d5   : > { %v2026_v63 = vpop.f32.mrf.mxu0 }
 0x1d6   : > { %v7596_v2 = vpack.c.bf16 %v2096_v7, %v2092_v60  ;;  %v2100_v51 = vadd.f32 %v2099_v57, %v2026_v63 }
 0x1d7   : > { %v2028_v13 = vpop.f32.mrf.mxu0 }
 0x1d8   : > { %v2102_v59 = vadd.f32 %v2101_v11, %v2028_v13 }
 0x1d9   : > { %v2030_v15 = vpop.f32.mrf.mxu0 }
 0x1da   : > { %v2104_v52 = vadd.f32 %v2103_v58, %v2030_v15 }
 0x1db   : > { %v2032_v53 = vpop.f32.mrf.mxu0 }
 0x1dc   : > { %v7598_v20 = vpack.c.bf16 %v2104_v52, %v2100_v51  ;;  %v2106_v21 = vadd.f32 %v2105_v19, %v2032_v53 }
 0x1dd   : > { %v2215_v34 = vpop.f32.mrf.mxu0 }
 0x1de   : > { %v7600_v28 = vpack.c.bf16 %v2106_v21, %v2102_v59 }
 0x1df   : > { %v2142_v30 = vpop.f32.mrf.mxu1  ;;  %v2217_v31 = vpop.f32.mrf.mxu0 }
 0x1e1   : > { %v2144_v32 = vpop.f32.mrf.mxu1  ;;  %v2219_v33 = vpop.f32.mrf.mxu0 }
 0x1e2   : > { %v2218_v36 = vadd.f32 %v2217_v31, %v2144_v32 }
 0x1e3   : > { %v2146_v39 = vpop.f32.mrf.mxu1  ;;  %v2221_v41 = vpop.f32.mrf.mxu0 }
 0x1e5   : > { %v2148_v43 = vpop.f32.mrf.mxu1  ;;  %v2225_v45 = vpop.f32.mrf.mxu0 }
 0x1e6   : > { %v2222_v54 = vadd.f32 %v2221_v41, %v2148_v43 }
 0x1e7   : > { %v2152_v56 = vpop.f32.mrf.mxu1  ;;  %v2227_v57 = vpop.f32.mrf.mxu0 }
 0x1e8   : > { %v7602_v60 = vpack.c.bf16 %v2222_v54, %v2218_v36  ;;  %v2226_v17 = vadd.f32 %v2225_v45, %v2152_v56  ;;  %v2216_v45 = vadd.f32 %v2215_v34, %v2142_v30  ;;  %v2220_v56 = vadd.f32 %v2219_v33, %v2146_v39 }
 0x1e9   : > { %v2154_v61 = vpop.f32.mrf.mxu1  ;;  %v2229_v3 = vpop.f32.mrf.mxu0 }
 0x1ea   : > { %v2228_v4 = vadd.f32 %v2227_v57, %v2154_v61 }
 0x1eb   : > { %v2156_v11 = vpop.f32.mrf.mxu1  ;;  %v2231_v7 = vpop.f32.mrf.mxu0 }
 0x1ec   : > { %v2230_v10 = vadd.f32 %v2229_v3, %v2156_v11 }
 0x1ed   : > { %v2158_v63 = vpop.f32.mrf.mxu1  ;;  %v2235_v51 = vpop.f32.mrf.mxu0 }
 0x1ee   : > { %v2232_v13 = vadd.f32 %v2231_v7, %v2158_v63 }
 0x1ef   : > { %v2162_v58 = vpop.f32.mrf.mxu1  ;;  %v2237_v59 = vpop.f32.mrf.mxu0 }
 0x1f0   : > { %v7604_v15 = vpack.c.bf16 %v2232_v13, %v2228_v4  ;;  %v2236_v44 = vadd.f32 %v2235_v51, %v2162_v58 }
 0x1f1   : > { %v2164_v52 = vpop.f32.mrf.mxu1  ;;  %v2239_v53 = vpop.f32.mrf.mxu0 }
 0x1f2   : > { %v2238_v19 = vadd.f32 %v2237_v59, %v2164_v52 }
 0x1f3   : > { %v2166_v21 = vpop.f32.mrf.mxu1  ;;  %v2241_v31 = vpop.f32.mrf.mxu0 }
 0x1f4   : > { %v2240_v7 = vadd.f32 %v2239_v53, %v2166_v21  ;;  %v7616_v21 = vpack.c.bf16 %v2230_v10, %v2226_v17 }
 0x1f5   : > { %v2168_v32 = vpop.f32.mrf.mxu1  ;;  %v2245_v36 = vpop.f32.mrf.mxu0 }
 0x1f6   : > { %v2242_v41 = vadd.f32 %v2241_v31, %v2168_v32  ;;  %v7608_v24 = vpack.c.bf16 %v2240_v7, %v2236_v44 }
 0x1f7   : > { %v2172_v43 = vpop.f32.mrf.mxu1  ;;  %v2247_v54 = vpop.f32.mrf.mxu0 }
 0x1f8   : > { %v7606_v57 = vpack.c.bf16 %v2242_v41, %v2238_v19  ;;  %v2246_v63 = vadd.f32 %v2245_v36, %v2172_v43  ;;  %v7620_v43 = vpack.c.bf16 %v2220_v56, %v2216_v45 }
 0x1f9   : > { %v2174_v61 = vpop.f32.mrf.mxu1  ;;  %v2249_v0 = vpop.f32.mrf.mxu0 }
 0x1fa   : > { %v2248_v23 = vadd.f32 %v2247_v54, %v2174_v61 }
 0x1fb   : > { %v2176_v4 = vpop.f32.mrf.mxu1  ;;  %v2251_v13 = vpop.f32.mrf.mxu0 }
 0x1fc   : > { %v2250_v9 = vadd.f32 %v2249_v0, %v2176_v4 }
 0x1fd   : > { %v2178_v59 = vpop.f32.mrf.mxu1  ;;  %v5815_v52 = vpop.f32.mrf.mxu0 }
 0x1fe   : > { %v7610_v31 = vpack.c.bf16 %v2250_v9, %v2246_v63  ;;  %v2252_v32 = vadd.f32 %v2251_v13, %v2178_v59 }
 0x1ff   : > { %v5816_v19 = vpop.f32.mrf.mxu0  ;;  %v6017_v41 = vpop.f32.mrf.mxu1 }
 0x200   : > { %6039 = vmatprep.subr.bf16.mxu1 %v7610_v31  ;;  %v7613_v51 = vpack.c.bf16 %v2252_v32, %v2248_v23  ;;  %v5817_v58 = vadd.f32 %v5816_v19, %v5815_v52 }
 0x201   : > { %6040 = vmatpush3.bf16.msra.mxu1 %v7610_v31  ;;  %v5818_v53 = vpop.f32.mrf.mxu0  ;;  %v2353_v0 = vpop.f32.mrf.mxu1 }
 0x202   : > { %6041 = vmatprep.subr.bf16.mxu1 %v7608_v24  ;;  %v2354_v9 = vadd.f32 %v5817_v58, %v2353_v0 }
 0x203   : > { %v5819_v44 = vpop.f32.mrf.mxu0  ;;  %v6018_v3 = vpop.f32.mrf.mxu1 }
 0x204   : > { %v5820_v11 = vadd.f32 %v5819_v44, %v5818_v53 }
 0x205   : > { %6042 = vmatpush3.bf16.msra.mxu1 %v7608_v24  ;;  %v5821_v36 = vpop.f32.mrf.mxu0  ;;  %v2356_v23 = vpop.f32.mrf.mxu1 }
 0x206   : > { %6043 = vmatprep.subr.bf16.mxu1 %v7616_v21  ;;  %v2357_v54 = vadd.f32 %v5820_v11, %v2356_v23 }
 0x207   : > { %v5822_v61 = vpop.f32.mrf.mxu0  ;;  %v6021_v34 = vpop.f32.mrf.mxu1 }
 0x208   : > { %v7623_v30 = vpack.c.bf16 %v2357_v54, %v2354_v9  ;;  %v5823_v10 = vadd.f32 %v5822_v61, %v5821_v36 }
 0x209   : > { %6044 = vmatpush3.bf16.msra.mxu1 %v7616_v21  ;;  %v5824_v17 = vpop.f32.mrf.mxu0  ;;  %v2369_v7 = vpop.f32.mrf.mxu1 }
 0x20a   : > { %6045 = vmatprep.subr.bf16.mxu1 %v7620_v43  ;;  %v2362_v33 = vadd.f32 %v6017_v41, %v5823_v10 }
 0x20b   : > { %v5825_v39 = vpop.f32.mrf.mxu0  ;;  %v6022_v52 = vpop.f32.mrf.mxu1 }
 0x20c   : > { %v5826_v63 = vadd.f32 %v5825_v39, %v5824_v17 }
 0x20d   : > { %6046 = vmatpush3.bf16.msra.mxu1 %v7620_v43  ;;  %v5827_v4 = vpop.f32.mrf.mxu0  ;;  %v2372_v45 = vpop.f32.mrf.mxu1 }
 0x20e   : > { %v2365_v13 = vadd.f32 %v6018_v3, %v5826_v63 }
 0x20f   : > { %v5828_v59 = vpop.f32.mrf.mxu0 }
 0x210   : > { %v5829_v32 = vadd.f32 %v5828_v59, %v5827_v4  ;;  %v7628_v19 = vpack.c.bf16 %v2365_v13, %v2362_v33  ;;  %v2420_v33 = vlaneseq }
 0x211   : > { %v5830_v58 = vpop.f32.mrf.mxu0 }
 0x212   : > { %v2370_v53 = vadd.f32 %v5829_v32, %v2369_v7  ;;  %v7634_v39 = vshrl.u32 %v2420_v33, 7  ;;  %v2430_v63 = vand.u32 127, %v2420_v33 }
 0x213   : > { %v5831_v0 = vpop.f32.mrf.mxu0 }
 0x214   : > { %v5832_v56 = vadd.f32 %v5831_v0, %v5830_v58  ;;  %8776 = vst [vmem:[#allocation19_spill] sm:$0xff] %v7634_v39  ;;  %v2423_v7 = vadd.s32 16, %v7634_v39  ;;  %v2424_v13 = vadd.s32 24, %v7634_v39  ;;  %vm7643_vm2 = vcmp.le.s32.totalorder %v2430_v63, %v7634_v39 }
 0x215   : > { %v5833_v9 = vpop.f32.mrf.mxu0 }
 0x216   : > { %v2373_v44 = vadd.f32 %v5832_v56, %v2372_v45  ;;  %vm7637_vm1 = vcmp.le.s32.totalorder %v2430_v63, %v2423_v7  ;;  %vm7651_vm3 = vcmp.le.s32.totalorder %v2430_v63, %v2424_v13  ;;  %v2427_v45 = vadd.s32 48, %v7634_v39 }
 0x217   : > { %v5834_v41 = vpop.f32.mrf.mxu0 }
 0x218   : > { %v7630_v11 = vpack.c.bf16 %v2373_v44, %v2370_v53  ;;  %v5835_v36 = vadd.f32 %v5834_v41, %v5833_v9  ;;  %vm7666_vm5 = vcmp.le.s32.totalorder %v2430_v63, %v2427_v45 }
 0x219   : > { %v5836_v23 = vpop.f32.mrf.mxu0 }
 0x21a   : > { %v2378_v54 = vadd.f32 %v6021_v34, %v5835_v36 }
 0x21b   : > { %v5837_v61 = vpop.f32.mrf.mxu0 }
 0x21c   : > { %v5838_v3 = vadd.f32 %v5837_v61, %v5836_v23 }
 0x21e   : > { %v2381_v10 = vadd.f32 %v6022_v52, %v5838_v3  ;;  %v2422_v52 = vadd.s32 8, %v7634_v39  ;;  %v2425_v3 = vadd.s32 32, %v7634_v39 }
 0x220   : > { %v7632_v17 = vpack.c.bf16 %v2381_v10, %v2378_v54  ;;  %vm7659_vm4 = vcmp.le.s32.totalorder %v2430_v63, %v2422_v52  ;;  %vm7678_vm6 = vcmp.le.s32.totalorder %v2430_v63, %v2425_v3 }
 0x280   : > { %v6033_v59 = vpop.f32.mrf.mxu0 }
 0x281   : > { %v2531_v32 = vsel %vm7637_vm1, %v6033_v59, -inf }
 0x282   : > { %v2498_v58 = vpop.f32.mrf.mxu0  ;;  %v2543_v53 = vsel %vm2439_vm0, %v2531_v32, -inf }
 0x283   : > { %v2529_v56 = vsel %vm7643_vm2, %v2498_v58, -inf  ;;  %2544 = vmax.xlane.f32.xlu1 %v2543_v53 }
 0x284   : > { %v6034_v9 = vpop.f32.mrf.mxu0  ;;  %v2537_v44 = vsel %vm2439_vm0, %v2529_v56, -inf }
 0x285   : > { %v2532_v36 = vsel %vm7651_vm3, %v6034_v9, -inf  ;;  %2538 = vmax.xlane.f32.xlu0 %v2537_v44  ;;  %v2428_v9 = vadd.s32 56, %v7634_v39 }
 0x286   : > { %v2501_v23 = vpop.f32.mrf.mxu0  ;;  %v2546_v54 = vsel %vm2439_vm0, %v2532_v36, -inf }
 0x287   : > { %v2530_v10 = vsel %vm7659_vm4, %v2501_v23, -inf  ;;  %2547 = vmax.xlane.f32.xlu1 %v2546_v54  ;;  %vm7703_vm7 = vcmp.le.s32.totalorder %v2430_v63, %v2428_v9 }
 0x288   : > { %v6037_v33 = vpop.f32.mrf.mxu0  ;;  %v2540_v7 = vsel %vm2439_vm0, %v2530_v10, -inf }
 0x289   : > { %v7676_v13 = vsel %vm7666_vm5, %v6037_v33, -inf  ;;  %2541 = vmax.xlane.f32.xlu0 %v2540_v7 }
 0x28a   : > { %v2514_v52 = vpop.f32.mrf.mxu0  ;;  %v2555_v58 = vsel %vm2439_vm0, %v7676_v13, -inf }
 0x28b   : > { %v7686_v53 = vsel %vm7678_vm6, %v2514_v52, -inf }
 0x28c   : > { %v2549_v45 = vsel %vm2439_vm0, %v7686_v53, -inf }
 0x28d   : > { %2556 = vmax.xlane.f32.xlu0 %v2555_v58 }
 0x291   : > { %2550 = vmax.xlane.f32.xlu0 %v2549_v45 }
 0x298   : > { %2726 = vrot.lane.b32.xlu1 %v7554_v50, %s7221_s21  ;;  %v6038_v50 = vpop.f32.mrf.mxu0 }
 0x29c   : > { %2724 = vrot.lane.b32.xlu1 %v7562_v62, %s7221_s21  ;;  %v2426_v62 = vadd.s32 40, %v7634_v39 }
 0x29e   : > { %vm7710_vm8 = vcmp.le.s32.totalorder %v2430_v63, %v2426_v62 }
 0x2a7   : > { %2728 = vrot.lane.b32.xlu0 %v7552_v55, %s7221_s21  ;;  %v2536_v55 = vsel %vm7703_vm7, %v6038_v50, -inf }
 0x2a8   : > { %v2558_v23 = vsel %vm2439_vm0, %v2536_v55, -inf }
 0x2ab   : > { %2710 = vrot.lane.b32.xlu0 %v7518_v18, %s7221_s21 }
 0x2af   : > { %2714 = vrot.lane.b32.xlu0 %v7534_v38, %s7221_s21  ;;  %v2517_v38 = vpop.f32.mrf.mxu0 }
 0x2b3   : > { %2913 = vrot.lane.b32.xlu0 %v7610_v31, %s7221_s21  ;;  %v2534_v31 = vsel %vm7710_vm8, %v2517_v38, -inf }
 0x2b4   : > { %v2552_v54 = vsel %vm2439_vm0, %v2534_v31, -inf }
 0x2c0   : > { %2559 = vmax.xlane.f32.xlu1 %v2558_v23 }
 0x2c4   : > { %2553 = vmax.xlane.f32.xlu1 %v2552_v54 }
 0x2d5   : > { %2722 = vrot.lane.b32.xlu1 %v7570_v14, %s7221_s21 }
 0x2d9   : > { %2712 = vrot.lane.b32.xlu1 %v7528_v27, %s7221_s21 }
 0x2dd   : > { %2716 = vrot.lane.b32.xlu1 %v7542_v48, %s7221_s21 }
 0x2e1   : > { %2911 = vrot.lane.b32.xlu1 %v7608_v24, %s7221_s21 }
 0x30c   : > { %v2545_v63 = vpop.xlane.xlu1 %2544 }
 0x30d   : > { %v2563_v7 = vsub.f32 %v2531_v32, %v2545_v63 }
 0x30e   : > { %v2539_v3 = vpop.xlane.xlu0 %2538 }
 0x30f   : > { %v2561_v33 = vsub.f32 %v2529_v56, %v2539_v3  ;;  %v2573_v14 = vmul.f32 1.442695, %v2563_v7 }
 0x310   : > { %v2548_v52 = vpop.xlane.xlu1 %2547 }
 0x311   : > { %v2569_v58 = vmul.f32 1.442695, %v2561_v33  ;;  %v2564_v45 = vsub.f32 %v2532_v36, %v2548_v52 }
 0x312   : > { %v2542_v9 = vpop.xlane.xlu0 %2541 }
 0x313   : > { %v2575_v50 = vmul.f32 1.442695, %v2564_v45  ;;  %v2562_v62 = vsub.f32 %v2530_v10, %v2542_v9  ;;  %6859 = vpow2.f32 %v2569_v58 }
 0x314   : > { %v2727_v7 = vpop.permute.xlu1 %2726 }
 0x315   : > { %v2571_v38 = vmul.f32 1.442695, %v2562_v62  ;;  %6861 = vpow2.f32 %v2575_v50  ;;  %v2749_v58 = vsel %vm2439_vm0, %v2727_v7, 0 }
 0x316   : > { %v2557_v27 = vpop.xlane.xlu0 %2556 }
 0x317   : > { %6863 = vpow2.f32 %v2571_v38  ;;  %v2567_v38 = vsub.f32 %v7676_v13, %v2557_v27 }
 0x318   : > { %6865 = vpow2.f32 %v2573_v14  ;;  %v2725_v45 = vpop.permute.xlu1 %2724 }
 0x319   : > { %v2746_v9 = vsel %vm2439_vm0, %v2725_v45, 0 }
 0x31a   : > { %v2551_v48 = vpop.xlane.xlu0 %2550 }
 0x31b   : > { %v2565_v50 = vsub.f32 %v7686_v53, %v2551_v48 }
 0x31e   : > { %v2729_v23 = vpop.permute.xlu0 %2728 }
 0x31f   : > { %6259 = vmatprep.subr.msk.bf16.mxu1 %vm2439_vm0, %v2729_v23  ;;  %v2752_v33 = vsel %vm2439_vm0, %v2729_v23, 0  ;;  %v2577_v23 = vmul.f32 1.442695, %v2565_v50 }
 0x320   : > { %v7727_v24 = vpop.eup %6859 }
 0x321   : > { %6867 = vpow2.f32 %v2577_v23 }
 0x322   : > { %v2711_v32 = vpop.permute.xlu0 %2710  ;;  %v7729_v56 = vpop.eup %6861 }
 0x323   : > { %8793 = vst [vmem:[#allocation20_spill] sm:$0xff] %v7729_v56 }
 0x324   : > { %v7731_v36 = vpop.eup %6863 }
 0x325   : > { %v7733_v54 = vpop.eup %6865  ;;  %v2609_v10 = vpack.c.bf16 %v7731_v36, %v7727_v24 }
 0x326   : > { %v2610_v63 = vpack.c.bf16 %v7729_v56, %v7733_v54  ;;  %v2715_v3 = vpop.permute.xlu0 %2714 }
 0x327   : > { %6047 = vmatprep.mubr.msk.bf16.mxu1 %vm2439_vm0, %v2609_v10 }
 0x328   : > { %6048 = vmatmul.mubr.msk.bf16.vlgmr.msra.gmra.mxu1 %vm2439_vm0, %v2610_v63 }
 0x329   : > { %6056 = vmatpush3.bf16.xpose.msra.mxu1 %v2752_v33 }
 0x32a   : > { %6260 = vmatprep.subr.msk.bf16.mxu1 %vm2439_vm0, %v2727_v7  ;;  %v2914_v52 = vpop.permute.xlu0 %2913 }
 0x32b   : > { %6071 = vmatprep.subr.bf16.mxu0 %v2914_v52 }
 0x32c   : > { %6072 = vmatpush3.bf16.msra.mxu0 %v2914_v52  ;;  %v2581_v52 = vmul.f32 1.442695, %v2567_v38 }
 0x331   : > { %6058 = vmatpush3.bf16.xpose.msra.mxu1 %v2749_v58 }
 0x332   : > { %6261 = vmatprep.subr.msk.bf16.mxu1 %vm2439_vm0, %v2725_v45 }
 0x339   : > { %6060 = vmatpush3.bf16.xpose.msra.mxu1 %v2746_v9 }
 0x349   : > { %v2560_v62 = vpop.xlane.xlu1 %2559 }
 0x34a   : > { %v2568_v14 = vsub.f32 %v2536_v55, %v2560_v62  ;;  %v7751_v55 = vpop.eup %6867 }
 0x34b   : > { %8794 = vst [vmem:[#allocation21_spill] sm:$0xff] %v7751_v55 }
 0x34c   : > { %v2583_v10 = vmul.f32 1.442695, %v2568_v14 }
 0x34d   : > { %v2554_v63 = vpop.xlane.xlu1 %2553 }
 0x34e   : > { %v2566_v33 = vsub.f32 %v2534_v31, %v2554_v63  ;;  %6869 = vpow2.f32 %v2583_v10 }
 0x350   : > { %v2579_v7 = vmul.f32 1.442695, %v2566_v33 }
 0x351   : > { %v2723_v58 = vpop.permute.xlu1 %2722 }
 0x352   : > { %6871 = vpow2.f32 %v2579_v7  ;;  %6262 = vmatprep.subr.msk.bf16.mxu1 %vm2439_vm0, %v2723_v58  ;;  %v2743_v45 = vsel %vm2439_vm0, %v2723_v58, 0 }
 0x353   : > { %6873 = vpow2.f32 %v2581_v52  ;;  %6062 = vmatpush3.bf16.xpose.msra.mxu1 %v2743_v45 }
 0x354   : > { %6103 = vmatprep.subr.bf16.mxu1 %v7613_v51 }
 0x355   : > { %v2713_v53 = vpop.permute.xlu1 %2712 }
 0x359   : > { %v2717_v13 = vpop.permute.xlu1 %2716 }
 0x35b   : > { %v7753_v31 = vpop.eup %6869 }
 0x35c   : > { %8795 = vst [vmem:[#allocation22_spill] sm:$0xff] %v7753_v31 }
 0x35d   : > { %v2912_v27 = vpop.permute.xlu1 %2911 }
 0x35e   : > { %6073 = vmatprep.subr.bf16.mxu0 %v2912_v27 }
 0x35f   : > { %v7755_v48 = vpop.eup %6871  ;;  %6074 = vmatpush3.bf16.msra.mxu0 %v2912_v27 }
 0x360   : > { %8796 = vst [vmem:[#allocation23_spill] sm:$0xff] %v7755_v48  ;;  %v7757_v9 = vpop.eup %6873  ;;  %v2611_v50 = vpack.c.bf16 %v7755_v48, %v7751_v55 }
 0x361   : > { %8797 = vst [vmem:[#allocation24_spill] sm:$0xff] %v7757_v9  ;;  %v2612_v62 = vpack.c.bf16 %v7753_v31, %v7757_v9 }
 0x362   : > { %6051 = vmatprep.mubr.msk.bf16.mxu1 %vm2439_vm0, %v2611_v50 }
 0x363   : > { %6052 = vmatmul.mubr.msk.bf16.gmra.mxu1 %vm2439_vm0, %v2612_v62 }
 0x364   : > { %6063 = vmatprep.mubr.msk.bf16.mxu1 %vm2439_vm0, %v2711_v32 }
 0x36b   : > { %6064 = vmatmul.mubr.msk.bf16.vlgmr.msra.gmra.mxu1 %vm2439_vm0, %v2713_v53 }
 0x36c   : > { %6104 = vmatpush3.bf16.msra.mxu1 %v7613_v51  ;;  %6067 = vmatprep.mubr.msk.bf16.mxu1 %vm2439_vm0, %v2715_v3 }
 0x36d   : > { %6105 = vmatprep.subr.bf16.mxu1 %v7606_v57 }
 0x370   : > { %6106 = vmatpush3.bf16.msra.mxu1 %v7606_v57 }
 0x371   : > { %6107 = vmatprep.subr.bf16.mxu1 %v7604_v15 }
 0x373   : > { %6068 = vmatmul.mubr.msk.bf16.gmra.mxu1 %vm2439_vm0, %v2717_v13 }
 0x374   : > { %6108 = vmatpush3.bf16.msra.mxu1 %v7604_v15 }
 0x375   : > { %6109 = vmatprep.subr.bf16.mxu1 %v7602_v60 }
 0x378   : > { %6110 = vmatpush3.bf16.msra.mxu1 %v7602_v60 }
 0x3e8   : > { %v7776_v32 = vpop.f32.mrf.mxu1 }
 0x3e9   : > { %8798 = vst [vmem:[#allocation25_spill] sm:$0xff] %v7776_v32 }
 0x3ea   : > { %v7778_v14 = vpop.f32.mrf.mxu1 }
 0x3eb   : > { %8799 = vst [vmem:[#allocation26_spill] sm:$0xff] %v7778_v14 }
 0x3ec   : > { %v7780_v38 = vpop.f32.mrf.mxu1 }
 0x3ed   : > { %8800 = vst [vmem:[#allocation27_spill] sm:$0xff] %v7780_v38 }
 0x3ee   : > { %v7782_v3 = vpop.f32.mrf.mxu1 }
 0x3ef   : > { %8801 = vst [vmem:[#allocation28_spill] sm:$0xff] %v7782_v3 }
 0x423   : > { %v7784_v23 = vpop.f32.mrf.mxu1 }
 0x424   : > { %8802 = vst [vmem:[#allocation29_spill] sm:$0xff] %v7784_v23 }
 0x425   : > { %v7786_v10 = vpop.f32.mrf.mxu1 }
 0x426   : > { %8803 = vst [vmem:[#allocation30_spill] sm:$0xff] %v7786_v10 }
 0x427   : > { %v7788_v63 = vpop.f32.mrf.mxu1 }
 0x428   : > { %8804 = vst [vmem:[#allocation31_spill] sm:$0xff] %v7788_v63 }
 0x429   : > { %v7790_v33 = vpop.f32.mrf.mxu1 }
 0x42a   : > { %8805 = vst [vmem:[#allocation32_spill] sm:$0xff] %v7790_v33 }
 0x42b   : > { %v6065_v52 = vpop.f32.mrf.mxu1 }
 0x42c   : > { %v2821_v7 = vsel %vm7637_vm1, %v6065_v52, -inf }
 0x42d   : > { %v2788_v58 = vpop.f32.mrf.mxu1  ;;  %v2833_v45 = vsel %vm2439_vm0, %v2821_v7, -inf }
 0x42e   : > { %v2819_v53 = vsel %vm7643_vm2, %v2788_v58, -inf  ;;  %2834 = vmax.xlane.f32.xlu0 %v2833_v45 }
 0x42f   : > { %v6066_v13 = vpop.f32.mrf.mxu1  ;;  %v2827_v50 = vsel %vm2439_vm0, %v2819_v53, -inf }
 0x430   : > { %v2822_v62 = vsel %vm7651_vm3, %v6066_v13, -inf }
 0x431   : > { %v2791_v27 = vpop.f32.mrf.mxu1  ;;  %v2836_v33 = vsel %vm2439_vm0, %v2822_v62, -inf }
 0x432   : > { %v2820_v39 = vsel %vm7659_vm4, %v2791_v27, -inf  ;;  %2828 = vmax.xlane.f32.xlu0 %v2827_v50 }
 0x433   : > { %v6069_v63 = vpop.f32.mrf.mxu1  ;;  %v2830_v52 = vsel %vm2439_vm0, %v2820_v39, -inf }
 0x434   : > { %2831 = vmax.xlane.f32.xlu1 %v2830_v52  ;;  %v2825_v58 = vsel %vm7666_vm5, %v6069_v63, -inf }
 0x435   : > { %v2804_v23 = vpop.f32.mrf.mxu1  ;;  %v2845_v52 = vsel %vm2439_vm0, %v2825_v58, -inf }
 0x436   : > { %v2823_v45 = vsel %vm7678_vm6, %v2804_v23, -inf  ;;  %2837 = vmax.xlane.f32.xlu0 %v2836_v33 }
 0x437   : > { %v6070_v10 = vpop.f32.mrf.mxu1  ;;  %v2839_v13 = vsel %vm2439_vm0, %v2823_v45, -inf }
 0x438   : > { %v2826_v27 = vsel %vm7703_vm7, %v6070_v10, -inf  ;;  %2840 = vmax.xlane.f32.xlu1 %v2839_v13 }
 0x439   : > { %v2807_v50 = vpop.f32.mrf.mxu1  ;;  %v2848_v63 = vsel %vm2439_vm0, %v2826_v27, -inf }
 0x43a   : > { %v2824_v38 = vsel %vm7710_vm8, %v2807_v50, -inf  ;;  %2846 = vmax.xlane.f32.xlu0 %v2845_v52 }
 0x43b   : > { %v2842_v23 = vsel %vm2439_vm0, %v2824_v38, -inf }
 0x43c   : > { %2849 = vmax.xlane.f32.xlu1 %v2848_v63 }
 0x43e   : > { %2843 = vmax.xlane.f32.xlu0 %v2842_v23 }
 0x44d   : > { %2907 = vrot.lane.b32.xlu1 %v7620_v43, %s7221_s21 }
 0x454   : > { %2909 = vrot.lane.b32.xlu0 %v7616_v21, %s7221_s21 }
 0x4b7   : > { %v2835_v10 = vpop.xlane.xlu0 %2834 }
 0x4b8   : > { %v2853_v33 = vsub.f32 %v2821_v7, %v2835_v10 }
 0x4ba   : > { %v2863_v52 = vmul.f32 1.442695, %v2853_v33  ;;  %v1784_v33 = vadd.f32 %v7510_v5, %v7516_v16  ;;  %v3108_v5 = vsel %vm2439_vm0, %v7590_v42, 0  ;;  %v1794_v16 = vadd.f32 %v7512_v8, %v7524_v26 }
 0x4bb   : > { %v2829_v13 = vpop.xlane.xlu0 %2828 }
 0x4bc   : > { %v2851_v32 = vsub.f32 %v2819_v53, %v2829_v13 }
 0x4bd   : > { %v2832_v3 = vpop.xlane.xlu1 %2831 }
 0x4be   : > { %v2859_v14 = vmul.f32 1.442695, %v2851_v32  ;;  %v2852_v50 = vsub.f32 %v2820_v39, %v2832_v3 }
 0x4bf   : > { %v2838_v31 = vpop.xlane.xlu0 %2837 }
 0x4c0   : > { %v2861_v9 = vmul.f32 1.442695, %v2852_v50  ;;  %v2854_v63 = vsub.f32 %v2822_v62, %v2838_v31  ;;  %6875 = vpow2.f32 %v2859_v14 }
 0x4c1   : > { %v2841_v48 = vpop.xlane.xlu1 %2840 }
 0x4c2   : > { %6877 = vpow2.f32 %v2861_v9  ;;  %v2865_v23 = vmul.f32 1.442695, %v2854_v63  ;;  %v2855_v55 = vsub.f32 %v2823_v45, %v2841_v48 }
 0x4c3   : > { %6879 = vpow2.f32 %v2863_v52  ;;  %v2847_v43 = vpop.xlane.xlu0 %2846 }
 0x4c4   : > { %6881 = vpow2.f32 %v2865_v23  ;;  %v2857_v21 = vsub.f32 %v2825_v58, %v2847_v43  ;;  %v2867_v7 = vmul.f32 1.442695, %v2855_v55  ;;  %v3114_v58 = vsel %vm2439_vm0, %v7598_v20, 0 }
 0x4c5   : > { %v2850_v56 = vpop.xlane.xlu1 %2849  ;;  %v2385_v43 = vpack.c.bf16 %v1784_v33, %v7514_v12  ;;  %v3105_v12 = vsel %vm2439_vm0, %v7586_v25, 0 }
 0x4c6   : > { %v2858_v10 = vsub.f32 %v2826_v27, %v2850_v56  ;;  %v2871_v39 = vmul.f32 1.442695, %v2857_v21  ;;  %6883 = vpow2.f32 %v2867_v7  ;;  %v3111_v21 = vsel %vm2439_vm0, %v7594_v6, 0 }
 0x4c7   : > { %v2844_v53 = vpop.xlane.xlu0 %2843  ;;  %v1804_v7 = vadd.f32 %v7526_v29, %v7532_v37 }
 0x4c8   : > { %v2873_v13 = vmul.f32 1.442695, %v2858_v10  ;;  %v2856_v32 = vsub.f32 %v2824_v38, %v2844_v53  ;;  %v2394_v10 = vpack.c.bf16 %v1794_v16, %v7522_v22 }
 0x4c9   : > { %v2908_v9 = vpop.permute.xlu1 %2907  ;;  %v2403_v53 = vpack.c.bf16 %v1804_v7, %v7530_v40 }
 0x4ca   : > { %v2869_v3 = vmul.f32 1.442695, %v2856_v32  ;;  %6885 = vpow2.f32 %v2873_v13  ;;  %v1814_v13 = vadd.f32 %v7538_v46, %v7540_v47 }
 0x4cb   : > { %v2910_v31 = vpop.permute.xlu0 %2909 }
 0x4cc   : > { %6887 = vpow2.f32 %v2869_v3  ;;  %6075 = vmatprep.subr.bf16.mxu0 %v2910_v31  ;;  %v2412_v32 = vpack.c.bf16 %v1814_v13, %v7536_v35 }
 0x4cd   : > { %6889 = vpow2.f32 %v2871_v39  ;;  %6076 = vmatpush3.bf16.msra.mxu0 %v2910_v31  ;;  %v7820_v48 = vpop.eup %6875 }
 0x4ce   : > { %6077 = vmatprep.subr.bf16.mxu0 %v2908_v9 }
 0x4cf   : > { %v7822_v14 = vpop.eup %6877 }
 0x4d0   : > { %v7824_v55 = vpop.eup %6879  ;;  %v2899_v56 = vpack.c.bf16 %v7822_v14, %v7820_v48 }
 0x4d1   : > { %v7828_v38 = vpop.eup %6881  ;;  %6078 = vmatpush3.bf16.msra.mxu0 %v2908_v9  ;;  %v2881_v44 = vsel %vm2439_vm0, %v7824_v55, 0.0 }
 0x4d2   : > { %v2900_v62 = vpack.c.bf16 %v7828_v38, %v7824_v55  ;;  %6079 = vmatprep.mubr.msk.bf16.mxu0 %vm2439_vm0, %v2899_v56  ;;  %6263 = vmatprep.subr.msk.bf16.mxu0 %vm2439_vm0, %v7598_v20 }
 0x4d3   : > { %v7840_v45 = vpop.eup %6883 }
 0x4d4   : > { %6080 = vmatmul.mubr.msk.bf16.vlgmr.msra.gmra.mxu0 %vm2439_vm0, %v2900_v62 }
 0x4d5   : > { %6088 = vmatpush3.bf16.xpose.msra.mxu0 %v3114_v58 }
 0x4d6   : > { %6264 = vmatprep.subr.msk.bf16.mxu0 %vm2439_vm0, %v7594_v6 }
 0x4d7   : > { %v7842_v27 = vpop.eup %6885 }
 0x4d9   : > { %v7846_v50 = vpop.eup %6887 }
 0x4da   : > { %v7848_v52 = vpop.eup %6889  ;;  %v2901_v63 = vpack.c.bf16 %v7846_v50, %v7840_v45 }
 0x4db   : > { %v2902_v23 = vpack.c.bf16 %v7842_v27, %v7848_v52 }
 0x4dc   : > { %6083 = vmatprep.mubr.msk.bf16.mxu0 %vm2439_vm0, %v2901_v63 }
 0x4dd   : > { %6084 = vmatmul.mubr.msk.bf16.gmra.mxu0 %vm2439_vm0, %v2902_v23 }
 0x4de   : > { %6090 = vmatpush3.bf16.xpose.msra.mxu0 %v3111_v21  ;;  %6095 = vmatprep.mubr.msk.bf16.mxu0 %vm2439_vm0, %v2385_v43 }
 0x4df   : > { %6265 = vmatprep.subr.msk.bf16.mxu0 %vm2439_vm0, %v7590_v42 }
 0x4e6   : > { %6092 = vmatpush3.bf16.xpose.msra.mxu0 %v3108_v5 }
 0x4e7   : > { %6266 = vmatprep.subr.msk.bf16.mxu0 %vm2439_vm0, %v7586_v25 }
 0x4ee   : > { %6094 = vmatpush3.bf16.xpose.msra.mxu0 %v3105_v12 }
 0x4f5   : > { %6096 = vmatmul.mubr.msk.bf16.vlgmr.msra.gmra.mxu0 %vm2439_vm0, %v2394_v10 }
 0x4f6   : > { %6099 = vmatprep.mubr.msk.bf16.mxu0 %vm2439_vm0, %v2403_v53 }
 0x4fd   : > { %6100 = vmatmul.mubr.msk.bf16.gmra.mxu0 %vm2439_vm0, %v2412_v32 }
 0x594   : > { %v7880_v39 = vpop.f32.mrf.mxu0 }
 0x595   : > { %8806 = vst [vmem:[#allocation33_spill] sm:$0xff] %v7880_v39 }
 0x596   : > { %v7882_v8 = vpop.f32.mrf.mxu0 }
 0x598   : > { %v7884_v26 = vpop.f32.mrf.mxu0 }
 0x599   : > { %8807 = vst [vmem:[#allocation34_spill] sm:$0xff] %v7884_v26 }
 0x59a   : > { %v7886_v22 = vpop.f32.mrf.mxu0 }
 0x59d   : > { %v7888_v29 = vpop.f32.mrf.mxu0 }
 0x59e   : > { %8808 = vst [vmem:[#allocation35_spill] sm:$0xff] %v7888_v29 }
 0x59f   : > { %v7890_v40 = vpop.f32.mrf.mxu0 }
 0x5a0   : > { %8809 = vst [vmem:[#allocation36_spill] sm:$0xff] %v7890_v40 }
 0x5a1   : > { %v7892_v37 = vpop.f32.mrf.mxu0 }
 0x5a2   : > { %8810 = vst [vmem:[#allocation37_spill] sm:$0xff] %v7892_v37 }
 0x5a3   : > { %v7894_v3 = vpop.f32.mrf.mxu0 }
 0x5a4   : > { %8811 = vst [vmem:[#allocation38_spill] sm:$0xff] %v7894_v3 }
 0x5b5   : > { %v6097_v46 = vpop.f32.mrf.mxu0 }
 0x5b6   : > { %v3183_v35 = vsel %vm7637_vm1, %v6097_v46, -inf }
 0x5b7   : > { %v3150_v47 = vpop.f32.mrf.mxu0  ;;  %v3195_v31 = vsel %vm2439_vm0, %v3183_v35, -inf }
 0x5b8   : > { %v3181_v9 = vsel %vm7643_vm2, %v3150_v47, -inf  ;;  %3196 = vmax.xlane.f32.xlu0 %v3195_v31 }
 0x5b9   : > { %v6098_v56 = vpop.f32.mrf.mxu0  ;;  %v3189_v62 = vsel %vm2439_vm0, %v3181_v9, -inf }
 0x5ba   : > { %v3184_v58 = vsel %vm7651_vm3, %v6098_v56, -inf  ;;  %3190 = vmax.xlane.f32.xlu1 %v3189_v62 }
 0x5bb   : > { %v3153_v33 = vpop.f32.mrf.mxu0  ;;  %v3198_v21 = vsel %vm2439_vm0, %v3184_v58, -inf }
 0x5bc   : > { %v3182_v63 = vsel %vm7659_vm4, %v3153_v33, -inf }
 0x5bd   : > { %v6101_v23 = vpop.f32.mrf.mxu0  ;;  %v3192_v5 = vsel %vm2439_vm0, %v3182_v63, -inf }
 0x5be   : > { %v7910_v12 = vsel %vm7666_vm5, %v6101_v23, -inf  ;;  %3199 = vmax.xlane.f32.xlu1 %v3198_v21  ;;  %3193 = vmax.xlane.f32.xlu0 %v3192_v5 }
 0x5bf   : > { %v3166_v16 = vpop.f32.mrf.mxu0  ;;  %v3207_v7 = vsel %vm2439_vm0, %v7910_v12, -inf }
 0x5c0   : > { %v7916_v13 = vsel %vm7678_vm6, %v3166_v16, -inf }
 0x5c1   : > { %v3201_v46 = vsel %vm2439_vm0, %v7916_v13, -inf  ;;  %v6102_v47 = vpop.f32.mrf.mxu0 }
 0x5c2   : > { %3208 = vmax.xlane.f32.xlu0 %v3207_v7  ;;  %v3188_v31 = vsel %vm7703_vm7, %v6102_v47, -inf }
 0x5c3   : > { %v3169_v56 = vpop.f32.mrf.mxu0 }
 0x5c6   : > { %3202 = vmax.xlane.f32.xlu0 %v3201_v46 }
 0x5cf   : > { %3378 = vrot.lane.b32.xlu1 %v7594_v6, %s7221_s21  ;;  %v3210_v6 = vsel %vm2439_vm0, %v3188_v31, -inf }
 0x5d3   : > { %3376 = vrot.lane.b32.xlu1 %v7590_v42, %s7221_s21  ;;  %v3186_v42 = vsel %vm7710_vm8, %v3169_v56, -inf }
 0x5dc   : > { %3380 = vrot.lane.b32.xlu0 %v7598_v20, %s7221_s21  ;;  %v3204_v20 = vsel %vm2439_vm0, %v3186_v42, -inf }
 0x5e0   : > { %3362 = vrot.lane.b32.xlu0 %v2385_v43, %s7221_s21 }
 0x5e4   : > { %3366 = vrot.lane.b32.xlu0 %v2403_v53, %s7221_s21 }
 0x5e8   : > { %3565 = vrot.lane.b32.xlu0 %v7613_v51, %s7221_s21 }
 0x5f7   : > { %3211 = vmax.xlane.f32.xlu1 %v3210_v6 }
 0x5fb   : > { %3205 = vmax.xlane.f32.xlu1 %v3204_v20 }
 0x60c   : > { %3374 = vrot.lane.b32.xlu1 %v7586_v25, %s7221_s21 }
 0x610   : > { %3364 = vrot.lane.b32.xlu1 %v2394_v10, %s7221_s21 }
 0x614   : > { %3368 = vrot.lane.b32.xlu1 %v2412_v32, %s7221_s21 }
 0x618   : > { %3563 = vrot.lane.b32.xlu1 %v7606_v57, %s7221_s21 }
 0x641   : > { %v3197_v51 = vpop.xlane.xlu0 %3196 }
 0x642   : > { %v3215_v43 = vsub.f32 %v3183_v35, %v3197_v51 }
 0x643   : > { %v3191_v53 = vpop.xlane.xlu1 %3190 }
 0x644   : > { %v3213_v62 = vsub.f32 %v3181_v9, %v3191_v53  ;;  %v3225_v33 = vmul.f32 1.442695, %v3215_v43 }
 0x646   : > { %v3221_v23 = vmul.f32 1.442695, %v3213_v62  ;;  %6891 = vpow2.f32 %v3225_v33 }
 0x647   : > { %v3200_v21 = vpop.xlane.xlu1 %3199  ;;  %v3194_v5 = vpop.xlane.xlu0 %3193 }
 0x648   : > { %v3216_v16 = vsub.f32 %v3184_v58, %v3200_v21  ;;  %v3214_v7 = vsub.f32 %v3182_v63, %v3194_v5  ;;  %6893 = vpow2.f32 %v3221_v23 }
 0x64a   : > { %v3227_v46 = vmul.f32 1.442695, %v3216_v16  ;;  %v3223_v25 = vmul.f32 1.442695, %v3214_v7 }
 0x64b   : > { %v3209_v10 = vpop.xlane.xlu0 %3208  ;;  %v3379_v43 = vpop.permute.xlu1 %3378 }
 0x64c   : > { %6895 = vpow2.f32 %v3227_v46  ;;  %v3401_v62 = vsel %vm2439_vm0, %v3379_v43, 0  ;;  %v3219_v7 = vsub.f32 %v7910_v12, %v3209_v10 }
 0x64d   : > { %6897 = vpow2.f32 %v3223_v25 }
 0x64f   : > { %v3203_v32 = vpop.xlane.xlu0 %3202  ;;  %v3377_v33 = vpop.permute.xlu1 %3376 }
 0x650   : > { %v3398_v23 = vsel %vm2439_vm0, %v3377_v33, 0  ;;  %v3217_v21 = vsub.f32 %v7916_v13, %v3203_v32 }
 0x652   : > { %v3229_v46 = vmul.f32 1.442695, %v3217_v21 }
 0x653   : > { %v3381_v47 = vpop.permute.xlu0 %3380  ;;  %v7943_v57 = vpop.eup %6891 }
 0x654   : > { %6267 = vmatprep.subr.msk.bf16.mxu1 %vm2439_vm0, %v3381_v47  ;;  %v3404_v51 = vsel %vm2439_vm0, %v3381_v47, 0  ;;  %6899 = vpow2.f32 %v3229_v46 }
 0x655   : > { %v7945_v9 = vpop.eup %6893 }
 0x657   : > { %v3363_v35 = vpop.permute.xlu0 %3362 }
 0x659   : > { %v7947_v56 = vpop.eup %6895 }
 0x65a   : > { %v7949_v58 = vpop.eup %6897  ;;  %v3262_v63 = vpack.c.bf16 %v7947_v56, %v7943_v57 }
 0x65b   : > { %v3367_v6 = vpop.permute.xlu0 %3366  ;;  %v3261_v20 = vpack.c.bf16 %v7949_v58, %v7945_v9 }
 0x65d   : > { %6111 = vmatprep.mubr.msk.bf16.mxu1 %vm2439_vm0, %v3261_v20  ;;  %v3233_v20 = vmul.f32 1.442695, %v3219_v7 }
 0x65e   : > { %6112 = vmatmul.mubr.msk.bf16.vlgmr.msra.gmra.mxu1 %vm2439_vm0, %v3262_v63 }
 0x65f   : > { %6120 = vmatpush3.bf16.xpose.msra.mxu1 %v3404_v51  ;;  %v3566_v53 = vpop.permute.xlu0 %3565 }
 0x660   : > { %6268 = vmatprep.subr.msk.bf16.mxu1 %vm2439_vm0, %v3379_v43  ;;  %6135 = vmatprep.subr.bf16.mxu0 %v3566_v53 }
 0x661   : > { %6136 = vmatpush3.bf16.msra.mxu0 %v3566_v53 }
 0x667   : > { %6122 = vmatpush3.bf16.xpose.msra.mxu1 %v3401_v62 }
 0x668   : > { %6269 = vmatprep.subr.msk.bf16.mxu1 %vm2439_vm0, %v3377_v33 }
 0x66f   : > { %6124 = vmatpush3.bf16.xpose.msra.mxu1 %v3398_v23 }
 0x680   : > { %v3212_v5 = vpop.xlane.xlu1 %3211 }
 0x681   : > { %v3220_v16 = vsub.f32 %v3188_v31, %v3212_v5  ;;  %v7967_v31 = vpop.eup %6899 }
 0x683   : > { %v3235_v25 = vmul.f32 1.442695, %v3220_v16 }
 0x684   : > { %v3206_v47 = vpop.xlane.xlu1 %3205 }
 0x685   : > { %v3218_v63 = vsub.f32 %v3186_v42, %v3206_v47  ;;  %6901 = vpow2.f32 %v3235_v25 }
 0x687   : > { %v3231_v51 = vmul.f32 1.442695, %v3218_v63 }
 0x688   : > { %v3375_v43 = vpop.permute.xlu1 %3374 }
 0x689   : > { %6903 = vpow2.f32 %v3231_v51  ;;  %6270 = vmatprep.subr.msk.bf16.mxu1 %vm2439_vm0, %v3375_v43  ;;  %v3395_v53 = vsel %vm2439_vm0, %v3375_v43, 0 }
 0x68a   : > { %6905 = vpow2.f32 %v3233_v20  ;;  %6126 = vmatpush3.bf16.xpose.msra.mxu1 %v3395_v53 }
 0x68b   : > { %6167 = vmatprep.subr.bf16.mxu1 %v7632_v17 }
 0x68c   : > { %v3365_v13 = vpop.permute.xlu1 %3364 }
 0x690   : > { %v3369_v12 = vpop.permute.xlu1 %3368 }
 0x692   : > { %v7969_v42 = vpop.eup %6901 }
 0x693   : > { %8812 = vst [vmem:[#allocation39_spill] sm:$0xff] %v7969_v42 }
 0x694   : > { %v3564_v10 = vpop.permute.xlu1 %3563 }
 0x695   : > { %6137 = vmatprep.subr.bf16.mxu0 %v3564_v10 }
 0x696   : > { %v7971_v32 = vpop.eup %6903  ;;  %6138 = vmatpush3.bf16.msra.mxu0 %v3564_v10 }
 0x697   : > { %v7973_v62 = vpop.eup %6905  ;;  %v3263_v33 = vpack.c.bf16 %v7971_v32, %v7967_v31 }
 0x698   : > { %8813 = vst [vmem:[#allocation40_spill] sm:$0xff] %v7973_v62  ;;  %v3264_v23 = vpack.c.bf16 %v7969_v42, %v7973_v62 }
 0x699   : > { %6115 = vmatprep.mubr.msk.bf16.mxu1 %vm2439_vm0, %v3263_v33 }
 0x69a   : > { %6116 = vmatmul.mubr.msk.bf16.gmra.mxu1 %vm2439_vm0, %v3264_v23 }
 0x69b   : > { %6127 = vmatprep.mubr.msk.bf16.mxu1 %vm2439_vm0, %v3363_v35 }
 0x6a2   : > { %6128 = vmatmul.mubr.msk.bf16.vlgmr.msra.gmra.mxu1 %vm2439_vm0, %v3365_v13 }
 0x6a3   : > { %6168 = vmatpush3.bf16.msra.mxu1 %v7632_v17  ;;  %6131 = vmatprep.mubr.msk.bf16.mxu1 %vm2439_vm0, %v3367_v6 }
 0x6a4   : > { %6169 = vmatprep.subr.bf16.mxu1 %v7630_v11 }
 0x6a7   : > { %6170 = vmatpush3.bf16.msra.mxu1 %v7630_v11 }
 0x6a8   : > { %6171 = vmatprep.subr.bf16.mxu1 %v7628_v19 }
 0x6aa   : > { %6132 = vmatmul.mubr.msk.bf16.gmra.mxu1 %vm2439_vm0, %v3369_v12 }
 0x6ab   : > { %6172 = vmatpush3.bf16.msra.mxu1 %v7628_v19 }
 0x6ac   : > { %6173 = vmatprep.subr.bf16.mxu1 %v7623_v30 }
 0x6af   : > { %6174 = vmatpush3.bf16.msra.mxu1 %v7623_v30 }
 0x71e   : > { %v7992_v35 = vpop.f32.mrf.mxu1 }
 0x71f   : > { %8814 = vst [vmem:[#allocation41_spill] sm:$0xff] %v7992_v35 }
 0x720   : > { %v7994_v21 = vpop.f32.mrf.mxu1 }
 0x721   : > { %8815 = vst [vmem:[#allocation42_spill] sm:$0xff] %v7994_v21 }
 0x722   : > { %v7996_v5 = vpop.f32.mrf.mxu1 }
 0x723   : > { %8816 = vst [vmem:[#allocation43_spill] sm:$0xff] %v7996_v5 }
 0x724   : > { %v7998_v6 = vpop.f32.mrf.mxu1 }
 0x725   : > { %8817 = vst [vmem:[#allocation44_spill] sm:$0xff] %v7998_v6 }
 0x75a   : > { %v8000_v16 = vpop.f32.mrf.mxu1 }
 0x75b   : > { %8818 = vst [vmem:[#allocation45_spill] sm:$0xff] %v8000_v16 }
 0x75c   : > { %v8002_v7 = vpop.f32.mrf.mxu1 }
 0x75d   : > { %8819 = vst [vmem:[#allocation46_spill] sm:$0xff] %v8002_v7 }
 0x75e   : > { %v8004_v46 = vpop.f32.mrf.mxu1 }
 0x75f   : > { %8820 = vst [vmem:[#allocation47_spill] sm:$0xff] %v8004_v46 }
 0x760   : > { %v8006_v25 = vpop.f32.mrf.mxu1 }
 0x761   : > { %8821 = vst [vmem:[#allocation48_spill] sm:$0xff] %v8006_v25 }
 0x762   : > { %v6129_v47 = vpop.f32.mrf.mxu1 }
 0x763   : > { %v3473_v63 = vsel %vm7637_vm1, %v6129_v47, -inf }
 0x764   : > { %v3440_v20 = vpop.f32.mrf.mxu1  ;;  %v3485_v51 = vsel %vm2439_vm0, %v3473_v63, -inf }
 0x765   : > { %v3471_v43 = vsel %vm7643_vm2, %v3440_v20, -inf  ;;  %3486 = vmax.xlane.f32.xlu0 %v3485_v51 }
 0x766   : > { %v6130_v53 = vpop.f32.mrf.mxu1  ;;  %v3479_v12 = vsel %vm2439_vm0, %v3471_v43, -inf }
 0x767   : > { %v3474_v10 = vsel %vm7651_vm3, %v6130_v53, -inf }
 0x768   : > { %v3443_v13 = vpop.f32.mrf.mxu1  ;;  %v3488_v16 = vsel %vm2439_vm0, %v3474_v10, -inf }
 0x769   : > { %v3472_v33 = vsel %vm7659_vm4, %v3443_v13, -inf  ;;  %3480 = vmax.xlane.f32.xlu0 %v3479_v12 }
 0x76a   : > { %v6133_v23 = vpop.f32.mrf.mxu1  ;;  %v3482_v47 = vsel %vm2439_vm0, %v3472_v33, -inf }
 0x76b   : > { %3483 = vmax.xlane.f32.xlu1 %v3482_v47  ;;  %v3477_v20 = vsel %vm7666_vm5, %v6133_v23, -inf }
 0x76c   : > { %v3456_v46 = vpop.f32.mrf.mxu1  ;;  %v3497_v47 = vsel %vm2439_vm0, %v3477_v20, -inf }
 0x76d   : > { %v3475_v51 = vsel %vm7678_vm6, %v3456_v46, -inf  ;;  %3489 = vmax.xlane.f32.xlu0 %v3488_v16 }
 0x76e   : > { %v6134_v25 = vpop.f32.mrf.mxu1  ;;  %v3491_v53 = vsel %vm2439_vm0, %v3475_v51, -inf }
 0x76f   : > { %v3478_v13 = vsel %vm7703_vm7, %v6134_v25, -inf  ;;  %3492 = vmax.xlane.f32.xlu1 %v3491_v53 }
 0x770   : > { %v3459_v12 = vpop.f32.mrf.mxu1  ;;  %v3500_v23 = vsel %vm2439_vm0, %v3478_v13, -inf }
 0x771   : > { %v3476_v7 = vsel %vm7710_vm8, %v3459_v12, -inf  ;;  %3498 = vmax.xlane.f32.xlu0 %v3497_v47 }
 0x772   : > { %v3494_v46 = vsel %vm2439_vm0, %v3476_v7, -inf }
 0x773   : > { %3501 = vmax.xlane.f32.xlu1 %v3500_v23 }
 0x775   : > { %3495 = vmax.xlane.f32.xlu0 %v3494_v46 }
 0x784   : > { %3559 = vrot.lane.b32.xlu1 %v7602_v60, %s7221_s21 }
 0x78b   : > { %3561 = vrot.lane.b32.xlu0 %v7604_v15, %s7221_s21 }
 0x7ee   : > { %v3487_v16 = vpop.xlane.xlu0 %3486 }
 0x7ef   : > { %v3505_v25 = vsub.f32 %v3473_v63, %v3487_v16 }
 0x7f1   : > { %v3515_v47 = vmul.f32 1.442695, %v3505_v25 }
 0x7f2   : > { %v3481_v53 = vpop.xlane.xlu0 %3480 }
 0x7f3   : > { %v3503_v5 = vsub.f32 %v3471_v43, %v3481_v53 }
 0x7f4   : > { %v3484_v35 = vpop.xlane.xlu1 %3483 }
 0x7f5   : > { %v3511_v6 = vmul.f32 1.442695, %v3503_v5  ;;  %v3504_v12 = vsub.f32 %v3472_v33, %v3484_v35 }
 0x7f6   : > { %v3490_v21 = vpop.xlane.xlu0 %3489 }
 0x7f7   : > { %v3513_v42 = vmul.f32 1.442695, %v3504_v12  ;;  %v3506_v23 = vsub.f32 %v3474_v10, %v3490_v21  ;;  %6907 = vpow2.f32 %v3511_v6 }
 0x7f8   : > { %v3493_v62 = vpop.xlane.xlu1 %3492 }
 0x7f9   : > { %6909 = vpow2.f32 %v3513_v42  ;;  %v3517_v46 = vmul.f32 1.442695, %v3506_v23  ;;  %v3507_v37 = vsub.f32 %v3475_v51, %v3493_v62 }
 0x7fa   : > { %6911 = vpow2.f32 %v3515_v47  ;;  %v3499_v60 = vpop.xlane.xlu0 %3498 }
 0x7fb   : > { %6913 = vpow2.f32 %v3517_v46  ;;  %v3509_v15 = vsub.f32 %v3477_v20, %v3499_v60  ;;  %v3519_v63 = vmul.f32 1.442695, %v3507_v37  ;;  %v3766_v20 = vsel %vm2439_vm0, %v7600_v28, 0  ;;  %v8822_v60 = vld [vmem:[#allocation18_spill] sm:$0xff] }
 0x7fc   : > { %v3502_v29 = vpop.xlane.xlu1 %3501  ;;  %v3763_v46 = vsel %vm2439_vm0, %v7596_v2, 0 }
 0x7fd   : > { %v3510_v16 = vsub.f32 %v3478_v13, %v3502_v29  ;;  %v3523_v35 = vmul.f32 1.442695, %v3509_v15  ;;  %6915 = vpow2.f32 %v3519_v63  ;;  %v8823_v15 = vld [vmem:[#allocation16_spill] sm:$0xff] }
 0x7fe   : > { %v3496_v43 = vpop.xlane.xlu0 %3495  ;;  %v2076_v63 = vadd.f32 %v8823_v15, %v8822_v60 }
 0x7ff   : > { %v3525_v53 = vmul.f32 1.442695, %v3510_v16  ;;  %v3508_v5 = vsub.f32 %v3476_v7, %v3496_v43  ;;  %v8824_v16 = vld [vmem:[#allocation17_spill] sm:$0xff] }
 0x800   : > { %v3560_v42 = vpop.permute.xlu1 %3559  ;;  %v2389_v43 = vpack.c.bf16 %v2076_v63, %v8824_v16 }
 0x801   : > { %v3521_v33 = vmul.f32 1.442695, %v3508_v5  ;;  %6917 = vpow2.f32 %v3525_v53  ;;  %v3760_v53 = vsel %vm2439_vm0, %v7592_v49, 0 }
 0x802   : > { %v3562_v21 = vpop.permute.xlu0 %3561  ;;  %v3757_v5 = vsel %vm2439_vm0, %v2389_v43, 0 }
 0x803   : > { %6919 = vpow2.f32 %v3521_v33  ;;  %6139 = vmatprep.subr.bf16.mxu0 %v3562_v21  ;;  %v8826_v33 = vld [vmem:[#allocation14_spill] sm:$0xff] }
 0x804   : > { %6921 = vpow2.f32 %v3523_v35  ;;  %6140 = vmatpush3.bf16.msra.mxu0 %v3562_v21  ;;  %v8036_v62 = vpop.eup %6907  ;;  %v8825_v35 = vld [vmem:[#allocation13_spill] sm:$0xff]  ;;  %v8827_v21 = vld [vmem:[#allocation15_spill] sm:$0xff] }
 0x805   : > { %6141 = vmatprep.subr.bf16.mxu0 %v3560_v42 }
 0x806   : > { %v8038_v6 = vpop.eup %6909 }
 0x807   : > { %v8040_v37 = vpop.eup %6911  ;;  %v3551_v29 = vpack.c.bf16 %v8038_v6, %v8036_v62 }
 0x808   : > { %v8044_v7 = vpop.eup %6913  ;;  %6142 = vmatpush3.bf16.msra.mxu0 %v3560_v42  ;;  %v3533_v18 = vsel %vm2439_vm0, %v8040_v37, 0.0 }
 0x809   : > { %v3552_v10 = vpack.c.bf16 %v8044_v7, %v8040_v37  ;;  %6143 = vmatprep.mubr.msk.bf16.mxu0 %vm2439_vm0, %v3551_v29  ;;  %6271 = vmatprep.subr.msk.bf16.mxu0 %vm2439_vm0, %v7600_v28 }
 0x80a   : > { %v8056_v51 = vpop.eup %6915 }
 0x80b   : > { %6144 = vmatmul.mubr.msk.bf16.vlgmr.msra.gmra.mxu0 %vm2439_vm0, %v3552_v10 }
 0x80c   : > { %6152 = vmatpush3.bf16.xpose.msra.mxu0 %v3766_v20 }
 0x80d   : > { %6272 = vmatprep.subr.msk.bf16.mxu0 %vm2439_vm0, %v7596_v2 }
 0x80e   : > { %v8058_v13 = vpop.eup %6917 }
 0x810   : > { %v8060_v25 = vpop.eup %6919 }
 0x811   : > { %v8062_v12 = vpop.eup %6921  ;;  %v3553_v47 = vpack.c.bf16 %v8060_v25, %v8056_v51 }
 0x812   : > { %v3554_v23 = vpack.c.bf16 %v8058_v13, %v8062_v12  ;;  %v3545_v55 = vsel %vm2439_vm0, %v8062_v12, 0.0  ;;  %v2890_v12 = vsel %vm2439_vm0, %v7846_v50, 0.0 }
 0x813   : > { %6147 = vmatprep.mubr.msk.bf16.mxu0 %vm2439_vm0, %v3553_v47 }
 0x814   : > { %6148 = vmatmul.mubr.msk.bf16.gmra.mxu0 %vm2439_vm0, %v3554_v23 }
 0x815   : > { %6154 = vmatpush3.bf16.xpose.msra.mxu0 %v3763_v46  ;;  %6159 = vmatprep.mubr.msk.bf16.mxu0 %vm2439_vm0, %v7544_v1 }
 0x816   : > { %6273 = vmatprep.subr.msk.bf16.mxu0 %vm2439_vm0, %v7592_v49 }
 0x81d   : > { %6156 = vmatpush3.bf16.xpose.msra.mxu0 %v3760_v53 }
 0x81e   : > { %6274 = vmatprep.subr.msk.bf16.mxu0 %vm2439_vm0, %v2389_v43 }
 0x825   : > { %6158 = vmatpush3.bf16.xpose.msra.mxu0 %v3757_v5 }
 0x82c   : > { %6160 = vmatmul.mubr.msk.bf16.vlgmr.msra.gmra.mxu0 %vm2439_vm0, %v8825_v35 }
 0x82d   : > { %6163 = vmatprep.mubr.msk.bf16.mxu0 %vm2439_vm0, %v8826_v33 }
 0x834   : > { %6164 = vmatmul.mubr.msk.bf16.gmra.mxu0 %vm2439_vm0, %v8827_v21 }
 0x8cb   : > { %v8089_v42 = vpop.f32.mrf.mxu0 }
 0x8cc   : > { %8828 = vst [vmem:[#allocation18_spill] sm:$0xff] %v8089_v42 }
 0x8cd   : > { %v8091_v29 = vpop.f32.mrf.mxu0 }
 0x8cf   : > { %v8093_v10 = vpop.f32.mrf.mxu0 }
 0x8d0   : > { %8829 = vst [vmem:[#allocation16_spill] sm:$0xff] %v8093_v10 }
 0x8d1   : > { %v8095_v20 = vpop.f32.mrf.mxu0 }
 0x8d2   : > { %8830 = vst [vmem:[#allocation17_spill] sm:$0xff] %v8095_v20 }
 0x8d4   : > { %v8097_v47 = vpop.f32.mrf.mxu0 }
 0x8d5   : > { %8831 = vst [vmem:[#allocation13_spill] sm:$0xff] %v8097_v47 }
 0x8d6   : > { %v8099_v23 = vpop.f32.mrf.mxu0 }
 0x8d7   : > { %8832 = vst [vmem:[#allocation14_spill] sm:$0xff] %v8099_v23 }
 0x8d8   : > { %v8101_v46 = vpop.f32.mrf.mxu0 }
 0x8d9   : > { %8833 = vst [vmem:[#allocation15_spill] sm:$0xff] %v8101_v46 }
 0x8da   : > { %v8103_v60 = vpop.f32.mrf.mxu0 }
 0x8db   : > { %8834 = vst [vmem:[#allocation49_spill] sm:$0xff] %v8103_v60 }
 0x8ec   : > { %v6161_v15 = vpop.f32.mrf.mxu0 }
 0x8ed   : > { %v3835_v63 = vsel %vm7637_vm1, %v6161_v15, -inf }
 0x8ee   : > { %v3802_v16 = vpop.f32.mrf.mxu0  ;;  %v3847_v53 = vsel %vm2439_vm0, %v3835_v63, -inf }
 0x8ef   : > { %v3833_v5 = vsel %vm7643_vm2, %v3802_v16, -inf  ;;  %3848 = vmax.xlane.f32.xlu0 %v3847_v53 }
 0x8f0   : > { %v6162_v3 = vpop.f32.mrf.mxu0  ;;  %v3841_v47 = vsel %vm2439_vm0, %v3833_v5, -inf }
 0x8f1   : > { %v3836_v23 = vsel %vm7651_vm3, %v6162_v3, -inf  ;;  %3842 = vmax.xlane.f32.xlu1 %v3841_v47 }
 0x8f2   : > { %v3805_v46 = vpop.f32.mrf.mxu0  ;;  %v3850_v15 = vsel %vm2439_vm0, %v3836_v23, -inf }
 0x8f3   : > { %v3834_v60 = vsel %vm7659_vm4, %v3805_v46, -inf }
 0x8f4   : > { %v6165_v40 = vpop.f32.mrf.mxu0  ;;  %v3844_v10 = vsel %vm2439_vm0, %v3834_v60, -inf }
 0x8f5   : > { %v8119_v16 = vsel %vm7666_vm5, %v6165_v40, -inf  ;;  %3851 = vmax.xlane.f32.xlu1 %v3850_v15  ;;  %3845 = vmax.xlane.f32.xlu0 %v3844_v10 }
 0x8f6   : > { %v3818_v53 = vpop.f32.mrf.mxu0  ;;  %v3859_v3 = vsel %vm2439_vm0, %v8119_v16, -inf }
 0x8f7   : > { %v3837_v47 = vsel %vm7678_vm6, %v3818_v53, -inf }
 0x8f8   : > { %v3853_v46 = vsel %vm2439_vm0, %v3837_v47, -inf  ;;  %v6166_v40 = vpop.f32.mrf.mxu0 }
 0x8f9   : > { %3860 = vmax.xlane.f32.xlu0 %v3859_v3  ;;  %v3840_v10 = vsel %vm7703_vm7, %v6166_v40, -inf }
 0x8fa   : > { %v3821_v15 = vpop.f32.mrf.mxu0  ;;  %v3862_v53 = vsel %vm2439_vm0, %v3840_v10, -inf }
 0x8fd   : > { %3854 = vmax.xlane.f32.xlu0 %v3853_v46 }
 0x906   : > { %4030 = vrot.lane.b32.xlu1 %v7596_v2, %s7221_s21  ;;  %v3838_v2 = vsel %vm7710_vm8, %v3821_v15, -inf }
 0x90a   : > { %4028 = vrot.lane.b32.xlu1 %v7592_v49, %s7221_s21  ;;  %v3856_v49 = vsel %vm2439_vm0, %v3838_v2, -inf }
 0x913   : > { %4032 = vrot.lane.b32.xlu0 %v7600_v28, %s7221_s21 }
 0x917   : > { %4014 = vrot.lane.b32.xlu0 %v7544_v1, %s7221_s21 }
 0x91b   : > { %4018 = vrot.lane.b32.xlu0 %v8826_v33, %s7221_s21 }
 0x92e   : > { %3863 = vmax.xlane.f32.xlu1 %v3862_v53 }
 0x932   : > { %3857 = vmax.xlane.f32.xlu1 %v3856_v49 }
 0x943   : > { %4026 = vrot.lane.b32.xlu1 %v2389_v43, %s7221_s21 }
 0x947   : > { %4016 = vrot.lane.b32.xlu1 %v8825_v35, %s7221_s21 }
 0x94b   : > { %4020 = vrot.lane.b32.xlu1 %v8827_v21, %s7221_s21 }
 0x978   : > { %v3849_v1 = vpop.xlane.xlu0 %3848 }
 0x979   : > { %v3867_v28 = vsub.f32 %v3835_v63, %v3849_v1 }
 0x97a   : > { %v3843_v33 = vpop.xlane.xlu1 %3842 }
 0x97b   : > { %v3865_v3 = vsub.f32 %v3833_v5, %v3843_v33  ;;  %v3877_v46 = vmul.f32 1.442695, %v3867_v28 }
 0x97d   : > { %v3873_v40 = vmul.f32 1.442695, %v3865_v3  ;;  %6923 = vpow2.f32 %v3877_v46 }
 0x97e   : > { %v3852_v42 = vpop.xlane.xlu1 %3851  ;;  %v3846_v15 = vpop.xlane.xlu0 %3845 }
 0x97f   : > { %v3868_v53 = vsub.f32 %v3836_v23, %v3852_v42  ;;  %v3866_v26 = vsub.f32 %v3834_v60, %v3846_v15  ;;  %6925 = vpow2.f32 %v3873_v40 }
 0x981   : > { %v3879_v49 = vmul.f32 1.442695, %v3868_v53  ;;  %v3875_v39 = vmul.f32 1.442695, %v3866_v26 }
 0x982   : > { %v3861_v43 = vpop.xlane.xlu0 %3860  ;;  %v4031_v23 = vpop.permute.xlu1 %4030 }
 0x983   : > { %6927 = vpow2.f32 %v3879_v49  ;;  %v4053_v60 = vsel %vm2439_vm0, %v4031_v23, 0 }
 0x984   : > { %6929 = vpow2.f32 %v3875_v39 }
 0x986   : > { %v3855_v35 = vpop.xlane.xlu0 %3854  ;;  %v4029_v28 = vpop.permute.xlu1 %4028 }
 0x987   : > { %v4050_v33 = vsel %vm2439_vm0, %v4029_v28, 0  ;;  %v3869_v3 = vsub.f32 %v3837_v47, %v3855_v35 }
 0x989   : > { %v3881_v15 = vmul.f32 1.442695, %v3869_v3 }
 0x98a   : > { %v4033_v20 = vpop.permute.xlu0 %4032  ;;  %v8148_v21 = vpop.eup %6923 }
 0x98b   : > { %6275 = vmatprep.subr.msk.bf16.mxu1 %vm2439_vm0, %v4033_v20  ;;  %v4056_v39 = vsel %vm2439_vm0, %v4033_v20, 0  ;;  %v3871_v20 = vsub.f32 %v8119_v16, %v3861_v43  ;;  %6931 = vpow2.f32 %v3881_v15 }
 0x98c   : > { %v8150_v63 = vpop.eup %6925 }
 0x98d   : > { %v3889_v37 = vsel %vm2439_vm0, %v8150_v63, 0.0 }
 0x990   : > { %v8152_v5 = vpop.eup %6927 }
 0x991   : > { %v8154_v1 = vpop.eup %6929  ;;  %v3914_v42 = vpack.c.bf16 %v8152_v5, %v8148_v21 }
 0x992   : > { %v3913_v26 = vpack.c.bf16 %v8154_v1, %v8150_v63 }
 0x994   : > { %6175 = vmatprep.mubr.msk.bf16.mxu1 %vm2439_vm0, %v3913_v26  ;;  %v3885_v26 = vmul.f32 1.442695, %v3871_v20 }
 0x995   : > { %6176 = vmatmul.mubr.msk.bf16.vlgmr.msra.gmra.mxu1 %vm2439_vm0, %v3914_v42 }
 0x996   : > { %6184 = vmatpush3.bf16.xpose.msra.mxu1 %v4056_v39 }
 0x997   : > { %6276 = vmatprep.subr.msk.bf16.mxu1 %vm2439_vm0, %v4031_v23 }
 0x998   : > { %v8170_v47 = vpop.eup %6931 }
 0x99e   : > { %6186 = vmatpush3.bf16.xpose.msra.mxu1 %v4053_v60 }
 0x99f   : > { %6277 = vmatprep.subr.msk.bf16.mxu1 %vm2439_vm0, %v4029_v28  ;;  %v4015_v28 = vpop.permute.xlu0 %4014 }
 0x9a3   : > { %v4019_v3 = vpop.permute.xlu0 %4018 }
 0x9a6   : > { %6188 = vmatpush3.bf16.xpose.msra.mxu1 %v4050_v33 }
 0x9b7   : > { %v3864_v46 = vpop.xlane.xlu1 %3863 }
 0x9b8   : > { %v3872_v40 = vsub.f32 %v3840_v10, %v3864_v46 }
 0x9ba   : > { %v3887_v53 = vmul.f32 1.442695, %v3872_v40  ;;  %v8835_v40 = vmov 0  }
 0x9bb   : > { %v3858_v49 = vpop.xlane.xlu1 %3857 }
 0x9bc   : > { %v3870_v42 = vsub.f32 %v3838_v2, %v3858_v49  ;;  %6933 = vpow2.f32 %v3887_v53 }
 0x9be   : > { %v3883_v39 = vmul.f32 1.442695, %v3870_v42 }
 0x9bf   : > { %v4027_v23 = vpop.permute.xlu1 %4026 }
 0x9c0   : > { %6935 = vpow2.f32 %v3883_v39  ;;  %v4047_v60 = vsel %vm2439_vm0, %v4027_v23, 0  ;;  %6278 = vmatprep.subr.msk.bf16.mxu1 %vm2439_vm0, %v4027_v23 }
 0x9c1   : > { %6937 = vpow2.f32 %v3885_v26  ;;  %6190 = vmatpush3.bf16.xpose.msra.mxu1 %v4047_v60 }
 0x9c3   : > { %v4017_v33 = vpop.permute.xlu1 %4016 }
 0x9c7   : > { %v4021_v46 = vpop.permute.xlu1 %4020 }
 0x9c9   : > { %v8172_v10 = vpop.eup %6933 }
 0x9cd   : > { %v8174_v16 = vpop.eup %6935 }
 0x9ce   : > { %v8176_v43 = vpop.eup %6937  ;;  %v3915_v2 = vpack.c.bf16 %v8174_v16, %v8170_v47 }
 0x9cf   : > { %v3916_v35 = vpack.c.bf16 %v8172_v10, %v8176_v43 }
 0x9d0   : > { %6179 = vmatprep.mubr.msk.bf16.mxu1 %vm2439_vm0, %v3915_v2 }
 0x9d1   : > { %6180 = vmatmul.mubr.msk.bf16.gmra.mxu1 %vm2439_vm0, %v3916_v35 }
 0x9d2   : > { %6191 = vmatprep.mubr.msk.bf16.mxu1 %vm2439_vm0, %v4015_v28 }
 0x9d9   : > { %6192 = vmatmul.mubr.msk.bf16.vlgmr.msra.gmra.mxu1 %vm2439_vm0, %v4017_v33 }
 0x9da   : > { %6195 = vmatprep.mubr.msk.bf16.mxu1 %vm2439_vm0, %v4019_v3 }
 0x9e1   : > { %6196 = vmatmul.mubr.msk.bf16.gmra.mxu1 %vm2439_vm0, %v4021_v46 }
 0x9e2   : > { %5078 = vmatprep.mubr.bf16.mxu1 %v8835_v40 }
 0xa55   : > { %v8189_v20 = vpop.f32.mrf.mxu1 }
 0xa57   : > { %v8191_v15 = vpop.f32.mrf.mxu1 }
 0xa59   : > { %v8193_v53 = vpop.f32.mrf.mxu1 }
 0xa5b   : > { %v8195_v49 = vpop.f32.mrf.mxu1 }
 0xa91   : > { %v8197_v42 = vpop.f32.mrf.mxu1 }
 0xa93   : > { %v8199_v26 = vpop.f32.mrf.mxu1 }
 0xa95   : > { %v8201_v39 = vpop.f32.mrf.mxu1 }
 0xa97   : > { %v8203_v23 = vpop.f32.mrf.mxu1 }
 0xa98   : > { %8836 = vst [vmem:[#allocation50_spill] sm:$0xff] %v8203_v23 }
 0xa99   : > { %v6193_v60 = vpop.f32.mrf.mxu1 }
 0xa9a   : > { %v8207_v2 = vsel %vm7637_vm1, %v6193_v60, -inf }
 0xa9b   : > { %v4092_v35 = vpop.f32.mrf.mxu1  ;;  %v4137_v28 = vsel %vm2439_vm0, %v8207_v2, -inf }
 0xa9c   : > { %v8213_v33 = vsel %vm7643_vm2, %v4092_v35, -inf  ;;  %4138 = vmax.xlane.f32.xlu0 %v4137_v28 }
 0xa9d   : > { %v6194_v3 = vpop.f32.mrf.mxu1  ;;  %v4131_v40 = vsel %vm2439_vm0, %v8213_v33, -inf }
 0xa9e   : > { %v8219_v23 = vsel %vm7651_vm3, %v6194_v3, -inf }
 0xa9f   : > { %v4095_v46 = vpop.f32.mrf.mxu1  ;;  %v4140_v35 = vsel %vm2439_vm0, %v8219_v23, -inf }
 0xaa0   : > { %v8223_v4 = vsel %vm7659_vm4, %v4095_v46, -inf  ;;  %4132 = vmax.xlane.f32.xlu0 %v4131_v40 }
 0xaa1   : > { %v6197_v60 = vpop.f32.mrf.mxu1  ;;  %v4134_v34 = vsel %vm2439_vm0, %v8223_v4, -inf }
 0xaa2   : > { %4135 = vmax.xlane.f32.xlu1 %v4134_v34  ;;  %v8231_v28 = vsel %vm7666_vm5, %v6197_v60, -inf }
 0xaa3   : > { %v4108_v0 = vpop.f32.mrf.mxu1  ;;  %v4149_v41 = vsel %vm2439_vm0, %v8231_v28, -inf }
 0xaa4   : > { %4141 = vmax.xlane.f32.xlu0 %v4140_v35  ;;  %v8237_v40 = vsel %vm7678_vm6, %v4108_v0, -inf  ;;  %v2887_v35 = vsel %vm2439_vm0, %v7840_v45, 0.0  ;;  %v3530_v45 = vsel %vm2439_vm0, %v8038_v6, 0.0  ;;  %v3542_v0 = vsel %vm2439_vm0, %v8060_v25, 0.0 }
 0xaa5   : > { %v4143_v3 = vsel %vm2439_vm0, %v8237_v40, -inf  ;;  %v6198_v61 = vpop.f32.mrf.mxu1  ;;  %v3548_v25 = vsel %vm2439_vm0, %v8058_v13, 0.0  ;;  %v3898_v13 = vsel %vm2439_vm0, %v8152_v5, 0.0 }
 0xaa6   : > { %v8249_v59 = vsel %vm7703_vm7, %v6198_v61, -inf }
 0xaa7   : > { %v4111_v46 = vpop.f32.mrf.mxu1  ;;  %v4152_v60 = vsel %vm2439_vm0, %v8249_v59, -inf }
 0xaa8   : > { %4150 = vmax.xlane.f32.xlu0 %v4149_v41  ;;  %v8255_v34 = vsel %vm7710_vm8, %v4111_v46, -inf }
 0xaac   : > { %4144 = vmax.xlane.f32.xlu0 %v4143_v3 }
 0xab3   : > { %4215 = vrot.lane.b32.xlu1 %v7630_v11, %s7221_s21  ;;  %v2875_v11 = vsel %vm2439_vm0, %v7820_v48, 0.0  ;;  %v3539_v48 = vsel %vm2439_vm0, %v8056_v51, 0.0  ;;  %v3536_v51 = vsel %vm2439_vm0, %v8044_v7, 0.0  ;;  %v2896_v7 = vsel %vm2439_vm0, %v7842_v27, 0.0 }
 0xab4   : > { %v3892_v27 = vsel %vm2439_vm0, %v8154_v1, 0.0 }
 0xab7   : > { %4213 = vrot.lane.b32.xlu1 %v7628_v19, %s7221_s21  ;;  %v4146_v19 = vsel %vm2439_vm0, %v8255_v34, -inf }
 0xac2   : > { %4217 = vrot.lane.b32.xlu0 %v7632_v17, %s7221_s21  ;;  %v3527_v17 = vsel %vm2439_vm0, %v8036_v62, 0.0  ;;  %v2893_v62 = vsel %vm2439_vm0, %v7848_v52, 0.0  ;;  %v2884_v52 = vsel %vm2439_vm0, %v7828_v38, 0.0 }
 0xadb   : > { %4153 = vmax.xlane.f32.xlu1 %v4152_v60 }
 0xadf   : > { %4147 = vmax.xlane.f32.xlu1 %v4146_v19 }
 0xae1   : > { %2876 = vadd.xlane.f32.xlu0 %v2875_v11 }
 0xae5   : > { %3528 = vadd.xlane.f32.xlu0 %v3527_v17 }
 0xae9   : > { %2882 = vadd.xlane.f32.xlu0 %v2881_v44 }
 0xaed   : > { %3534 = vadd.xlane.f32.xlu0 %v3533_v18 }
 0xaf0   : > { %4211 = vrot.lane.b32.xlu1 %v7623_v30, %s7221_s21  ;;  %v2878_v30 = vsel %vm2439_vm0, %v7822_v14, 0.0 }
 0xaf1   : > { %2888 = vadd.xlane.f32.xlu0 %v2887_v35 }
 0xaf5   : > { %3540 = vadd.xlane.f32.xlu0 %v3539_v48 }
 0xaf9   : > { %2894 = vadd.xlane.f32.xlu0 %v2893_v62 }
 0xafd   : > { %3546 = vadd.xlane.f32.xlu0 %v3545_v55 }
 0xb01   : > { %3890 = vadd.xlane.f32.xlu0 %v3889_v37 }
 0xb14   : > { %2879 = vadd.xlane.f32.xlu1 %v2878_v30  ;;  %v3895_v30 = vsel %vm2439_vm0, %v8148_v21, 0.0  ;;  %v2585_v21 = vsel %vm2439_vm0, %v7727_v24, 0.0  ;;  %v3240_v24 = vsel %vm2439_vm0, %v7949_v58, 0.0  ;;  %v3246_v58 = vsel %vm2439_vm0, %v7947_v56, 0.0 }
 0xb15   : > { %v3252_v56 = vsel %vm2439_vm0, %v7971_v32, 0.0 }
 0xb18   : > { %3531 = vadd.xlane.f32.xlu1 %v3530_v45 }
 0xb1c   : > { %2885 = vadd.xlane.f32.xlu1 %v2884_v52  ;;  %v3904_v52 = vsel %vm2439_vm0, %v8174_v16, 0.0 }
 0xb20   : > { %3537 = vadd.xlane.f32.xlu1 %v3536_v51 }
 0xb24   : > { %2891 = vadd.xlane.f32.xlu1 %v2890_v12 }
 0xb25   : > { %v4139_v63 = vpop.xlane.xlu0 %4138 }
 0xb26   : > { %v4157_v14 = vsub.f32 %v8207_v2, %v4139_v63  ;;  %v3910_v63 = vsel %vm2439_vm0, %v8172_v10, 0.0  ;;  %v3237_v10 = vsel %vm2439_vm0, %v7945_v9, 0.0  ;;  %v3243_v9 = vsel %vm2439_vm0, %v7943_v57, 0.0 }
 0xb28   : > { %v4167_v6 = vmul.f32 1.442695, %v4157_v14  ;;  %3543 = vadd.xlane.f32.xlu1 %v3542_v0 }
 0xb29   : > { %v4133_v41 = vpop.xlane.xlu0 %4132 }
 0xb2a   : > { %6939 = vpow2.f32 %v4167_v6  ;;  %v4155_v38 = vsub.f32 %v8213_v33, %v4133_v41  ;;  %v2588_v6 = vsel %vm2439_vm0, %v7731_v36, 0.0  ;;  %v3901_v41 = vsel %vm2439_vm0, %v8170_v47, 0.0 }
 0xb2b   : > { %v4136_v3 = vpop.xlane.xlu1 %4135  ;;  %v2591_v36 = vsel %vm2439_vm0, %v7733_v54, 0.0 }
 0xb2c   : > { %v4163_v61 = vmul.f32 1.442695, %v4155_v38  ;;  %v4156_v50 = vsub.f32 %v8223_v4, %v4136_v3  ;;  %2897 = vadd.xlane.f32.xlu1 %v2896_v7  ;;  %v3907_v38 = vsel %vm2439_vm0, %v8176_v43, 0.0  ;;  %v8837_v3 = vld [vmem:[#allocation20_spill] sm:$0xff]  ;;  %v8838_v7 = vld [vmem:[#allocation21_spill] sm:$0xff] }
 0xb2d   : > { %v4142_v46 = vpop.xlane.xlu0 %4141  ;;  %v2594_v47 = vsel %vm2439_vm0, %v8837_v3, 0.0  ;;  %v2597_v43 = vsel %vm2439_vm0, %v8838_v7, 0.0 }
 0xb2e   : > { %6941 = vpow2.f32 %v4163_v61  ;;  %v4165_v2 = vmul.f32 1.442695, %v4156_v50  ;;  %v4158_v60 = vsub.f32 %v8219_v23, %v4142_v46  ;;  %v8839_v61 = vld [vmem:[#allocation23_spill] sm:$0xff] }
 0xb2f   : > { %v4216_v35 = vpop.permute.xlu1 %4215  ;;  %v2600_v54 = vsel %vm2439_vm0, %v8839_v61, 0.0  ;;  %v8845_v61 = vld [vmem:[#allocation16_spill] sm:$0xff] }
 0xb30   : > { %6943 = vpow2.f32 %v4165_v2  ;;  %v4169_v19 = vmul.f32 1.442695, %v4158_v60  ;;  %3549 = vadd.xlane.f32.xlu1 %v3548_v25  ;;  %v3249_v2 = vsel %vm2439_vm0, %v7967_v31, 0.0 }
 0xb31   : > { %v4151_v33 = vpop.xlane.xlu0 %4150 }
 0xb32   : > { %v4161_v11 = vsub.f32 %v8231_v28, %v4151_v33  ;;  %6945 = vpow2.f32 %v4169_v19 }
 0xb33   : > { %v4214_v37 = vpop.permute.xlu1 %4213 }
 0xb34   : > { %v4175_v4 = vmul.f32 1.442695, %v4161_v11  ;;  %3893 = vadd.xlane.f32.xlu1 %v3892_v27 }
 0xb35   : > { %v4145_v17 = vpop.xlane.xlu0 %4144 }
 0xb36   : > { %v4159_v44 = vsub.f32 %v8237_v40, %v4145_v17  ;;  %6947 = vpow2.f32 %v4175_v4  ;;  %v8840_v17 = vld [vmem:[#allocation24_spill] sm:$0xff] }
 0xb37   : > { %v8303_v18 = vpop.eup %6939 }
 0xb38   : > { %v4171_v23 = vmul.f32 1.442695, %v4159_v44  ;;  %3899 = vadd.xlane.f32.xlu1 %v3898_v13  ;;  %v4185_v28 = vsel %vm2439_vm0, %v8303_v18, 0.0  ;;  %v2603_v44 = vsel %vm2439_vm0, %v8840_v17, 0.0  ;;  %v6768_v17 = vld [vmem:[#allocation8 + $0x180] ss:$12 sps:$4 sm:$0xff]  }
 0xb39   : > { %4186 = vadd.xlane.f32.xlu0 %v4185_v28  ;;  %v4218_v1 = vpop.permute.xlu0 %4217 }
 0xb3a   : > { %6199 = vmatprep.subr.bf16.mxu0 %v4218_v1  ;;  %6949 = vpow2.f32 %v4171_v23 }
 0xb3b   : > { %v6942_v48 = vpop.eup %6941  ;;  %6200 = vmatpush3.bf16.msra.mxu0 %v4218_v1 }
 0xb3c   : > { %6201 = vmatprep.subr.bf16.mxu0 %v4216_v35  ;;  %v4179_v40 = vsel %vm2439_vm0, %v6942_v48, 0.0 }
 0xb3d   : > { %v6944_v62 = vpop.eup %6943  ;;  %4180 = vadd.xlane.f32.xlu0 %v4179_v40 }
 0xb3e   : > { %v4182_v5 = vsel %vm2439_vm0, %v6944_v62, 0.0  ;;  %v4203_v55 = vpack.c.bf16 %v6944_v62, %v6942_v48 }
 0xb3f   : > { %4183 = vadd.xlane.f32.xlu1 %v4182_v5  ;;  %6202 = vmatpush3.bf16.msra.mxu0 %v4216_v35  ;;  %v6946_v45 = vpop.eup %6945 }
 0xb40   : > { %6203 = vmatprep.subr.bf16.mxu0 %v4214_v37  ;;  %6207 = vmatprep.mubr.msk.bf16.mxu0 %vm2439_vm0, %v4203_v55  ;;  %v4188_v51 = vsel %vm2439_vm0, %v6946_v45, 0.0 }
 0xb41   : > { %3896 = vadd.xlane.f32.xlu0 %v3895_v30 }
 0xb43   : > { %3905 = vadd.xlane.f32.xlu1 %v3904_v52  ;;  %6204 = vmatpush3.bf16.msra.mxu0 %v4214_v37  ;;  %v6948_v12 = vpop.eup %6947 }
 0xb44   : > { %v4197_v14 = vsel %vm2439_vm0, %v6948_v12, 0.0 }
 0xb45   : > { %4189 = vadd.xlane.f32.xlu0 %v4188_v51 }
 0xb47   : > { %3911 = vadd.xlane.f32.xlu1 %v3910_v63  ;;  %v6950_v0 = vpop.eup %6949 }
 0xb48   : > { %v4191_v16 = vsel %vm2439_vm0, %v6950_v0, 0.0 }
 0xb49   : > { %4198 = vadd.xlane.f32.xlu0 %v4197_v14 }
 0xb4b   : > { %2586 = vadd.xlane.f32.xlu1 %v2585_v21  ;;  %v8841_v21 = vld [vmem:[#allocation17_spill] sm:$0xff] }
 0xb4d   : > { %4192 = vadd.xlane.f32.xlu0 %v4191_v16 }
 0xb4f   : > { %2589 = vadd.xlane.f32.xlu1 %v2588_v6 }
 0xb51   : > { %3902 = vadd.xlane.f32.xlu0 %v3901_v41 }
 0xb53   : > { %3238 = vadd.xlane.f32.xlu1 %v3237_v10  ;;  %v8842_v10 = vld [vmem:[#allocation33_spill] sm:$0xff] }
 0xb55   : > { %3908 = vadd.xlane.f32.xlu0 %v3907_v38 }
 0xb57   : > { %3241 = vadd.xlane.f32.xlu1 %v3240_v24  ;;  %v8843_v24 = vld [vmem:[#allocation34_spill] sm:$0xff] }
 0xb59   : > { %2592 = vadd.xlane.f32.xlu0 %v2591_v36 }
 0xb5b   : > { %2595 = vadd.xlane.f32.xlu1 %v2594_v47 }
 0xb5d   : > { %3244 = vadd.xlane.f32.xlu0 %v3243_v9 }
 0xb5f   : > { %2598 = vadd.xlane.f32.xlu1 %v2597_v43  ;;  %v8844_v43 = vld [vmem:[#allocation18_spill] sm:$0xff] }
 0xb61   : > { %3247 = vadd.xlane.f32.xlu0 %v3246_v58 }
 0xb63   : > { %2601 = vadd.xlane.f32.xlu1 %v2600_v54 }
 0xb64   : > { %v4154_v50 = vpop.xlane.xlu1 %4153 }
 0xb65   : > { %v4162_v46 = vsub.f32 %v8249_v59, %v4154_v50  ;;  %v4204_v59 = vpack.c.bf16 %v6946_v45, %v8303_v18 }
 0xb67   : > { %v4177_v57 = vmul.f32 1.442695, %v4162_v46  ;;  %3250 = vadd.xlane.f32.xlu1 %v3249_v2 }
 0xb68   : > { %v4148_v60 = vpop.xlane.xlu1 %4147 }
 0xb69   : > { %6951 = vpow2.f32 %v4177_v57  ;;  %v4160_v25 = vsub.f32 %v8255_v34, %v4148_v60  ;;  %v8846_v60 = vld [vmem:[#allocation36_spill] sm:$0xff] }
 0xb6a   : > { %v2877_v18 = vpop.xlane.xlu0 %2876 }
 0xb6b   : > { %v4173_v19 = vmul.f32 1.442695, %v4160_v25  ;;  %3253 = vadd.xlane.f32.xlu1 %v3252_v56  ;;  %v8847_v56 = vld [vmem:[#allocation38_spill] sm:$0xff] }
 0xb6c   : > { %v4212_v33 = vpop.permute.xlu1 %4211 }
 0xb6d   : > { %6953 = vpow2.f32 %v4173_v19  ;;  %6205 = vmatprep.subr.bf16.mxu0 %v4212_v33 }
 0xb6e   : > { %6206 = vmatpush3.bf16.msra.mxu0 %v4212_v33  ;;  %v3529_v13 = vpop.xlane.xlu0 %3528  ;;  %6955 = vrcp.f32 %v2877_v18  ;;  %v8850_v18 = vld [vmem:[#allocation35_spill] sm:$0xff] }
 0xb71   : > { %6208 = vmatmul.mubr.msk.bf16.vlgmr.msra.gmra.mxu0 %vm2439_vm0, %v4204_v59 }
 0xb72   : > { %v2883_v23 = vpop.xlane.xlu0 %2882 }
 0xb76   : > { %v6952_v31 = vpop.eup %6951  ;;  %v3535_v28 = vpop.xlane.xlu0 %3534 }
 0xb77   : > { %v4200_v11 = vsel %vm2439_vm0, %v6952_v31, 0.0  ;;  %v4206_v32 = vpack.c.bf16 %v6952_v31, %v6948_v12 }
 0xb78   : > { %4201 = vadd.xlane.f32.xlu1 %v4200_v11  ;;  %v8848_v11 = vld [vmem:[#allocation14_spill] sm:$0xff] }
 0xb7a   : > { %v6954_v27 = vpop.eup %6953  ;;  %v2889_v48 = vpop.xlane.xlu0 %2888 }
 0xb7b   : > { %v4194_v34 = vsel %vm2439_vm0, %v6954_v27, 0.0  ;;  %v4205_v4 = vpack.c.bf16 %v6954_v27, %v6950_v0  ;;  %v6956_v62 = vpop.eup %6955 }
 0xb7c   : > { %4195 = vadd.xlane.f32.xlu1 %v4194_v34  ;;  %v8360_v30 = vmul.f32 %v6956_v62, %v7882_v8  ;;  %v8849_v34 = vld [vmem:[#allocation49_spill] sm:$0xff] }
 0xb7d   : > { %6211 = vmatprep.mubr.msk.bf16.mxu0 %vm2439_vm0, %v4205_v4 }
 0xb7e   : > { %6212 = vmatmul.mubr.msk.bf16.gmra.mxu0 %vm2439_vm0, %v4206_v32  ;;  %v3541_v5 = vpop.xlane.xlu0 %3540 }
 0xb80   : > { %2604 = vadd.xlane.f32.xlu1 %v2603_v44 }
 0xb82   : > { %v2895_v14 = vpop.xlane.xlu0 %2894 }
 0xb9d   : > { %v2880_v35 = vpop.xlane.xlu1 %2879 }
 0xb9e   : > { %6957 = vrcp.f32 %v2880_v35 }
 0xb9f   : > { %6959 = vrcp.f32 %v3529_v13 }
 0xba1   : > { %v3532_v1 = vpop.xlane.xlu1 %3531 }
 0xba2   : > { %6961 = vrcp.f32 %v3532_v1 }
 0xba3   : > { %6963 = vrcp.f32 %v2883_v23  ;;  %v8851_v23 = vld [vmem:[#allocation37_spill] sm:$0xff] }
 0xba5   : > { %v2886_v40 = vpop.xlane.xlu1 %2885 }
 0xba6   : > { %6965 = vrcp.f32 %v2886_v40  ;;  %v8852_v40 = vld [vmem:[#allocation13_spill] sm:$0xff] }
 0xba7   : > { %6967 = vrcp.f32 %v3535_v28 }
 0xba9   : > { %v3538_v55 = vpop.xlane.xlu1 %3537 }
 0xbaa   : > { %6969 = vrcp.f32 %v3538_v55 }
 0xbab   : > { %v6958_v37 = vpop.eup %6957  ;;  %6971 = vrcp.f32 %v2889_v48 }
 0xbac   : > { %v8363_v45 = vmul.f32 %v6958_v37, %v7886_v22  ;;  %v6960_v52 = vpop.eup %6959 }
 0xbad   : > { %v2892_v51 = vpop.xlane.xlu1 %2891  ;;  %v8368_v0 = vmul.f32 %v6960_v52, %v8091_v29  ;;  %v3547_v29 = vpop.xlane.xlu0 %3546 }
 0xbae   : > { %6973 = vrcp.f32 %v2892_v51  ;;  %v6379_v12 = vpack.i.bf16 %v8363_v45, %v8360_v30  ;;  %v6831_v30 = vld [vmem:[#allocation8 + $0xdc] ss:$12 sps:$4 sm:$0xff]   ;;  %v6829_v45 = vld [vmem:[#allocation8 + $0xd8] ss:$12 sps:$4 sm:$0xff]  }
 0xbaf   : > { %v6962_v63 = vpop.eup %6961  ;;  %6975 = vrcp.f32 %v3541_v5  ;;  %v8853_v5 = vld [vmem:[#allocation15_spill] sm:$0xff] }
 0xbb0   : > { %v8371_v16 = vmul.f32 %v6962_v63, %v8841_v21  ;;  %v6964_v8 = vpop.eup %6963 }
 0xbb1   : > { %v3544_v6 = vpop.xlane.xlu1 %3543  ;;  %v8376_v38 = vmul.f32 %v6964_v8, %v8842_v10  ;;  %v6747_v10 = vld [vmem:[#allocation8 + $0x228] ss:$12 sps:$4 sm:$0xff]  }
 0xbb2   : > { %6977 = vrcp.f32 %v3544_v6  ;;  %v6384_v22 = vpack.i.bf16 %v8371_v16, %v8368_v0  ;;  %v6834_v0 = vld [vmem:[#allocation8 + $0xc0] ss:$12 sps:$4 sm:$0xff]  }
 0xbb3   : > { %v6966_v41 = vpop.eup %6965  ;;  %6979 = vrcp.f32 %v2895_v14 }
 0xbb4   : > { %v8379_v36 = vmul.f32 %v6966_v41, %v8843_v24  ;;  %v6968_v3 = vpop.eup %6967  ;;  %v6749_v24 = vld [vmem:[#allocation8 + $0x22c] ss:$12 sps:$4 sm:$0xff]  }
 0xbb5   : > { %v2898_v47 = vpop.xlane.xlu1 %2897  ;;  %v8384_v58 = vmul.f32 %v6968_v3, %v8844_v43  ;;  %5046 = vmatprep.subr.bf16.mxu1 %v6749_v24  ;;  %v6755_v43 = vld [vmem:[#allocation8 + $0x1fc] ss:$12 sps:$4 sm:$0xff]  }
 0xbb6   : > { %6981 = vrcp.f32 %v2898_v47  ;;  %v6389_v9 = vpack.i.bf16 %v8379_v36, %v8376_v38  ;;  %5047 = vmatpush1.bf16.msra.mxu1 %v6747_v10  ;;  %v6750_v47 = vld [vmem:[#allocation8 + $0x210] ss:$12 sps:$4 sm:$0xff]  }
 0xbb7   : > { %v6970_v7 = vpop.eup %6969  ;;  %6983 = vrcp.f32 %v3547_v29  ;;  %v6752_v29 = vld [vmem:[#allocation8 + $0x214] ss:$12 sps:$4 sm:$0xff]   ;;  %v6762_v10 = vld [vmem:[#allocation8 + $0x1b0] ss:$12 sps:$4 sm:$0xff]  }
 0xbb8   : > { %v8387_v54 = vmul.f32 %v6970_v7, %v8845_v61  ;;  %v6972_v50 = vpop.eup %6971  ;;  %v8439_v7 = vpop.xlane.xlu0 %3890  ;;  %5048 = vmatprep.subr.bf16.mxu1 %v6752_v29 }
 0xbb9   : > { %v3550_v46 = vpop.xlane.xlu1 %3549  ;;  %v8392_v25 = vmul.f32 %v6972_v50, %v8846_v60  ;;  %v6753_v50 = vld [vmem:[#allocation8 + $0x1f8] ss:$12 sps:$4 sm:$0xff]   ;;  %v6756_v60 = vld [vmem:[#allocation8 + $0x1e0] ss:$12 sps:$4 sm:$0xff]  }
 0xbba   : > { %6985 = vrcp.f32 %v3550_v46  ;;  %v6394_v2 = vpack.i.bf16 %v8387_v54, %v8384_v58  ;;  %5049 = vmatpush1.bf16.msra.mxu1 %v6750_v47 }
 0xbbb   : > { %v6974_v57 = vpop.eup %6973  ;;  %5050 = vmatprep.subr.bf16.mxu1 %v6755_v43  ;;  %v6765_v43 = vld [vmem:[#allocation8 + $0x198] ss:$12 sps:$4 sm:$0xff]  }
 0xbbc   : > { %v8395_v19 = vmul.f32 %v6974_v57, %v8847_v56  ;;  %v6976_v33 = vpop.eup %6975  ;;  %v6758_v57 = vld [vmem:[#allocation8 + $0x1e4] ss:$12 sps:$4 sm:$0xff]  }
 0xbbd   : > { %v8400_v27 = vmul.f32 %v6976_v33, %v8848_v11  ;;  %v8423_v52 = vpop.xlane.xlu1 %3893 }
 0xbbe   : > { %v6399_v59 = vpack.i.bf16 %v8395_v19, %v8392_v25  ;;  %5051 = vmatpush1.bf16.msra.mxu1 %v6753_v50  ;;  %v6767_v50 = vld [vmem:[#allocation8 + $0x19c] ss:$12 sps:$4 sm:$0xff]  }
 0xbbf   : > { %v6978_v31 = vpop.eup %6977  ;;  %5052 = vmatprep.subr.bf16.mxu1 %v6758_v57 }
 0xbc0   : > { %v8403_v4 = vmul.f32 %v6978_v31, %v8849_v34  ;;  %v6980_v32 = vpop.eup %6979 }
 0xbc1   : > { %v8408_v13 = vmul.f32 %v6980_v32, %v8850_v18  ;;  %v8425_v51 = vpop.xlane.xlu1 %3899  ;;  %v6761_v18 = vld [vmem:[#allocation8 + $0x1cc] ss:$12 sps:$4 sm:$0xff]  }
 0xbc2   : > { %v4187_v46 = vpop.xlane.xlu0 %4186  ;;  %5053 = vmatpush1.bf16.msra.mxu1 %v6756_v60  ;;  %v8857_v16 = vpack.i.bf16 %v8403_v4, %v8400_v27 }
 0xbc3   : > { %v6982_v44 = vpop.eup %6981  ;;  %6987 = vrcp.f32 %v4187_v46  ;;  %5054 = vmatprep.subr.bf16.mxu1 %v6761_v18 }
 0xbc4   : > { %v8411_v28 = vmul.f32 %v6982_v44, %v8851_v23  ;;  %v6984_v35 = vpop.eup %6983 }
 0xbc5   : > { %v8416_v62 = vmul.f32 %v6984_v35, %v8852_v40  ;;  %v6759_v35 = vld [vmem:[#allocation8 + $0x1c8] ss:$12 sps:$4 sm:$0xff]  }
 0xbc6   : > { %v4181_v33 = vpop.xlane.xlu0 %4180  ;;  %5055 = vmatpush1.bf16.msra.mxu1 %v6759_v35  ;;  %v8858_v58 = vpack.i.bf16 %v8411_v28, %v8408_v13 }
 0xbc7   : > { %v6986_v48 = vpop.eup %6985 }
 0xbc8   : > { %v8419_v55 = vmul.f32 %v6986_v48, %v8853_v5  ;;  %v4184_v63 = vpop.xlane.xlu1 %4183  ;;  %v6764_v5 = vld [vmem:[#allocation8 + $0x1b4] ss:$12 sps:$4 sm:$0xff]  }
 0xbc9   : > { %5056 = vmatprep.subr.bf16.mxu1 %v6764_v5 }
 0xbca   : > { %v8447_v11 = vpop.xlane.xlu0 %3896  ;;  %5057 = vmatpush1.bf16.msra.mxu1 %v6762_v10  ;;  %v8859_v38 = vpack.i.bf16 %v8419_v55, %v8416_v62 }
 0xbcb   : > { %5058 = vmatprep.subr.bf16.mxu1 %v6767_v50 }
 0xbcc   : > { %v8427_v14 = vpop.xlane.xlu1 %3905 }
 0xbce   : > { %v4190_v32 = vpop.xlane.xlu0 %4189  ;;  %5059 = vmatpush1.bf16.msra.mxu1 %v6765_v43 }
 0xbcf   : > { %6989 = vrcp.f32 %v4190_v32 }
 0xbd0   : > { %v8429_v21 = vpop.xlane.xlu1 %3911  ;;  %6991 = vrcp.f32 %v4181_v33  ;;  %v6988_v29 = vpop.eup %6987 }
 0xbd1   : > { %6993 = vrcp.f32 %v4184_v63 }
 0xbd2   : > { %v4199_v48 = vpop.xlane.xlu0 %4198 }
 0xbd3   : > { %6995 = vrcp.f32 %v4199_v48  ;;  %v6770_v48 = vld [vmem:[#allocation8 + $0x184] ss:$12 sps:$4 sm:$0xff]  }
 0xbd4   : > { %v8431_v8 = vpop.xlane.xlu1 %2586  ;;  %5060 = vmatprep.subr.bf16.mxu1 %v6770_v48  ;;  %v6779_v48 = vld [vmem:[#allocation8 + $0x78] ss:$12 sps:$4 sm:$0xff]  }
 0xbd5   : > { %5061 = vmatpush1.bf16.msra.mxu1 %v6768_v17  ;;  %v6781_v17 = vld [vmem:[#allocation8 + $0x7c] ss:$12 sps:$4 sm:$0xff]  }
 0xbd6   : > { %v4193_v60 = vpop.xlane.xlu0 %4192 }
 0xbd8   : > { %v8433_v6 = vpop.xlane.xlu1 %2589 }
 0xbda   : > { %v3903_v36 = vpop.xlane.xlu0 %3902 }
 0xbdc   : > { %v8435_v41 = vpop.xlane.xlu1 %3238  ;;  %v6990_v63 = vpop.eup %6989 }
 0xbdd   : > { %v6992_v57 = vpop.eup %6991 }
 0xbde   : > { %v6994_v18 = vpop.eup %6993 }
 0xbe0   : > { %v8437_v3 = vpop.xlane.xlu1 %3241 }
 0xbe4   : > { %v8441_v61 = vpop.xlane.xlu1 %2595 }
 0xbe8   : > { %v8443_v56 = vpop.xlane.xlu1 %2598 }
 0xbec   : > { %v8445_v31 = vpop.xlane.xlu1 %2601 }
 0xbf0   : > { %v8449_v34 = vpop.xlane.xlu1 %3250 }
 0xbf4   : > { %v8451_v44 = vpop.xlane.xlu1 %3253 }
 0xc01   : > { %v4202_v23 = vpop.xlane.xlu1 %4201 }
 0xc02   : > { %6997 = vrcp.f32 %v4202_v23 }
 0xc05   : > { %v4196_v47 = vpop.xlane.xlu1 %4195 }
 0xc06   : > { %6999 = vrcp.f32 %v4196_v47 }
 0xc07   : > { %7001 = vrcp.f32 %v4193_v60 }
 0xc08   : > { %7003 = vrcp.f32 %v8439_v7 }
 0xc09   : > { %7005 = vrcp.f32 %v8425_v51  ;;  %v8506_v19 = vpop.xlane.xlu1 %2604 }
 0xc0a   : > { %7007 = vrcp.f32 %v8447_v11 }
 0xc0b   : > { %7009 = vrcp.f32 %v8423_v52 }
 0xc0c   : > { %7011 = vrcp.f32 %v8429_v21 }
 0xc31   : > { %v6209_v40 = vpop.f32.mrf.mxu0 }
 0xc32   : > { %v4310_v33 = vmul.f32 %v6988_v29, %v6209_v40  ;;  %v6996_v29 = vpop.eup %6995 }
 0xc33   : > { %v4269_v24 = vpop.f32.mrf.mxu0  ;;  %v6998_v50 = vpop.eup %6997 }
 0xc34   : > { %v4308_v37 = vmul.f32 %v6992_v57, %v4269_v24  ;;  %v6774_v57 = vld [vmem:[#allocation8 + $0xac] ss:$12 sps:$4 sm:$0xff]   ;;  %v7000_v43 = vpop.eup %6999 }
 0xc35   : > { %v6210_v46 = vpop.f32.mrf.mxu0  ;;  %4973 = vmatprep.subr.bf16.mxu0 %v6774_v57  ;;  %v6798_v57 = vld [vmem:[#allocation8 + $0x4] ss:$12 sps:$4 sm:$0xff]  }
 0xc36   : > { %v4311_v32 = vmul.f32 %v6990_v63, %v6210_v46  ;;  %v6772_v46 = vld [vmem:[#allocation8 + $0xa8] ss:$12 sps:$4 sm:$0xff]  }
 0xc37   : > { %v4272_v35 = vpop.f32.mrf.mxu0  ;;  %4974 = vmatpush1.bf16.msra.mxu0 %v6772_v46  ;;  %v6793_v46 = vld [vmem:[#allocation8 + $0x18] ss:$12 sps:$4 sm:$0xff]  }
 0xc38   : > { %v6359_v1 = vpack.i.bf16 %v4311_v32, %v4310_v33  ;;  %v4309_v5 = vmul.f32 %v6994_v18, %v4272_v35  ;;  %v7002_v32 = vpop.eup %7001  ;;  %v6776_v18 = vld [vmem:[#allocation8 + $0x90] ss:$12 sps:$4 sm:$0xff]  }
 0xc39   : > { %v7004_v25 = vpop.eup %7003 }
 0xc3a   : > { %v6364_v10 = vpack.i.bf16 %v4309_v5, %v4308_v37  ;;  %6360 = vrot.lane.b32.xlu1 %v6359_v1, %s7221_s21  ;;  %v6778_v1 = vld [vmem:[#allocation8 + $0x94] ss:$12 sps:$4 sm:$0xff]   ;;  %v4002_v7 = vmul.f32 %v7004_v25, %v8191_v15 }
 0xc3b   : > { %4975 = vmatprep.subr.bf16.mxu0 %v6778_v1  ;;  %v8855_v1 = vld [vmem:[#allocation39_spill] sm:$0xff] }
 0xc3c   : > { %6365 = vrot.lane.b32.xlu0 %v6364_v10, %s7221_s21  ;;  %4976 = vmatpush1.bf16.msra.mxu0 %v6776_v18  ;;  %v6785_v10 = vld [vmem:[#allocation8 + $0x64] ss:$12 sps:$4 sm:$0xff]   ;;  %v6799_v18 = vld [vmem:[#allocation8 + $0x168] ss:$12 sps:$4 sm:$0xff]  }
 0xc3d   : > { %4977 = vmatprep.subr.bf16.mxu0 %v6781_v17  ;;  %v6804_v17 = vld [vmem:[#allocation8 + $0x150] ss:$12 sps:$4 sm:$0xff]  }
 0xc3e   : > { %v6213_v23 = vpop.f32.mrf.mxu0 }
 0xc3f   : > { %v4314_v63 = vmul.f32 %v6996_v29, %v6213_v23  ;;  %v6783_v23 = vld [vmem:[#allocation8 + $0x60] ss:$12 sps:$4 sm:$0xff]  }
 0xc40   : > { %v4285_v40 = vpop.f32.mrf.mxu0  ;;  %4978 = vmatpush1.bf16.msra.mxu0 %v6779_v48  ;;  %v6788_v29 = vld [vmem:[#allocation8 + $0x4c] ss:$12 sps:$4 sm:$0xff]  }
 0xc41   : > { %v4312_v35 = vmul.f32 %v7002_v32, %v4285_v40  ;;  %4979 = vmatprep.subr.bf16.mxu0 %v6785_v10  ;;  %v6790_v40 = vld [vmem:[#allocation8 + $0x30] ss:$12 sps:$4 sm:$0xff]   ;;  %v3258_v32 = vsel %vm2439_vm0, %v8855_v1, 0.0 }
 0xc42   : > { %v6214_v47 = vpop.f32.mrf.mxu0  ;;  %v6811_v10 = vld [vmem:[#allocation8 + $0x13c] ss:$12 sps:$4 sm:$0xff]  }
 0xc43   : > { %v4315_v24 = vmul.f32 %v6998_v50, %v6214_v47  ;;  %v6786_v50 = vld [vmem:[#allocation8 + $0x48] ss:$12 sps:$4 sm:$0xff]  }
 0xc44   : > { %v4288_v60 = vpop.f32.mrf.mxu0  ;;  %4980 = vmatpush1.bf16.msra.mxu0 %v6783_v23  ;;  %v6792_v47 = vld [vmem:[#allocation8 + $0x34] ss:$12 sps:$4 sm:$0xff]   ;;  %v6809_v23 = vld [vmem:[#allocation8 + $0x138] ss:$12 sps:$4 sm:$0xff]  }
 0xc45   : > { %v6369_v33 = vpack.i.bf16 %v4315_v24, %v4314_v63  ;;  %v4313_v37 = vmul.f32 %v7000_v43, %v4288_v60  ;;  %4981 = vmatprep.subr.bf16.mxu0 %v6788_v29  ;;  %v6795_v63 = vld [vmem:[#allocation8 + $0x1c] ss:$12 sps:$4 sm:$0xff]   ;;  %v6816_v29 = vld [vmem:[#allocation8 + $0x124] ss:$12 sps:$4 sm:$0xff]  }
 0xc46   : > { %v6802_v24 = vld [vmem:[#allocation8 + $0x170] ss:$12 sps:$4 sm:$0xff]  }
 0xc47   : > { %6370 = vrot.lane.b32.xlu0 %v6369_v33, %s7221_s21  ;;  %v6374_v5 = vpack.i.bf16 %v4313_v37, %v4312_v35  ;;  %5947 = vmatprep.subr.bf16.mxu1 %v6802_v24  ;;  %v8854_v43 = vld [vmem:[#allocation40_spill] sm:$0xff]  ;;  %v6796_v33 = vld [vmem:[#allocation8] ss:$12 sps:$4 sm:$0xff]  }
 0xc48   : > { %4982 = vmatpush1.bf16.msra.mxu0 %v6786_v50  ;;  %v3255_v60 = vsel %vm2439_vm0, %v8854_v43, 0.0  ;;  %v6801_v37 = vld [vmem:[#allocation8 + $0x16c] ss:$12 sps:$4 sm:$0xff]   ;;  %v6806_v35 = vld [vmem:[#allocation8 + $0x154] ss:$12 sps:$4 sm:$0xff]  }
 0xc49   : > { %4983 = vmatprep.subr.bf16.mxu0 %v6792_v47  ;;  %v6814_v50 = vld [vmem:[#allocation8 + $0x120] ss:$12 sps:$4 sm:$0xff]   ;;  %v6824_v24 = vld [vmem:[#allocation8 + $0xf0] ss:$12 sps:$4 sm:$0xff]  }
 0xc4a   : > { %v6821_v47 = vld [vmem:[#allocation8 + $0x10c] ss:$12 sps:$4 sm:$0xff]  }
 0xc4b   : > { %6375 = vrot.lane.b32.xlu0 %v6374_v5, %s7221_s21  ;;  %v8856_v5 = vld [vmem:[#allocation22_spill] sm:$0xff] }
 0xc4c   : > { %4984 = vmatpush1.bf16.msra.mxu0 %v6790_v40  ;;  %v2606_v48 = vsel %vm2439_vm0, %v8856_v5, 0.0  ;;  %v6819_v40 = vld [vmem:[#allocation8 + $0x108] ss:$12 sps:$4 sm:$0xff]  }
 0xc4d   : > { %4985 = vmatprep.subr.bf16.mxu0 %v6795_v63  ;;  %v6826_v63 = vld [vmem:[#allocation8 + $0xf4] ss:$12 sps:$4 sm:$0xff]  }
 0xc50   : > { %4986 = vmatpush1.bf16.msra.mxu0 %v6793_v46 }
 0xc51   : > { %4987 = vmatprep.subr.bf16.mxu0 %v6798_v57 }
 0xc54   : > { %4988 = vmatpush1.bf16.msra.mxu0 %v6796_v33 }
 0xc55   : > { %4989 = vmatprep.subr.bf16.mxu0 %v6801_v37 }
 0xc58   : > { %4990 = vmatpush2.bf16.msra.mxu0 %v6799_v18 }
 0xc59   : > { %4991 = vmatprep.subr.bf16.mxu0 %v6806_v35 }
 0xc5c   : > { %4992 = vmatpush2.bf16.msra.mxu0 %v6804_v17 }
 0xc5d   : > { %4993 = vmatprep.subr.bf16.mxu0 %v6811_v10  ;;  %v6803_v10 = vld [vmem:[#allocation8 + $0xb0] ss:$12 sps:$4 sm:$0xff]  }
 0xc5e   : > { %3256 = vadd.xlane.f32.xlu1 %v3255_v60 }
 0xc60   : > { %4994 = vmatpush2.bf16.msra.mxu0 %v6809_v23  ;;  %v6807_v23 = vld [vmem:[#allocation8 + $0x158] ss:$12 sps:$4 sm:$0xff]  }
 0xc61   : > { %4995 = vmatprep.subr.bf16.mxu0 %v6816_v29 }
 0xc62   : > { %3259 = vadd.xlane.f32.xlu1 %v3258_v32 }
 0xc64   : > { %4996 = vmatpush2.bf16.msra.mxu0 %v6814_v50 }
 0xc65   : > { %4997 = vmatprep.subr.bf16.mxu0 %v6821_v47 }
 0xc68   : > { %4998 = vmatpush2.bf16.msra.mxu0 %v6819_v40 }
 0xc69   : > { %4999 = vmatprep.subr.bf16.mxu0 %v6826_v63 }
 0xc6a   : > { %2607 = vadd.xlane.f32.xlu0 %v2606_v48 }
 0xc6c   : > { %5000 = vmatpush2.bf16.msra.mxu0 %v6824_v24 }
 0xc6d   : > { %5001 = vmatprep.subr.bf16.mxu0 %v6831_v30 }
 0xc70   : > { %5002 = vmatpush2.bf16.msra.mxu0 %v6829_v45  ;;  %v8860_v45 = vld [vmem:[#allocation50_spill] sm:$0xff] }
 0xc73   : > { %6380 = vrot.lane.b32.xlu1 %v6379_v12, %s7221_s21  ;;  %v6836_v12 = vld [vmem:[#allocation8 + $0xc4] ss:$12 sps:$4 sm:$0xff]  }
 0xc74   : > { %5003 = vmatprep.subr.bf16.mxu0 %v6836_v12 }
 0xc75   : > { %5004 = vmatpush2.bf16.msra.mxu0 %v6834_v0 }
 0xc77   : > { %6385 = vrot.lane.b32.xlu1 %v6384_v22, %s7221_s21  ;;  %v8487_v22 = vld [vmem:[#allocation8 + $0x230] ss:$12 sps:$4 sm:$0xff]  }
 0xc78   : > { %6215 = vmatprep.subr.bf16.mxu0 %v8487_v22 }
 0xc7b   : > { %6395 = vrot.lane.b32.xlu1 %v6394_v2, %s7221_s21 }
 0xc7f   : > { %6400 = vrot.lane.b32.xlu1 %v6399_v59, %s7221_s21  ;;  %v7006_v59 = vpop.eup %7005 }
 0xc80   : > { %6390 = vrot.lane.b32.xlu0 %v6389_v9, %s7221_s21  ;;  %v3909_v9 = vpop.xlane.xlu0 %3908  ;;  %v7008_v27 = vpop.eup %7007  ;;  %v4005_v55 = vmul.f32 %v7006_v59, %v8193_v53 }
 0xc81   : > { %7013 = vrcp.f32 %v3909_v9  ;;  %v7010_v13 = vpop.eup %7009  ;;  %v4004_v62 = vmul.f32 %v7008_v27, %v8189_v20 }
 0xc82   : > { %7015 = vrcp.f32 %v8427_v14  ;;  %v4003_v11 = vmul.f32 %v7010_v13, %v8195_v49  ;;  %v7012_v15 = vpop.eup %7011  ;;  %v6817_v13 = vld [vmem:[#allocation8 + $0x128] ss:$12 sps:$4 sm:$0xff]  }
 0xc83   : > { %6405 = vrot.lane.b32.xlu1 %v8857_v16, %s7221_s21  ;;  %7017 = vrcp.f32 %v3903_v36  ;;  %v4009_v17 = vmul.f32 %v7012_v15, %v8201_v39  ;;  %v8861_v16 = vmov 0  }
 0xc84   : > { %v8502_v54 = vpop.xlane.xlu0 %2592  ;;  %7019 = vrcp.f32 %v8431_v8 }
 0xc85   : > { %7021 = vrcp.f32 %v8433_v6 }
 0xc86   : > { %7023 = vrcp.f32 %v8435_v41  ;;  %v8862_v41 = vld [vmem:[#allocation26_spill] sm:$0xff] }
 0xc87   : > { %6410 = vrot.lane.b32.xlu1 %v8858_v58, %s7221_s21  ;;  %v6808_v58 = vld [vmem:[#allocation8 + $0x98] ss:$12 sps:$4 sm:$0xff]   ;;  %7025 = vrcp.f32 %v8437_v3 }
 0xc88   : > { %v8504_v2 = vpop.xlane.xlu0 %3244  ;;  %7027 = vrcp.f32 %v8502_v54 }
 0xc89   : > { %7029 = vrcp.f32 %v8441_v61  ;;  %v8863_v61 = vld [vmem:[#allocation28_spill] sm:$0xff] }
 0xc8a   : > { %7031 = vrcp.f32 %v8504_v2 }
 0xc8b   : > { %6415 = vrot.lane.b32.xlu1 %v8859_v38, %s7221_s21  ;;  %v6812_v38 = vld [vmem:[#allocation8 + $0x140] ss:$12 sps:$4 sm:$0xff]  }
 0xc8c   : > { %v8509_v4 = vpop.xlane.xlu0 %3247 }
 0xc8d   : > { %7033 = vrcp.f32 %v8509_v4 }
 0xc8e   : > { %v7014_v49 = vpop.eup %7013  ;;  %7035 = vrcp.f32 %v8443_v56 }
 0xc8f   : > { %v7016_v32 = vpop.eup %7015  ;;  %v4008_v35 = vmul.f32 %v7014_v49, %v8197_v42  ;;  %7037 = vrcp.f32 %v8445_v31 }
 0xc90   : > { %v7018_v29 = vpop.eup %7017  ;;  %v4007_v39 = vmul.f32 %v7016_v32, %v8860_v45  ;;  %7039 = vrcp.f32 %v8449_v34 }
 0xc91   : > { %v4006_v42 = vmul.f32 %v7018_v29, %v8199_v26  ;;  %v6813_v26 = vld [vmem:[#allocation8 + $0x80] ss:$12 sps:$4 sm:$0xff]   ;;  %7041 = vrcp.f32 %v8451_v44 }
 0xc92   : > { %7043 = vrcp.f32 %v8506_v19  ;;  %v8866_v29 = vld [vmem:[#allocation25_spill] sm:$0xff] }
 0xcac   : > { %v6361_v28 = vpop.permute.xlu1 %6360 }
 0xcad   : > { %v6363_v52 = vunpack.i.h.bf16 %v6361_v28  ;;  %v6362_v51 = vunpack.i.l.bf16 %v6361_v28  ;;  %v6818_v28 = vld [vmem:[#allocation8 + $0x68] ss:$12 sps:$4 sm:$0xff]  }
 0xcae   : > { %v6366_v21 = vpop.permute.xlu0 %6365 }
 0xcaf   : > { %v4351_v46 = vsel %vm2439_vm0, %v4005_v55, %v6363_v52  ;;  %v4350_v57 = vsel %vm2439_vm0, %v4004_v62, %v6362_v51  ;;  %v6368_v43 = vunpack.i.h.bf16 %v6366_v21  ;;  %v6367_v60 = vunpack.i.l.bf16 %v6366_v21  ;;  %v6822_v62 = vld [vmem:[#allocation8 + $0x110] ss:$12 sps:$4 sm:$0xff]   ;;  %v6827_v51 = vld [vmem:[#allocation8 + $0xf8] ss:$12 sps:$4 sm:$0xff]   ;;  %v6833_v21 = vld [vmem:[#allocation8 + $0x20] ss:$12 sps:$4 sm:$0xff]  }
 0xcb0   : > { %v5794_v14 = vpack.c.bf16 %v4351_v46, %v4351_v46  ;;  %v5793_v33 = vpack.c.bf16 %v4350_v57, %v4350_v57  ;;  %v6823_v55 = vld [vmem:[#allocation8 + $0x50] ss:$12 sps:$4 sm:$0xff]   ;;  %v6837_v57 = vld [vmem:[#allocation8 + $0xc8] ss:$12 sps:$4 sm:$0xff]  }
 0xcb1   : > { %v4349_v20 = vsel %vm2439_vm0, %v4003_v11, %v6368_v43  ;;  %v4348_v53 = vsel %vm2439_vm0, %v4002_v7, %v6367_v60  ;;  %v6828_v7 = vld [vmem:[#allocation8 + $0x38] ss:$12 sps:$4 sm:$0xff]   ;;  %v6832_v11 = vld [vmem:[#allocation8 + $0xe0] ss:$12 sps:$4 sm:$0xff]   ;;  %v6838_v43 = vld [vmem:[#allocation8 + $0x8] ss:$12 sps:$4 sm:$0xff]  }
 0xcb2   : > { %4391 = vst [vmem:[#allocation2 + $0x2c] sm:$0xf] %v5794_v14  ;;  %4390 = vst [vmem:[#allocation2 + $0x20] sm:$0xf] %v5793_v33  ;;  %v5792_v37 = vpack.c.bf16 %v4349_v20, %v4349_v20  ;;  %v5791_v1 = vpack.c.bf16 %v4348_v53, %v4348_v53  ;;  %v7020_v33 = vpop.eup %7019 }
 0xcb3   : > { %v7022_v8 = vpop.eup %7021  ;;  %v2698_v3 = vmul.f32 %v7020_v33, %v8862_v41  ;;  %v8871_v33 = vld [vmem:[#allocation32_spill] sm:$0xff] }
 0xcb4   : > { %4389 = vst [vmem:[#allocation2 + $0x14] sm:$0xf] %v5792_v37  ;;  %4388 = vst [vmem:[#allocation2 + $0x8] sm:$0xf] %v5791_v1  ;;  %v7024_v6 = vpop.eup %7023  ;;  %v2699_v2 = vmul.f32 %v7022_v8, %v8863_v61 }
 0xcb5   : > { %v7026_v20 = vpop.eup %7025 }
 0xcb6   : > { %v7028_v37 = vpop.eup %7027 }
 0xcb7   : > { %v7030_v56 = vpop.eup %7029 }
 0xcb8   : > { %v7032_v15 = vpop.eup %7031 }
 0xcb9   : > { %v6371_v18 = vpop.permute.xlu0 %6370  ;;  %v8532_v27 = vld [vmem:[#allocation2 + $0x20] ss:$12 sps:$4 sm:$0xff]   ;;  %v7034_v44 = vpop.eup %7033 }
 0xcba   : > { %v6373_v5 = vunpack.i.h.bf16 %v6371_v18  ;;  %v6372_v48 = vunpack.i.l.bf16 %v6371_v18  ;;  %v8864_v18 = vld [vmem:[#allocation42_spill] sm:$0xff] }
 0xcbb   : > { %v8522_v50 = vld [vmem:[#allocation2 + $0x8] ss:$12 sps:$4 sm:$0xff]  }
 0xcbc   : > { %v4355_v47 = vsel %vm2439_vm0, %v4009_v17, %v6373_v5  ;;  %v4354_v40 = vsel %vm2439_vm0, %v4008_v35, %v6372_v48  ;;  %5079 = vmatmul.mubr.bf16.vlgmr.msra.gmra.mxu1 %v8522_v50  ;;  %v3350_v35 = vmul.f32 %v7024_v6, %v8864_v18  ;;  %v8865_v5 = vld [vmem:[#allocation44_spill] sm:$0xff] }
 0xcbd   : > { %v5798_v63 = vpack.c.bf16 %v4355_v47, %v4355_v47  ;;  %v5797_v24 = vpack.c.bf16 %v4354_v40, %v4354_v40  ;;  %v6376_v30 = vpop.permute.xlu0 %6375  ;;  %5088 = vmatprep.mubr.bf16.mxu1 %v8861_v16  ;;  %5948 = vmatpush3.bf16.msra.mxu1 %v6803_v10  ;;  %v3351_v48 = vmul.f32 %v7026_v20, %v8865_v5  ;;  %v8867_v40 = vld [vmem:[#allocation27_spill] sm:$0xff] }
 0xcbe   : > { %v6378_v12 = vunpack.i.h.bf16 %v6376_v30  ;;  %v6377_v0 = vunpack.i.l.bf16 %v6376_v30  ;;  %5949 = vmatprep.subr.bf16.mxu1 %v6807_v23  ;;  %v2700_v47 = vmul.f32 %v7028_v37, %v8866_v29  ;;  %v8868_v30 = vld [vmem:[#allocation41_spill] sm:$0xff]  ;;  %v8872_v37 = vld [vmem:[#allocation46_spill] sm:$0xff] }
 0xcbf   : > { %4395 = vst [vmem:[#allocation2 + $0x5c] sm:$0xf] %v5798_v63  ;;  %4394 = vst [vmem:[#allocation2 + $0x50] sm:$0xf] %v5797_v24  ;;  %v2701_v63 = vmul.f32 %v7030_v56, %v8867_v40 }
 0xcc0   : > { %v4353_v36 = vsel %vm2439_vm0, %v4007_v39, %v6378_v12  ;;  %v4352_v9 = vsel %vm2439_vm0, %v4006_v42, %v6377_v0  ;;  %v3352_v42 = vmul.f32 %v7032_v15, %v8868_v30  ;;  %v8869_v0 = vld [vmem:[#allocation43_spill] sm:$0xff] }
 0xcc1   : > { %v5796_v25 = vpack.c.bf16 %v4353_v36, %v4353_v36  ;;  %v5795_v59 = vpack.c.bf16 %v4352_v9, %v4352_v9  ;;  %5950 = vmatpush3.bf16.msra.mxu1 %v6808_v58 }
 0xcc2   : > { %5951 = vmatprep.subr.bf16.mxu1 %v6812_v38  ;;  %v7036_v38 = vpop.eup %7035 }
 0xcc3   : > { %4393 = vst [vmem:[#allocation2 + $0x44] sm:$0xf] %v5796_v25  ;;  %4392 = vst [vmem:[#allocation2 + $0x38] sm:$0xf] %v5795_v59 }
 0xcc4   : > { %5089 = vmatmul.mubr.bf16.gmra.mxu1 %v8532_v27 }
 0xcc5   : > { %5098 = vmatprep.mubr.bf16.mxu1 %v8861_v16  ;;  %5952 = vmatpush3.bf16.msra.mxu1 %v6813_v26  ;;  %v7038_v26 = vpop.eup %7037 }
 0xcc6   : > { %5953 = vmatprep.subr.bf16.mxu1 %v6817_v13  ;;  %v8540_v46 = vld [vmem:[#allocation2 + $0x50] ss:$12 sps:$4 sm:$0xff]   ;;  %v2703_v8 = vmul.f32 %v7038_v26, %v8871_v33  ;;  %v6858_v33 = vld [vmem:[#allocation8 + $0x188] ss:$12 sps:$4 sm:$0xff]  }
 0xcc9   : > { %5954 = vmatpush3.bf16.msra.mxu1 %v6818_v28 }
 0xcca   : > { %v8536_v52 = vld [vmem:[#allocation2 + $0x38] ss:$12 sps:$4 sm:$0xff]   ;;  %5955 = vmatprep.subr.bf16.mxu1 %v6822_v62 }
 0xccc   : > { %5099 = vmatmul.mubr.bf16.gmra.mxu1 %v8536_v52 }
 0xccd   : > { %5108 = vmatprep.mubr.bf16.mxu1 %v8861_v16  ;;  %5956 = vmatpush3.bf16.msra.mxu1 %v6823_v55  ;;  %v3353_v16 = vmul.f32 %v7034_v44, %v8869_v0  ;;  %v6846_v44 = vld [vmem:[#allocation8 + $0x218] ss:$12 sps:$4 sm:$0xff]  }
 0xcce   : > { %5957 = vmatprep.subr.bf16.mxu1 %v6827_v51 }
 0xcd1   : > { %5958 = vmatpush3.bf16.msra.mxu1 %v6828_v7 }
 0xcd2   : > { %5959 = vmatprep.subr.bf16.mxu1 %v6832_v11 }
 0xcd4   : > { %5109 = vmatmul.mubr.bf16.gmra.mxu1 %v8540_v46 }
 0xcd5   : > { %5960 = vmatpush3.bf16.msra.mxu1 %v6833_v21 }
 0xcd6   : > { %5961 = vmatprep.subr.bf16.mxu1 %v6837_v57 }
 0xcd9   : > { %5962 = vmatpush3.bf16.msra.mxu1 %v6838_v43  ;;  %v7040_v43 = vpop.eup %7039 }
 0xcda   : > { %6239 = vmatprep.subr.bf16.mxu1 %v8487_v22  ;;  %v3354_v56 = vmul.f32 %v7040_v43, %v8872_v37 }
 0xce7   : > { %v3257_v60 = vpop.xlane.xlu1 %3256 }
 0xceb   : > { %v3260_v14 = vpop.xlane.xlu1 %3259 }
 0xcef   : > { %v6381_v54 = vpop.permute.xlu1 %6380 }
 0xcf0   : > { %v6383_v4 = vunpack.i.h.bf16 %v6381_v54  ;;  %v6382_v53 = vunpack.i.l.bf16 %v6381_v54 }
 0xcf2   : > { %v3045_v1 = vsel %vm2439_vm0, %v2699_v2, %v6383_v4  ;;  %v3044_v31 = vsel %vm2439_vm0, %v2698_v3, %v6382_v53  ;;  %v7042_v3 = vpop.eup %7041 }
 0xcf3   : > { %v5776_v34 = vpack.c.bf16 %v3045_v1, %v3045_v1  ;;  %v5775_v49 = vpack.c.bf16 %v3044_v31, %v3044_v31  ;;  %v2608_v32 = vpop.xlane.xlu0 %2607  ;;  %v6386_v17 = vpop.permute.xlu1 %6385  ;;  %v8873_v1 = vld [vmem:[#allocation48_spill] sm:$0xff] }
 0xcf4   : > { %7045 = vrcp.f32 %v2608_v32  ;;  %v6388_v10 = vunpack.i.h.bf16 %v6386_v17  ;;  %v6387_v23 = vunpack.i.l.bf16 %v6386_v17  ;;  %v7044_v53 = vpop.eup %7043  ;;  %v3355_v31 = vmul.f32 %v7042_v3, %v8873_v1 }
 0xcf5   : > { %3085 = vst [vmem:[#allocation2 + $0xc] sm:$0xf] %v5776_v34  ;;  %3084 = vst [vmem:[#allocation2] sm:$0xf] %v5775_v49  ;;  %7047 = vrcp.f32 %v3257_v60  ;;  %v8870_v60 = vld [vmem:[#allocation30_spill] sm:$0xff] }
 0xcf6   : > { %v3697_v19 = vsel %vm2439_vm0, %v3351_v48, %v6388_v10  ;;  %v3696_v24 = vsel %vm2439_vm0, %v3350_v35, %v6387_v23  ;;  %7049 = vrcp.f32 %v3260_v14  ;;  %v2702_v14 = vmul.f32 %v7036_v38, %v8870_v60  ;;  %v8876_v38 = vld [vmem:[#allocation45_spill] sm:$0xff] }
 0xcf7   : > { %v5784_v45 = vpack.c.bf16 %v3697_v19, %v3697_v19  ;;  %v5783_v39 = vpack.c.bf16 %v3696_v24, %v3696_v24  ;;  %v6391_v12 = vpop.permute.xlu0 %6390  ;;  %v6396_v58 = vpop.permute.xlu1 %6395  ;;  %v6857_v60 = vld [vmem:[#allocation8 + $0x1a0] ss:$12 sps:$4 sm:$0xff]  }
 0xcf8   : > { %v6393_v36 = vunpack.i.h.bf16 %v6391_v12  ;;  %v6392_v9 = vunpack.i.l.bf16 %v6391_v12  ;;  %v6398_v25 = vunpack.i.h.bf16 %v6396_v58  ;;  %v6397_v59 = vunpack.i.l.bf16 %v6396_v58  ;;  %v6847_v12 = vld [vmem:[#allocation8 + $0x200] ss:$12 sps:$4 sm:$0xff]  }
 0xcf9   : > { %3737 = vst [vmem:[#allocation2 + $0x10] sm:$0xf] %v5784_v45  ;;  %3736 = vst [vmem:[#allocation2 + $0x4] sm:$0xf] %v5783_v39 }
 0xcfa   : > { %v3047_v13 = vsel %vm2439_vm0, %v2701_v63, %v6393_v36  ;;  %v3046_v28 = vsel %vm2439_vm0, %v2700_v47, %v6392_v9  ;;  %v3699_v62 = vsel %vm2439_vm0, %v3353_v16, %v6398_v25  ;;  %v3698_v55 = vsel %vm2439_vm0, %v3352_v42, %v6397_v59  ;;  %v8874_v47 = vld [vmem:[#allocation29_spill] sm:$0xff]  ;;  %v8875_v63 = vld [vmem:[#allocation31_spill] sm:$0xff] }
 0xcfb   : > { %v5778_v51 = vpack.c.bf16 %v3047_v13, %v3047_v13  ;;  %v5777_v7 = vpack.c.bf16 %v3046_v28, %v3046_v28  ;;  %v5786_v11 = vpack.c.bf16 %v3699_v62, %v3699_v62  ;;  %v5785_v21 = vpack.c.bf16 %v3698_v55, %v3698_v55  ;;  %v6401_v57 = vpop.permute.xlu1 %6400  ;;  %v8877_v9 = vld [vmem:[#allocation47_spill] sm:$0xff] }
 0xcfc   : > { %v6403_v6 = vunpack.i.h.bf16 %v6401_v57  ;;  %v6402_v41 = vunpack.i.l.bf16 %v6401_v57  ;;  %v6839_v49 = vld [vmem:[#allocation2] ss:$12 sps:$4 sm:$0xff]   ;;  %v2704_v40 = vmul.f32 %v7044_v53, %v8874_v47  ;;  %v6851_v62 = vld [vmem:[#allocation8 + $0x1e8] ss:$12 sps:$4 sm:$0xff]   ;;  %v6856_v57 = vld [vmem:[#allocation8 + $0x1b8] ss:$12 sps:$4 sm:$0xff]  }
 0xcfd   : > { %3087 = vst [vmem:[#allocation2 + $0x24] sm:$0xf] %v5778_v51  ;;  %3086 = vst [vmem:[#allocation2 + $0x18] sm:$0xf] %v5777_v7 }
 0xcfe   : > { %3739 = vst [vmem:[#allocation2 + $0x28] sm:$0xf] %v5786_v11  ;;  %3738 = vst [vmem:[#allocation2 + $0x1c] sm:$0xf] %v5785_v21  ;;  %v3049_v54 = vsel %vm2439_vm0, %v2703_v8, %v6403_v6  ;;  %v3048_v20 = vsel %vm2439_vm0, %v2702_v14, %v6402_v41  ;;  %v6852_v11 = vld [vmem:[#allocation8 + $0x1d0] ss:$12 sps:$4 sm:$0xff]  }
 0xcff   : > { %v5780_v61 = vpack.c.bf16 %v3049_v54, %v3049_v54  ;;  %v5779_v2 = vpack.c.bf16 %v3048_v20, %v3048_v20  ;;  %v6406_v4 = vpop.permute.xlu1 %6405 }
 0xd00   : > { %v6408_v15 = vunpack.i.h.bf16 %v6406_v4  ;;  %v6407_v34 = vunpack.i.l.bf16 %v6406_v4  ;;  %v6841_v18 = vld [vmem:[#allocation2 + $0x4] ss:$12 sps:$4 sm:$0xff]  }
 0xd01   : > { %v7046_v32 = vpop.eup %7045  ;;  %3089 = vst [vmem:[#allocation2 + $0x3c] sm:$0xf] %v5780_v61  ;;  %3088 = vst [vmem:[#allocation2 + $0x30] sm:$0xf] %v5779_v2  ;;  %5005 = vmatprep.mubr.bf16.mxu0 %v6841_v18  ;;  %5151 = vmatprep.mubr.bf16.mxu1 %v6841_v18 }
 0xd02   : > { %v3701_v35 = vsel %vm2439_vm0, %v3355_v31, %v6408_v15  ;;  %v3700_v17 = vsel %vm2439_vm0, %v3354_v56, %v6407_v34  ;;  %v7048_v5 = vpop.eup %7047  ;;  %v2705_v19 = vmul.f32 %v7046_v32, %v8875_v63  ;;  %5006 = vmatmul.mubr.bf16.vlgmr.msra.gmra.mxu0 %v6839_v49  ;;  %5152 = vmatmul.mubr.bf16.vlgmr.msra.gmra.mxu1 %v6839_v49  ;;  %v8611_v31 = vld [vmem:[%s8739_s3] sm:$0x7] }
 0xd03   : > { %v5788_v48 = vpack.c.bf16 %v3701_v35, %v3701_v35  ;;  %v5787_v10 = vpack.c.bf16 %v3700_v17, %v3700_v17  ;;  %v6411_v23 = vpop.permute.xlu1 %6410  ;;  %v7050_v29 = vpop.eup %7049  ;;  %6216 = vmatpush3.bf16.msra.mxu0 %v8487_v22  ;;  %6247 = vmatpush3.bf16.msra.mxu1 %v8487_v22  ;;  %v3356_v36 = vmul.f32 %v7048_v5, %v8876_v38 }
 0xd04   : > { %v6413_v24 = vunpack.i.h.bf16 %v6411_v23  ;;  %v6412_v30 = vunpack.i.l.bf16 %v6411_v23  ;;  %6217 = vmatprep.subr.bf16.mxu0 %v6846_v44  ;;  %6240 = vmatprep.subr.bf16.mxu1 %v6846_v44  ;;  %v3357_v25 = vmul.f32 %v7050_v29, %v8877_v9  ;;  %v6843_v28 = vld [vmem:[#allocation2 + $0x18] ss:$12 sps:$4 sm:$0xff]  }
 0xd05   : > { %3741 = vst [vmem:[#allocation2 + $0x40] sm:$0xf] %v5788_v48  ;;  %3740 = vst [vmem:[#allocation2 + $0x34] sm:$0xf] %v5787_v10  ;;  %v6845_v42 = vld [vmem:[#allocation2 + $0x1c] ss:$12 sps:$4 sm:$0xff]  }
 0xd06   : > { %v3051_v45 = vsel %vm2439_vm0, %v2705_v19, %v6413_v24  ;;  %v3050_v39 = vsel %vm2439_vm0, %v2704_v40, %v6412_v30  ;;  %5015 = vmatprep.mubr.bf16.mxu0 %v6845_v42  ;;  %5159 = vmatprep.mubr.bf16.mxu1 %v6845_v42 }
 0xd07   : > { %v5782_v0 = vpack.c.bf16 %v3051_v45, %v3051_v45  ;;  %v5781_v16 = vpack.c.bf16 %v3050_v39, %v3050_v39  ;;  %v6416_v58 = vpop.permute.xlu1 %6415  ;;  %6218 = vmatpush3.bf16.msra.mxu0 %v6846_v44  ;;  %6248 = vmatpush3.bf16.msra.mxu1 %v6846_v44 }
 0xd08   : > { %v6418_v59 = vunpack.i.h.bf16 %v6416_v58  ;;  %v6417_v26 = vunpack.i.l.bf16 %v6416_v58  ;;  %6219 = vmatprep.subr.bf16.mxu0 %v6847_v12  ;;  %6241 = vmatprep.subr.bf16.mxu1 %v6847_v12  ;;  %v6848_v21 = vld [vmem:[#allocation2 + $0x30] ss:$12 sps:$4 sm:$0xff]  }
 0xd09   : > { %3091 = vst [vmem:[#allocation2 + $0x54] sm:$0xf] %v5782_v0  ;;  %3090 = vst [vmem:[#allocation2 + $0x48] sm:$0xf] %v5781_v16 }
 0xd0a   : > { %v3703_v22 = vsel %vm2439_vm0, %v3357_v25, %v6418_v59  ;;  %v3702_v13 = vsel %vm2439_vm0, %v3356_v36, %v6417_v26  ;;  %5016 = vmatmul.mubr.bf16.gmra.mxu0 %v6843_v28  ;;  %5160 = vmatmul.mubr.bf16.gmra.mxu1 %v6843_v28 }
 0xd0b   : > { %v5790_v55 = vpack.c.bf16 %v3703_v22, %v3703_v22  ;;  %v5789_v51 = vpack.c.bf16 %v3702_v13, %v3702_v13  ;;  %6220 = vmatpush3.bf16.msra.mxu0 %v6847_v12  ;;  %6249 = vmatpush3.bf16.msra.mxu1 %v6847_v12 }
 0xd0c   : > { %v6850_v7 = vld [vmem:[#allocation2 + $0x34] ss:$12 sps:$4 sm:$0xff]   ;;  %6221 = vmatprep.subr.bf16.mxu0 %v6851_v62  ;;  %6242 = vmatprep.subr.bf16.mxu1 %v6851_v62 }
 0xd0d   : > { %3743 = vst [vmem:[#allocation2 + $0x58] sm:$0xf] %v5790_v55  ;;  %3742 = vst [vmem:[#allocation2 + $0x4c] sm:$0xf] %v5789_v51  ;;  %5025 = vmatprep.mubr.bf16.mxu0 %v6850_v7  ;;  %5167 = vmatprep.mubr.bf16.mxu1 %v6850_v7 }
 0xd0f   : > { %6222 = vmatpush3.bf16.msra.mxu0 %v6851_v62  ;;  %6250 = vmatpush3.bf16.msra.mxu1 %v6851_v62 }
 0xd10   : > { %6223 = vmatprep.subr.bf16.mxu0 %v6852_v11  ;;  %6243 = vmatprep.subr.bf16.mxu1 %v6852_v11  ;;  %v6853_v14 = vld [vmem:[#allocation2 + $0x48] ss:$12 sps:$4 sm:$0xff]  }
 0xd12   : > { %5026 = vmatmul.mubr.bf16.gmra.mxu0 %v6848_v21  ;;  %5168 = vmatmul.mubr.bf16.gmra.mxu1 %v6848_v21 }
 0xd13   : > { %6224 = vmatpush3.bf16.msra.mxu0 %v6852_v11  ;;  %6251 = vmatpush3.bf16.msra.mxu1 %v6852_v11 }
 0xd14   : > { %v6855_v43 = vld [vmem:[#allocation2 + $0x4c] ss:$12 sps:$4 sm:$0xff]   ;;  %6225 = vmatprep.subr.bf16.mxu0 %v6856_v57  ;;  %6244 = vmatprep.subr.bf16.mxu1 %v6856_v57 }
 0xd15   : > { %5035 = vmatprep.mubr.bf16.mxu0 %v6855_v43  ;;  %5175 = vmatprep.mubr.bf16.mxu1 %v6855_v43 }
 0xd17   : > { %6226 = vmatpush3.bf16.msra.mxu0 %v6856_v57  ;;  %6252 = vmatpush3.bf16.msra.mxu1 %v6856_v57 }
 0xd18   : > { %6227 = vmatprep.subr.bf16.mxu0 %v6857_v60  ;;  %6245 = vmatprep.subr.bf16.mxu1 %v6857_v60 }
 0xd1a   : > { %5036 = vmatmul.mubr.bf16.gmra.mxu0 %v6853_v14  ;;  %5176 = vmatmul.mubr.bf16.gmra.mxu1 %v6853_v14 }
 0xd1b   : > { %6228 = vmatpush3.bf16.msra.mxu0 %v6857_v60  ;;  %6253 = vmatpush3.bf16.msra.mxu1 %v6857_v60 }
 0xd1c   : > { %6231 = vmatprep.mubr.bf16.mxu0 %v8522_v50  ;;  %6235 = vmatprep.mubr.bf16.mxu1 %v8536_v52 }
 0xd1d   : > { %6229 = vmatprep.subr.bf16.mxu0 %v6858_v33  ;;  %6246 = vmatprep.subr.bf16.mxu1 %v6858_v33 }
 0xd1f   : > { %6230 = vmatpush3.bf16.msra.mxu0 %v6858_v33  ;;  %6254 = vmatpush3.bf16.msra.mxu1 %v6858_v33 }
 0xd22   : > { %6232 = vmatmul.mubr.bf16.vlgmr.msra.gmra.mxu0 %v8532_v27  ;;  %6236 = vmatmul.mubr.bf16.vlgmr.msra.gmra.mxu1 %v8540_v46  ;;  %v8878_v46 = vld [vmem:[#allocation19_spill] sm:$0xff] }
 0xd23   : > { %v4512_v56 = vsub.s32 0, %v8878_v46  ;;  %v4516_v15 = vsub.s32 1, %v8878_v46 }
 0xd25   : > { %v8615_v34 = vrot.slane %v8611_v31, %v4512_v56  ;;  %v8621_v32 = vrot.slane %v8611_v31, %v4516_v15 }
 0xd7c   : > { %v5080_v8 = vpop.f32.mrf.mxu1 }
 0xd7e   : > { %v5082_v6 = vpop.f32.mrf.mxu1 }
 0xd80   : > { %v5084_v41 = vpop.f32.mrf.mxu1 }
 0xd82   : > { %v5086_v3 = vpop.f32.mrf.mxu1 }
 0xd84   : > { %v5090_v54 = vpop.f32.mrf.mxu1 }
 0xd86   : > { %v5092_v20 = vpop.f32.mrf.mxu1 }
 0xd88   : > { %v5094_v61 = vpop.f32.mrf.mxu1 }
 0xd8a   : > { %v5096_v2 = vpop.f32.mrf.mxu1 }
 0xd8c   : > { %v5100_v50 = vpop.f32.mrf.mxu1 }
 0xd8e   : > { %v8595_v4 = vpop.f32.mrf.mxu1 }
 0xd90   : > { %v8597_v52 = vpop.f32.mrf.mxu1 }
 0xd92   : > { %v8599_v53 = vpop.f32.mrf.mxu1 }
 0xd94   : > { %v8601_v37 = vpop.f32.mrf.mxu1 }
 0xd96   : > { %v8603_v27 = vpop.f32.mrf.mxu1 }
 0xd98   : > { %v8606_v1 = vpop.f32.mrf.mxu1 }
 0xd9a   : > { %v8617_v49 = vpop.f32.mrf.mxu1 }
 0xdc2   : > { %v5007_v18 = vpop.f32.mrf.mxu0  ;;  %v8623_v35 = vpop.f32.mrf.mxu1 }
 0xdc3   : > { %v5008_v17 = vadd.f32 %v5007_v18, %v8615_v34 }
 0xdc4   : > { %v5009_v44 = vpop.f32.mrf.mxu0  ;;  %v8626_v5 = vpop.f32.mrf.mxu1 }
 0xdc5   : > { %v5081_v48 = vadd.f32 %v5080_v8, %v5008_v17  ;;  %v5010_v10 = vadd.f32 %v5009_v44, %v8621_v32 }
 0xdc6   : > { %v5011_v23 = vpop.f32.mrf.mxu0  ;;  %v8629_v29 = vpop.f32.mrf.mxu1 }
 0xdc7   : > { %5249 = vst [vmem:[%s8631_s29] sm:$0xff] %v5081_v48  ;;  %v5083_v47 = vadd.f32 %v5082_v6, %v5010_v10  ;;  %v5012_v40 = vadd.f32 %v5011_v23, %v8615_v34  ;;  %v5965_v48 = vadd.f32 %v8626_v5, %v8623_v35 }
 0xdc8   : > { %v5013_v63 = vpop.f32.mrf.mxu0  ;;  %v8635_v19 = vpop.f32.mrf.mxu1 }
 0xdc9   : > { %5250 = vst [vmem:[%s8631_s29 + $0x8] sm:$0xff] %v5083_v47  ;;  %v5085_v24 = vadd.f32 %v5084_v41, %v5012_v40  ;;  %v5014_v30 = vadd.f32 %v5013_v63, %v8621_v32 }
 0xdca   : > { %v5017_v42 = vpop.f32.mrf.mxu0  ;;  %v5969_v45 = vpop.f32.mrf.mxu1 }
 0xdcb   : > { %5252 = vst [vmem:[%s8631_s29 + $0x18] sm:$0xff] %v5085_v24  ;;  %v5087_v39 = vadd.f32 %v5086_v3, %v5014_v30  ;;  %v5018_v12 = vadd.f32 %v5017_v42, %v8615_v34 }
 0xdcc   : > { %v5019_v0 = vpop.f32.mrf.mxu0  ;;  %v5970_v16 = vpop.f32.mrf.mxu1 }
 0xdcd   : > { %5253 = vst [vmem:[%s8631_s29 + $0x20] sm:$0xff] %v5087_v39  ;;  %v5091_v58 = vadd.f32 %v5090_v54, %v5018_v12  ;;  %v5020_v38 = vadd.f32 %v5019_v0, %v8621_v32  ;;  %v5971_v56 = vadd.f32 %v5970_v16, %v5969_v45 }
 0xdce   : > { %v5021_v36 = vpop.f32.mrf.mxu0  ;;  %v5972_v9 = vpop.f32.mrf.mxu1 }
 0xdcf   : > { %5255 = vst [vmem:[%s8631_s29 + $0x30] sm:$0xff] %v5091_v58  ;;  %v5093_v25 = vadd.f32 %v5092_v20, %v5020_v38  ;;  %v5022_v59 = vadd.f32 %v5021_v36, %v8615_v34 }
 0xdd0   : > { %v5023_v26 = vpop.f32.mrf.mxu0  ;;  %v5973_v22 = vpop.f32.mrf.mxu1 }
 0xdd1   : > { %5256 = vst [vmem:[%s8631_s29 + $0x38] sm:$0xff] %v5093_v25  ;;  %v5095_v13 = vadd.f32 %v5094_v61, %v5022_v59  ;;  %v5024_v28 = vadd.f32 %v5023_v26, %v8621_v32  ;;  %v5974_v63 = vadd.f32 %v5973_v22, %v5972_v9 }
 0xdd2   : > { %v5027_v62 = vpop.f32.mrf.mxu0  ;;  %v5975_v55 = vpop.f32.mrf.mxu1 }
 0xdd3   : > { %5258 = vst [vmem:[%s8631_s29 + $0x48] sm:$0xff] %v5095_v13  ;;  %v5097_v51 = vadd.f32 %v5096_v2, %v5024_v28  ;;  %v5028_v7 = vadd.f32 %v5027_v62, %v8615_v34  ;;  %v4520_v2 = vsub.s32 2, %v8878_v46 }
 0xdd4   : > { %v5029_v11 = vpop.f32.mrf.mxu0  ;;  %v5976_v21 = vpop.f32.mrf.mxu1 }
 0xdd5   : > { %5259 = vst [vmem:[%s8631_s29 + $0x50] sm:$0xff] %v5097_v51  ;;  %v5101_v57 = vadd.f32 %v5100_v50, %v5028_v7  ;;  %v5030_v43 = vadd.f32 %v5029_v11, %v8621_v32  ;;  %v5977_v46 = vadd.f32 %v5976_v21, %v5975_v55 }
 0xdd6   : > { %v5031_v60 = vpop.f32.mrf.mxu0  ;;  %v5978_v14 = vpop.f32.mrf.mxu1 }
 0xdd7   : > { %5261 = vst [vmem:[%s8631_s29 + $0x60] sm:$0xff] %v5101_v57  ;;  %v5103_v33 = vadd.f32 %v8595_v4, %v5030_v43  ;;  %v5032_v8 = vadd.f32 %v5031_v60, %v8615_v34 }
 0xdd8   : > { %v5033_v6 = vpop.f32.mrf.mxu0  ;;  %v5979_v41 = vpop.f32.mrf.mxu1 }
 0xdd9   : > { %5262 = vst [vmem:[%s8631_s29 + $0x68] sm:$0xff] %v5103_v33  ;;  %v5105_v3 = vadd.f32 %v8597_v52, %v5032_v8  ;;  %v5034_v54 = vadd.f32 %v5033_v6, %v8621_v32  ;;  %v5980_v0 = vadd.f32 %v5979_v41, %v5978_v14 }
 0xdda   : > { %v5037_v20 = vpop.f32.mrf.mxu0  ;;  %v5981_v61 = vpop.f32.mrf.mxu1 }
 0xddb   : > { %5264 = vst [vmem:[%s8631_s29 + $0x78] sm:$0xff] %v5105_v3  ;;  %v5107_v50 = vadd.f32 %v8599_v53, %v5034_v54  ;;  %v5038_v4 = vadd.f32 %v5037_v20, %v8615_v34  ;;  %v4521_v53 = vrot.slane %v8611_v31, %v4520_v2 }
 0xddc   : > { %v5039_v15 = vpop.f32.mrf.mxu0  ;;  %v5982_v18 = vpop.f32.mrf.mxu1 }
 0xddd   : > { %5265 = vst [vmem:[%s8631_s29 + $0x80] sm:$0xff] %v5107_v50  ;;  %v5111_v17 = vadd.f32 %v8601_v37, %v5038_v4  ;;  %v5040_v52 = vadd.f32 %v5039_v15, %v8621_v32  ;;  %v5983_v44 = vadd.f32 %v5982_v18, %v5981_v61  ;;  %v5162_v30 = vadd.f32 %v5971_v56, %v4521_v53 }
 0xdde   : > { %v5041_v10 = vpop.f32.mrf.mxu0  ;;  %v5984_v23 = vpop.f32.mrf.mxu1  ;;  %v5154_v39 = vadd.f32 %v5965_v48, %v4521_v53  ;;  %v5170_v12 = vadd.f32 %v5977_v46, %v4521_v53  ;;  %v5165_v36 = vadd.f32 %v5974_v63, %v4521_v53  ;;  %v5173_v13 = vadd.f32 %v5980_v0, %v4521_v53 }
 0xddf   : > { %5267 = vst [vmem:[%s8631_s29 + $0x90] sm:$0xff] %v5111_v17  ;;  %v5113_v47 = vadd.f32 %v8603_v27, %v5040_v52  ;;  %v5042_v40 = vadd.f32 %v5041_v10, %v8615_v34  ;;  %v5178_v31 = vadd.f32 %v5983_v44, %v4521_v53  ;;  %v5968_v27 = vadd.f32 %v8635_v19, %v8629_v29 }
 0xde0   : > { %v5043_v24 = vpop.f32.mrf.mxu0  ;;  %v5985_v37 = vpop.f32.mrf.mxu1 }
 0xde1   : > { %5268 = vst [vmem:[%s8631_s29 + $0x98] sm:$0xff] %v5113_v47  ;;  %v5115_v42 = vadd.f32 %v8606_v1, %v5042_v40  ;;  %v5044_v35 = vadd.f32 %v5043_v24, %v8621_v32  ;;  %v5986_v5 = vadd.f32 %v5985_v37, %v5984_v23  ;;  %v5157_v22 = vadd.f32 %v5968_v27, %v4521_v53 }
 0xde2   : > { %v6233_v34 = vpop.f32.mrf.mxu0  ;;  %v6237_v45 = vpop.f32.mrf.mxu1 }
 0xde3   : > { %5270 = vst [vmem:[%s8631_s29 + $0xa8] sm:$0xff] %v5115_v42  ;;  %v5117_v1 = vadd.f32 %v8617_v49, %v5044_v35  ;;  %v5227_v16 = vadd.f32 %v6233_v34, %v5162_v30  ;;  %v5243_v32 = vadd.f32 %v6237_v45, %v5178_v31  ;;  %v5181_v9 = vadd.f32 %v5986_v5, %v4521_v53 }
 0xde4   : > { %v5218_v58 = vpop.f32.mrf.mxu0  ;;  %v5234_v38 = vpop.f32.mrf.mxu1 }
 0xde5   : > { %5271 = vst [vmem:[%s8631_s29 + $0xb0] sm:$0xff] %v5117_v1  ;;  %5257 = vst [vmem:[%s8631_s29 + $0x40] sm:$0xff] %v5227_v16  ;;  %v5219_v29 = vadd.f32 %v5218_v58, %v5154_v39  ;;  %v5235_v19 = vadd.f32 %v5234_v38, %v5170_v12 }
 0xde6   : > { %5269 = vst [vmem:[%s8631_s29 + $0xa0] sm:$0xff] %v5243_v32  ;;  %v6234_v25 = vpop.f32.mrf.mxu0  ;;  %v6238_v49 = vpop.f32.mrf.mxu1 }
 0xde7   : > { %5251 = vst [vmem:[%s8631_s29 + $0x10] sm:$0xff] %v5219_v29  ;;  %5263 = vst [vmem:[%s8631_s29 + $0x70] sm:$0xff] %v5235_v19  ;;  %v5230_v59 = vadd.f32 %v6234_v25, %v5165_v36  ;;  %v5246_v26 = vadd.f32 %v6238_v49, %v5181_v9 }
 0xde8   : > { %v5221_v28 = vpop.f32.mrf.mxu0  ;;  %v5237_v62 = vpop.f32.mrf.mxu1 }
 0xde9   : > { %5260 = vst [vmem:[%s8631_s29 + $0x58] sm:$0xff] %v5230_v59  ;;  %5272 = vst [vmem:[%s8631_s29 + $0xb8] sm:$0xff] %v5246_v26  ;;  %v5222_v55 = vadd.f32 %v5221_v28, %v5157_v22  ;;  %v5238_v51 = vadd.f32 %v5237_v62, %v5173_v13 }
 0xdeb   : > { %5254 = vst [vmem:[%s8631_s29 + $0x28] sm:$0xff] %v5222_v55  ;;  %5266 = vst [vmem:[%s8631_s29 + $0x88] sm:$0xff] %v5238_v51 }
 0xdec   : > { %7156 = shalt.err (!%p7153_p9)
}
 0xded   : > { %s7157_s28 = scalar_lea.hbm %s8687_s5, 3072  ;;  %s7161_s23 = scalar_lea.hbm %s8740_s4, 6144 }
 0xdee   : > { %p7158_p13 = scmp.ne.s32.totalorder %s8687_s5, %s7157_s28  ;;  %p7162_p4 = scmp.lt.s32.totalorder %s8687_s5, %s8740_s4 }
 0xdef   : > { %p7163_p8 = scmp.lt.s32.totalorder %s7161_s23, %s7157_s28 }
 0xdf0   : > { %p7159_p5 = pnand %p7158_p13, %p8879_p10 }
 0xdf1   : > { %p7164_p7 = por %p7163_p8, %p7162_p4 }
 0xdf2   : > { %p7160_p0 = pneg %p7159_p5 }
 0xdf4   : > { %p7165_p11 = pnand %p7164_p7, %p7160_p0 }
 0xdf6   : > { %7168 = shalt.err (!%p7165_p11)
}
 0xdf7   : > { %s7223_s29 = smov 384   ;;  %s7224_s6 = smov 24  }
 0xdf8   : > { %6294 = dma.vmem_to_hbm [thread:$0]  (%p8879_p10), %s8689_s8, 3072, %s8687_s5, %s5274_s26, %s7223_s29, %s7223_s29, %s7224_s6  }
 0xdf9 PF: > { %s5302_s19 = sand.u32 1, %s7199_s15   ;;  %p8880_p1 = scmp.ne.s32.totalorder %s8760_s22, 0 }
 0xdfa   : > { %p8881_p2 = scmp.ge.s32.totalorder %s7211_s18, 2  ;;  %s5303_s11 = scalar_lea.sflag [#allocation5], %s5302_s19 }
 0xdfc   : > { %p6308_p6 = pnand %p8881_p2, %p8880_p1 }
 0xdfe   : > { %p6309_p12 = pneg %p6308_p6 }
 0xe00   : > { %7194 = dma.done.wait (%p6309_p12), %s5303_s11, 3072  }
 0xe01   : > { %7196 = vsyncadd (%p6309_p12), %s5303_s11, 4294964224  ;;  %p18_p3 = scmp.ge.s32.totalorder %s7325_s13, 4   ;;  %s8882_s15 = smov %s7203_s16 }
 0xe02   : > { %s8883_s16 = smov %s7207_s17  ;;  %s8884_s17 = smov %s7334_s24 }
 0xe03   : > { %s8885_s18 = smov %s7325_s13  ;;  %20 = sbr.rel (!%p18_p3) target bundleno = 6 (0x6), region = 89 }
 0xe08   :  { %5308 = vsyncpa [#allocation4], 1 }
 0xe09   :  { %5310 = vsyncpa [#allocation4 + $0x1], 1 }
 0xe0a   :  { %5311 = vsyncpa [#allocation7], 1 }
 0xe0b   :  { %5312 = vsyncpa [#allocation5], 1 }
 0xe0c   :  { %5314 = vsyncpa [#allocation5 + $0x1], 1 }

</bundles_post_ra>
